<compile_context>
chip_gen: v7x
topology: tpu7x:2x2x1
jax: 0.10.0
libtpu: 0.0.40
codegen_flags: <defaults>
</compile_context>

<pallas_src>
import math

import numpy as np
import jax
import jax.numpy as jnp
from jax.experimental import pallas as pl
from jax.experimental.pallas import tpu as pltpu


def _round_up(x, m):
    return -(-x // m) * m


# ----------------------------------------------------------------------------
# Host-side constants: group-membership matrices for GroupNorm broadcasts
# ----------------------------------------------------------------------------
def _membership_matrices(c, g):
    gs = c // g
    ch = np.arange(c)[:, None] // gs
    m = (ch == np.arange(g)[None, :]).astype(np.float32)       # (C, G)
    return m, m.T                                               # (C,G), (G,C)


# ----------------------------------------------------------------------------
# Host-side parameter packing: everything into two (rows, 128) f32 blobs
# ----------------------------------------------------------------------------
def _pack_params(pn_params, fin_params, train_corrmask):
    (w_f1, b_f1, g_f1, be_f1,
     w_f2, b_f2, g_f2, be_f2,
     w_f3, b_f3, g_f3, be_f3,
     w_h, b_h, g_h, be_h,
     w_y1f, w_y1g, b_y1, g_y1, be_y1,
     w_y2, b_y2, g_y2, be_y2,
     w_y, b_y) = pn_params

    gm64, gm64t = _membership_matrices(64, 2)
    gm128, gm128t = _membership_matrices(128, 4)

    mats = [("w_f1", w_f1), ("w_f2", w_f2), ("w_f3", w_f3), ("w_h", w_h),
            ("w_y1f", w_y1f), ("w_y1g", w_y1g), ("w_y2", w_y2), ("w_y", w_y),
            ("gm64", gm64), ("gm64t", gm64t),
            ("gm128", gm128), ("gm128t", gm128t)]
    vecs = [("b_f1", b_f1), ("g_f1", g_f1), ("be_f1", be_f1),
            ("b_f2", b_f2), ("g_f2", g_f2), ("be_f2", be_f2),
            ("b_f3", b_f3), ("g_f3", g_f3), ("be_f3", be_f3),
            ("b_h", b_h), ("g_h", g_h), ("be_h", be_h),
            ("b_y1", b_y1), ("g_y1", g_y1), ("be_y1", be_y1),
            ("b_y2", b_y2), ("g_y2", g_y2), ("be_y2", be_y2),
            ("b_y", b_y)]
    if train_corrmask:
        w1x, w1y, w1s, b1, w2, b2 = fin_params
        mats += [("fin_w1x", w1x), ("fin_w1y", w1y), ("fin_w2", w2)]
        vecs += [("fin_w1s", w1s), ("fin_b1", b1), ("fin_b2", b2)]

    # weight / membership blob: each block row-padded to a multiple of 8 rows,
    # lane-padded to 128, so every in-kernel read starts sublane-aligned.
    wlayout, wblocks, off = {}, [], 0
    for name, m in mats:
        m = jnp.asarray(m, jnp.float32)
        r, c = m.shape
        rp = _round_up(r, 8)
        wblocks.append(jnp.pad(m, ((0, rp - r), (0, 128 - c))))
        wlayout[name] = (off, r, c)
        off += rp
    wblob = jnp.concatenate(wblocks, axis=0)                    # (Rw, 128)

    # vector blob: one row per bias / gamma / beta
    vlayout, vblocks = {}, []
    for i, (name, v) in enumerate(vecs):
        v = jnp.asarray(v, jnp.float32).reshape(1, -1)
        c = v.shape[1]
        vblocks.append(jnp.pad(v, ((0, 0), (0, 128 - c))))
        vlayout[name] = (i, c)
    nrows = len(vblocks)
    pad = _round_up(nrows, 8) - nrows
    if pad:
        vblocks.append(jnp.zeros((pad, 128), jnp.float32))
    vblob = jnp.concatenate(vblocks, axis=0)                    # (Rv, 128)

    return wblob, vblob, wlayout, vlayout


# ----------------------------------------------------------------------------
# Fused CorrNet kernel (encoder for both clouds + corr-mask head)
# ----------------------------------------------------------------------------
def _build_corrnet_kernel(nv, npts, fout, wlayout, vlayout, train_corrmask):
    del fout  # shapes come from the layouts / out refs
    ntot = nv + npts

    def kernel(x_ref, w_ref, v_ref, feat_ref, *mask_refs):
        # --- static blob views (read at point of use; short live ranges) ----
        def W(name):
            off, r, c = wlayout[name]
            return w_ref[off:off + r, 0:c]

        def V(name):
            i, c = vlayout[name]
            return v_ref[i:i + 1, 0:c]

        # --- GroupNorm: matches torch.nn.GroupNorm (biased var, eps=1e-5) ---
        def gnorm(y, gamma, beta, groups, gmn, gmtn, eps=1e-5):
            n, c = y.shape
            if groups == 1:
                mean = jnp.mean(y, axis=1, keepdims=True)
                var = jnp.maximum(
                    jnp.mean(y * y, axis=1, keepdims=True) - mean * mean, 0.0)
                inv = jax.lax.rsqrt(var + eps)
                a_c, b_c = inv, -mean * inv
            else:
                gs = c // groups
                gm = W(gmn)                                    # (C, G)
                s1 = jnp.dot(y, gm, preferred_element_type=jnp.float32)
                s2 = jnp.dot(y * y, gm, preferred_element_type=jnp.float32)
                mean = s1 * (1.0 / gs)
                var = jnp.maximum(s2 * (1.0 / gs) - mean * mean, 0.0)
                inv = jax.lax.rsqrt(var + eps)                 # rsqrt on (N, G)
                # single (2N,G)x(G,C) broadcast-back instead of two matmuls
                ab = jnp.dot(jnp.concatenate([inv, -mean * inv], axis=0),
                             W(gmtn), preferred_element_type=jnp.float32)
                a_c, b_c = ab[:n], ab[n:]
            return (y * a_c + b_c) * gamma + beta

        def block(xin, wn, bn, gn, ben, groups, gmn=None, gmtn=None):
            pre = jnp.dot(xin, W(wn), preferred_element_type=jnp.float32) + V(bn)
            act = jnp.maximum(pre, 0.2 * pre)                  # LeakyReLU(0.2)
            return gnorm(act, V(gn), V(ben), groups, gmn, gmtn)

        x = x_ref[...]                                         # (Ntot, 3)

        # mlp_fi layer 1 (3 -> 32): K=3 matmul done as three VPU FMAs
        w1 = W("w_f1")                                         # (3, 32)
        pre = (x[:, 0:1] * w1[0:1, :] + x[:, 1:2] * w1[1:2, :]
               + x[:, 2:3] * w1[2:3, :] + V("b_f1"))
        act = jnp.maximum(pre, 0.2 * pre)
        f = gnorm(act, V("g_f1"), V("be_f1"), 1, None, None)   # (Ntot, 32)

        # mlp_fi layers 2-3, mlp_hi
        f = block(f, "w_f2", "b_f2", "g_f2", "be_f2", 2, "gm64", "gm64t")   # 64
        f = block(f, "w_f3", "b_f3", "g_f3", "be_f3", 4, "gm128", "gm128t") # 128
        h = block(f, "w_h", "b_h", "g_h", "be_h", 4, "gm128", "gm128t")     # 128

        # Per-cloud global max-pool; rows are padded with duplicates so the
        # static sublane-aligned slices are exact.
        g_v = jnp.max(h[:nv], axis=0, keepdims=True)           # (1, 128)
        g_p = jnp.max(h[nv:], axis=0, keepdims=True)           # (1, 128)

        # mlp_yi layer 1: Lin(256,128) on cat(f, g_expanded) as split matmul;
        # the g-part is per-cloud constant -> (1,128)x(128,128).
        w_y1g = W("w_y1g")
        gw_v = jnp.dot(g_v, w_y1g, preferred_element_type=jnp.float32)
        gw_p = jnp.dot(g_p, w_y1g, preferred_element_type=jnp.float32)
        pre_f = (jnp.dot(f, W("w_y1f"), preferred_element_type=jnp.float32)
                 + V("b_y1"))
        pre = jnp.concatenate([pre_f[:nv] + gw_v, pre_f[nv:] + gw_p], axis=0)
        act = jnp.maximum(pre, 0.2 * pre)
        t = gnorm(act, V("g_y1"), V("be_y1"), 4, "gm128", "gm128t")  # (Ntot,128)

        # mlp_yi layer 2: 128 -> 64
        t = block(t, "w_y2", "b_y2", "g_y2", "be_y2", 2, "gm64", "gm64t")

        # mlp_y: 64 -> F
        y = jnp.dot(t, W("w_y"), preferred_element_type=jnp.float32) + V("b_y")

        # F.normalize(p=2, dim=1)
        ss = jnp.sum(y * y, axis=1, keepdims=True)
        feat = y * jax.lax.rsqrt(jnp.maximum(ss, 1e-24))

        feat_ref[...] = feat                                   # single store slab

        if train_corrmask:
            mask_ref = mask_refs[0]
            vtx_f = feat[:nv]                                  # (Nv, F)
            pts_f = feat[nv:]                                  # (Np, F)
            sim = jax.lax.dot_general(vtx_f, pts_f, (((1,), (1,)), ((), ())),
                                      preferred_element_type=jnp.float32)
            max_val = jnp.max(sim, axis=1, keepdims=True)      # (Nv, 1)
            col = jax.lax.broadcasted_iota(jnp.int32, (nv, npts), 1)
            # first index achieving the row max (torch.argmax tie rule)
            idx = jnp.min(jnp.where(sim >= max_val, col, npts),
                          axis=1, keepdims=True)
            one_hot = (col == idx).astype(jnp.float32)
            # gather pts_feature[argmax] as one-hot matmul (fine at small N)
            y_mat = jnp.dot(one_hot, pts_f, preferred_element_type=jnp.float32)
            # mlp_fin: Lin(2F+1,64) on cat(x, y, sim) as split matmul, ReLU, Lin(64,1)
            pre1 = (jnp.dot(vtx_f, W("fin_w1x"), preferred_element_type=jnp.float32)
                    + jnp.dot(y_mat, W("fin_w1y"), preferred_element_type=jnp.float32)
                    + max_val * V("fin_w1s")
                    + V("fin_b1"))
            h1 = jnp.maximum(pre1, 0.0)
            mask_ref[...] = (jnp.dot(h1, W("fin_w2"),
                                     preferred_element_type=jnp.float32)
                             + V("fin_b2"))

    return kernel


# ----------------------------------------------------------------------------
# Wrapper: single pallas_call for the whole CorrNet forward
# ----------------------------------------------------------------------------
def corrnet_forward(vtx, pts, pn_params, fin_params, num_output_features,
                    train_corrmask=True):
    nv0, np0 = vtx.shape[0], pts.shape[0]
    fout = num_output_features
    nv, npts = _round_up(nv0, 8), _round_up(np0, 8)

    def pad_rows(a, target):
        pad = target - a.shape[0]
        if pad == 0:
            return a
        # replicate the first row: keeps max-pool / argmax semantics intact
        return jnp.concatenate(
            [a, jnp.broadcast_to(a[:1], (pad, a.shape[1]))], axis=0)

    # Stack the two (row-padded) point clouds so one kernel encodes both.
    x_all = jnp.concatenate([pad_rows(vtx, nv), pad_rows(pts, npts)], axis=0)

    wblob, vblob, wlayout, vlayout = _pack_params(pn_params, fin_params,
                                                  train_corrmask)

    out_shape = [jax.ShapeDtypeStruct((nv + npts, fout), jnp.float32)]
    if train_corrmask:
        out_shape.append(jax.ShapeDtypeStruct((nv, 1), jnp.float32))

    # Advisory cost estimate for the XLA scheduler.
    per_row = (3 * 32 + 32 * 64 + 64 * 128 + 128 * 128 + 128 * 128
               + 128 * 64 + 64 * fout)
    flops = 2 * (nv + npts) * per_row
    if train_corrmask:
        flops += 4 * nv * npts * fout + 2 * nv * (2 * fout * 64 + 64)
    transcendentals = (nv + npts) * 18
    bytes_accessed = 4 * (int(x_all.size) + int(wblob.size) + int(vblob.size)
                          + sum(int(np.prod(s.shape)) for s in out_shape))

    kernel = _build_corrnet_kernel(nv, npts, fout, wlayout, vlayout,
                                   train_corrmask)

    outs = pl.pallas_call(
        kernel,
        out_shape=tuple(out_shape),
        in_specs=[pl.BlockSpec(memory_space=pltpu.MemorySpace.VMEM)] * 3,
        out_specs=tuple(pl.BlockSpec(memory_space=pltpu.MemorySpace.VMEM)
                        for _ in out_shape),
        compiler_params=pltpu.CompilerParams(vmem_limit_bytes=32 * 1024 * 1024),
        cost_estimate=pl.CostEstimate(flops=int(flops),
                                      transcendentals=int(transcendentals),
                                      bytes_accessed=int(bytes_accessed)),
    )(x_all, wblob, vblob)

    feat = outs[0]
    vtx_feature = feat[:nv0]
    pts_feature = feat[nv:nv + np0]
    out_corrmask = outs[1][:nv0] if train_corrmask else None
    return vtx_feature, pts_feature, out_corrmask


# ----------------------------------------------------------------------------
# Deterministic parameter initialization (PyTorch-default-style uniform)
# ----------------------------------------------------------------------------
def _linear_init(key, fan_in, fan_out):
    bound = 1.0 / math.sqrt(fan_in)
    kw, kb = jax.random.split(key)
    # stored transposed to (in, out) so kernels compute x @ W + b
    w = jax.random.uniform(kw, (fan_in, fan_out), jnp.float32, -bound, bound)
    b = jax.random.uniform(kb, (1, fan_out), jnp.float32, -bound, bound)
    return w, b


def init_corrnet_params(key, num_output_features):
    keys = iter(jax.random.split(key, 16))

    def gn(c):
        return jnp.ones((1, c), jnp.float32), jnp.zeros((1, c), jnp.float32)

    pn = []
    # mlp_fi (3 blocks) + mlp_hi (1 block)
    for ci, co in [(3, 32), (32, 64), (64, 128), (128, 128)]:
        w, b = _linear_init(next(keys), ci, co)
        gam, bet = gn(co)
        pn += [w, b, gam, bet]
    # mlp_yi block 1: Lin(256, 128), weight split into f-part / g-part
    w, b = _linear_init(next(keys), 256, 128)
    gam, bet = gn(128)
    pn += [w[:128], w[128:], b, gam, bet]
    # mlp_yi block 2: Lin(128, 64)
    w, b = _linear_init(next(keys), 128, 64)
    gam, bet = gn(64)
    pn += [w, b, gam, bet]
    # mlp_y: Lin(64, num_output_features)
    w, b = _linear_init(next(keys), 64, num_output_features)
    pn += [w, b]

    # mlp_fin: Lin(2F+1, 64) -> ReLU -> Lin(64, 1); W1 pre-sliced into x/y/sim cols
    fout = num_output_features
    w1, b1 = _linear_init(next(keys), 2 * fout + 1, 64)
    w2, b2 = _linear_init(next(keys), 64, 1)
    fin = (w1[:fout], w1[fout:2 * fout], w1[2 * fout:], b1, w2, b2)
    return tuple(pn), fin


# ----------------------------------------------------------------------------
# Pure-JAX reference (correctness sanity check)
# ----------------------------------------------------------------------------
def _ref_groupnorm(x, gamma, beta, groups, eps=1e-5):
    n, c = x.shape
    xg = x.reshape(n, groups, c // groups)
    mean = xg.mean(axis=2, keepdims=True)
    var = xg.var(axis=2, keepdims=True)
    return ((xg - mean) / jnp.sqrt(var + eps)).reshape(n, c) * gamma + beta


def _ref_pointnet(x, pn):
    (w_f1, b_f1, g_f1, be_f1, w_f2, b_f2, g_f2, be_f2, w_f3, b_f3, g_f3, be_f3,
     w_h, b_h, g_h, be_h, w_y1f, w_y1g, b_y1, g_y1, be_y1,
     w_y2, b_y2, g_y2, be_y2, w_y, b_y) = pn

    def blk(x, w, b, gam, bet, groups):
        pre = x @ w + b
        return _ref_groupnorm(jnp.where(pre >= 0, pre, 0.2 * pre), gam, bet, groups)

    f = blk(x, w_f1, b_f1, g_f1, be_f1, 1)
    f = blk(f, w_f2, b_f2, g_f2, be_f2, 2)
    f = blk(f, w_f3, b_f3, g_f3, be_f3, 4)
    h = blk(f, w_h, b_h, g_h, be_h, 4)
    g = h.max(axis=0, keepdims=True)
    pre = f @ w_y1f + g @ w_y1g + b_y1
    t = _ref_groupnorm(jnp.where(pre >= 0, pre, 0.2 * pre), g_y1, be_y1, 4)
    t = blk(t, w_y2, b_y2, g_y2, be_y2, 2)
    y = t @ w_y + b_y
    norm = jnp.sqrt(jnp.sum(y * y, axis=1, keepdims=True))
    return y / jnp.maximum(norm, 1e-12)


def _ref_corrmask(vtx_f, pts_f, fin):
    w1x, w1y, w1s, b1, w2, b2 = fin
    sim = vtx_f @ pts_f.T
    n = jnp.argmax(sim, axis=1)
    y_mat = pts_f[n, :]
    sim_vec = jnp.max(sim, axis=1, keepdims=True)
    pre1 = vtx_f @ w1x + y_mat @ w1y + sim_vec * w1s + b1
    return jnp.maximum(pre1, 0.0) @ w2 + b2


# ----------------------------------------------------------------------------
if __name__ == "__main__":
    key = jax.random.PRNGKey(0)
    k_vtx, k_pts, k_par = jax.random.split(key, 3)

    num_output_features = 32
    train_corrmask = True
    n_vtx, n_pts = 16, 24

    vtx = jax.random.normal(k_vtx, (n_vtx, 3), jnp.float32)
    pts = jax.random.normal(k_pts, (n_pts, 3), jnp.float32)

    pn_params, fin_params = init_corrnet_params(k_par, num_output_features)

    vtx_feature, pts_feature, out_corrmask = corrnet_forward(
        vtx, pts, pn_params, fin_params, num_output_features, train_corrmask)

    jax.block_until_ready(vtx_feature)
    jax.block_until_ready(pts_feature)
    jax.block_until_ready(out_corrmask)

    # sanity check vs pure-JAX reference
    ref_vtx = _ref_pointnet(vtx, pn_params)
    ref_pts = _ref_pointnet(pts, pn_params)
    ref_mask = _ref_corrmask(ref_vtx, ref_pts, fin_params)
    assert jnp.allclose(vtx_feature, ref_vtx, atol=2e-3, rtol=2e-3)
    assert jnp.allclose(pts_feature, ref_pts, atol=2e-3, rtol=2e-3)
    assert jnp.allclose(out_corrmask, ref_mask, atol=2e-3, rtol=2e-3)

    print("KERNEL_OK")
</pallas_src>

<mosaic_0001>
module attributes {stable_mosaic.version = 11 : i64} {
  func.func @kernel(%arg0: memref<40x3xf32, #tpu.memory_space<vmem>>, %arg1: memref<1016x128xf32, #tpu.memory_space<vmem>>, %arg2: memref<24x128xf32, #tpu.memory_space<vmem>>, %arg3: memref<40x32xf32, #tpu.memory_space<vmem>>, %arg4: memref<16x1xf32, #tpu.memory_space<vmem>>) attributes {dimension_semantics = [], scalar_prefetch = 0 : i64, scratch_operands = 0 : i64, tpu.core_type = #tpu.core_type<tc>} {
    %c0 = arith.constant 0 : index
    %c0_0 = arith.constant 0 : index
    %0 = vector.load %arg0[%c0, %c0_0] : memref<40x3xf32, #tpu.memory_space<vmem>>, vector<40x3xf32>
    %c0_1 = arith.constant 0 : index
    %c0_2 = arith.constant 0 : index
    %1 = vector.load %arg1[%c0_1, %c0_2] : memref<1016x128xf32, #tpu.memory_space<vmem>>, vector<3x32xf32>
    %2 = vector.extract_strided_slice %0 {offsets = [0, 0], sizes = [40, 1], strides = [1, 1]} : vector<40x3xf32> to vector<40x1xf32>
    %3 = vector.extract_strided_slice %1 {offsets = [0, 0], sizes = [1, 32], strides = [1, 1]} : vector<3x32xf32> to vector<1x32xf32>
    %4 = vector.broadcast %2 : vector<40x1xf32> to vector<40x32xf32>
    %5 = vector.broadcast %3 : vector<1x32xf32> to vector<40x32xf32>
    %6 = arith.mulf %4, %5 : vector<40x32xf32>
    %7 = vector.extract_strided_slice %0 {offsets = [0, 1], sizes = [40, 1], strides = [1, 1]} : vector<40x3xf32> to vector<40x1xf32>
    %8 = vector.extract_strided_slice %1 {offsets = [1, 0], sizes = [1, 32], strides = [1, 1]} : vector<3x32xf32> to vector<1x32xf32>
    %9 = vector.broadcast %7 : vector<40x1xf32> to vector<40x32xf32>
    %10 = vector.broadcast %8 : vector<1x32xf32> to vector<40x32xf32>
    %11 = arith.mulf %9, %10 : vector<40x32xf32>
    %12 = arith.addf %6, %11 : vector<40x32xf32>
    %13 = vector.extract_strided_slice %0 {offsets = [0, 2], sizes = [40, 1], strides = [1, 1]} : vector<40x3xf32> to vector<40x1xf32>
    %14 = vector.extract_strided_slice %1 {offsets = [2, 0], sizes = [1, 32], strides = [1, 1]} : vector<3x32xf32> to vector<1x32xf32>
    %15 = vector.broadcast %13 : vector<40x1xf32> to vector<40x32xf32>
    %16 = vector.broadcast %14 : vector<1x32xf32> to vector<40x32xf32>
    %17 = arith.mulf %15, %16 : vector<40x32xf32>
    %18 = arith.addf %12, %17 : vector<40x32xf32>
    %c0_3 = arith.constant 0 : index
    %c0_4 = arith.constant 0 : index
    %19 = vector.load %arg2[%c0_3, %c0_4] : memref<24x128xf32, #tpu.memory_space<vmem>>, vector<1x32xf32>
    %20 = vector.broadcast %19 : vector<1x32xf32> to vector<40x32xf32>
    %21 = arith.addf %18, %20 : vector<40x32xf32>
    %cst = arith.constant 2.000000e-01 : f32
    %22 = vector.broadcast %cst : f32 to vector<40x32xf32>
    %23 = arith.mulf %22, %21 : vector<40x32xf32>
    %24 = arith.maximumf %21, %23 : vector<40x32xf32>
    %c1 = arith.constant 1 : index
    %c0_5 = arith.constant 0 : index
    %25 = vector.load %arg2[%c1, %c0_5] : memref<24x128xf32, #tpu.memory_space<vmem>>, vector<1x32xf32>
    %c2 = arith.constant 2 : index
    %c0_6 = arith.constant 0 : index
    %26 = vector.load %arg2[%c2, %c0_6] : memref<24x128xf32, #tpu.memory_space<vmem>>, vector<1x32xf32>
    %cst_7 = arith.constant dense<0.000000e+00> : vector<40xf32>
    %27 = vector.multi_reduction <add>, %24, %cst_7 [1] : vector<40x32xf32> to vector<40xf32>
    %28 = vector.shape_cast %27 : vector<40xf32> to vector<40x1xf32>
    %cst_8 = arith.constant 3.200000e+01 : f32
    %29 = vector.broadcast %cst_8 : f32 to vector<40x1xf32>
    %30 = arith.divf %28, %29 : vector<40x1xf32>
    %31 = arith.mulf %24, %24 : vector<40x32xf32>
    %cst_9 = arith.constant dense<0.000000e+00> : vector<40xf32>
    %32 = vector.multi_reduction <add>, %31, %cst_9 [1] : vector<40x32xf32> to vector<40xf32>
    %33 = vector.shape_cast %32 : vector<40xf32> to vector<40x1xf32>
    %cst_10 = arith.constant 3.200000e+01 : f32
    %34 = vector.broadcast %cst_10 : f32 to vector<40x1xf32>
    %35 = arith.divf %33, %34 : vector<40x1xf32>
    %36 = arith.mulf %30, %30 : vector<40x1xf32>
    %37 = arith.subf %35, %36 : vector<40x1xf32>
    %cst_11 = arith.constant 0.000000e+00 : f32
    %38 = vector.broadcast %cst_11 : f32 to vector<40x1xf32>
    %39 = arith.maximumf %37, %38 : vector<40x1xf32>
    %cst_12 = arith.constant 9.99999974E-6 : f32
    %40 = vector.broadcast %cst_12 : f32 to vector<40x1xf32>
    %41 = arith.addf %39, %40 : vector<40x1xf32>
    %42 = math.rsqrt %41 : vector<40x1xf32>
    %cst_13 = arith.constant 0.000000e+00 : f32
    %43 = vector.broadcast %cst_13 : f32 to vector<40x1xf32>
    %44 = arith.subf %43, %30 : vector<40x1xf32>
    %45 = arith.mulf %44, %42 : vector<40x1xf32>
    %46 = vector.broadcast %42 : vector<40x1xf32> to vector<40x32xf32>
    %47 = arith.mulf %24, %46 : vector<40x32xf32>
    %48 = vector.broadcast %45 : vector<40x1xf32> to vector<40x32xf32>
    %49 = arith.addf %47, %48 : vector<40x32xf32>
    %50 = vector.broadcast %25 : vector<1x32xf32> to vector<40x32xf32>
    %51 = arith.mulf %49, %50 : vector<40x32xf32>
    %52 = vector.broadcast %26 : vector<1x32xf32> to vector<40x32xf32>
    %53 = arith.addf %51, %52 : vector<40x32xf32>
    %c8 = arith.constant 8 : index
    %c0_14 = arith.constant 0 : index
    %54 = vector.load %arg1[%c8, %c0_14] : memref<1016x128xf32, #tpu.memory_space<vmem>>, vector<32x64xf32>
    %cst_15 = arith.constant dense<0.000000e+00> : vector<40x64xf32>
    %55 = tpu.matmul %53, %54, %cst_15 {dimension_numbers = #tpu.dot_dimension_numbers<[1], [0], [0], [1], [0, 0, 1, 1], [], []>} : vector<40x32xf32>, vector<32x64xf32>, vector<40x64xf32> -> vector<40x64xf32>
    %c3 = arith.constant 3 : index
    %c0_16 = arith.constant 0 : index
    %56 = vector.load %arg2[%c3, %c0_16] : memref<24x128xf32, #tpu.memory_space<vmem>>, vector<1x64xf32>
    %57 = vector.broadcast %56 : vector<1x64xf32> to vector<40x64xf32>
    %58 = arith.addf %55, %57 : vector<40x64xf32>
    %cst_17 = arith.constant 2.000000e-01 : f32
    %59 = vector.broadcast %cst_17 : f32 to vector<40x64xf32>
    %60 = arith.mulf %59, %58 : vector<40x64xf32>
    %61 = arith.maximumf %58, %60 : vector<40x64xf32>
    %c4 = arith.constant 4 : index
    %c0_18 = arith.constant 0 : index
    %62 = vector.load %arg2[%c4, %c0_18] : memref<24x128xf32, #tpu.memory_space<vmem>>, vector<1x64xf32>
    %c5 = arith.constant 5 : index
    %c0_19 = arith.constant 0 : index
    %63 = vector.load %arg2[%c5, %c0_19] : memref<24x128xf32, #tpu.memory_space<vmem>>, vector<1x64xf32>
    %c680 = arith.constant 680 : index
    %c0_20 = arith.constant 0 : index
    %64 = vector.load %arg1[%c680, %c0_20] : memref<1016x128xf32, #tpu.memory_space<vmem>>, vector<64x2xf32>
    %cst_21 = arith.constant dense<0.000000e+00> : vector<40x2xf32>
    %65 = tpu.matmul %61, %64, %cst_21 {dimension_numbers = #tpu.dot_dimension_numbers<[1], [0], [0], [1], [0, 0, 1, 1], [], []>} : vector<40x64xf32>, vector<64x2xf32>, vector<40x2xf32> -> vector<40x2xf32>
    %66 = arith.mulf %61, %61 : vector<40x64xf32>
    %cst_22 = arith.constant dense<0.000000e+00> : vector<40x2xf32>
    %67 = tpu.matmul %66, %64, %cst_22 {dimension_numbers = #tpu.dot_dimension_numbers<[1], [0], [0], [1], [0, 0, 1, 1], [], []>} : vector<40x64xf32>, vector<64x2xf32>, vector<40x2xf32> -> vector<40x2xf32>
    %cst_23 = arith.constant 3.125000e-02 : f32
    %68 = vector.broadcast %cst_23 : f32 to vector<40x2xf32>
    %69 = arith.mulf %65, %68 : vector<40x2xf32>
    %cst_24 = arith.constant 3.125000e-02 : f32
    %70 = vector.broadcast %cst_24 : f32 to vector<40x2xf32>
    %71 = arith.mulf %67, %70 : vector<40x2xf32>
    %72 = arith.mulf %69, %69 : vector<40x2xf32>
    %73 = arith.subf %71, %72 : vector<40x2xf32>
    %cst_25 = arith.constant 0.000000e+00 : f32
    %74 = vector.broadcast %cst_25 : f32 to vector<40x2xf32>
    %75 = arith.maximumf %73, %74 : vector<40x2xf32>
    %cst_26 = arith.constant 9.99999974E-6 : f32
    %76 = vector.broadcast %cst_26 : f32 to vector<40x2xf32>
    %77 = arith.addf %75, %76 : vector<40x2xf32>
    %78 = math.rsqrt %77 : vector<40x2xf32>
    %cst_27 = arith.constant 0.000000e+00 : f32
    %79 = vector.broadcast %cst_27 : f32 to vector<40x2xf32>
    %80 = arith.subf %79, %69 : vector<40x2xf32>
    %81 = arith.mulf %80, %78 : vector<40x2xf32>
    %82 = tpu.concatenate %78, %81 in 0 : vector<40x2xf32>, vector<40x2xf32> -> vector<80x2xf32>
    %c744 = arith.constant 744 : index
    %c0_28 = arith.constant 0 : index
    %83 = vector.load %arg1[%c744, %c0_28] : memref<1016x128xf32, #tpu.memory_space<vmem>>, vector<2x64xf32>
    %cst_29 = arith.constant dense<0.000000e+00> : vector<80x64xf32>
    %84 = tpu.matmul %82, %83, %cst_29 {dimension_numbers = #tpu.dot_dimension_numbers<[1], [0], [0], [1], [0, 0, 1, 1], [], []>} : vector<80x2xf32>, vector<2x64xf32>, vector<80x64xf32> -> vector<80x64xf32>
    %85 = vector.extract_strided_slice %84 {offsets = [0, 0], sizes = [40, 64], strides = [1, 1]} : vector<80x64xf32> to vector<40x64xf32>
    %86 = vector.extract_strided_slice %84 {offsets = [40, 0], sizes = [40, 64], strides = [1, 1]} : vector<80x64xf32> to vector<40x64xf32>
    %87 = arith.mulf %61, %85 : vector<40x64xf32>
    %88 = arith.addf %87, %86 : vector<40x64xf32>
    %89 = vector.broadcast %62 : vector<1x64xf32> to vector<40x64xf32>
    %90 = arith.mulf %88, %89 : vector<40x64xf32>
    %91 = vector.broadcast %63 : vector<1x64xf32> to vector<40x64xf32>
    %92 = arith.addf %90, %91 : vector<40x64xf32>
    %c40 = arith.constant 40 : index
    %c0_30 = arith.constant 0 : index
    %93 = vector.load %arg1[%c40, %c0_30] : memref<1016x128xf32, #tpu.memory_space<vmem>>, vector<64x128xf32>
    %cst_31 = arith.constant dense<0.000000e+00> : vector<40x128xf32>
    %94 = tpu.matmul %92, %93, %cst_31 {dimension_numbers = #tpu.dot_dimension_numbers<[1], [0], [0], [1], [0, 0, 1, 1], [], []>} : vector<40x64xf32>, vector<64x128xf32>, vector<40x128xf32> -> vector<40x128xf32>
    %c6 = arith.constant 6 : index
    %c0_32 = arith.constant 0 : index
    %95 = vector.load %arg2[%c6, %c0_32] : memref<24x128xf32, #tpu.memory_space<vmem>>, vector<1x128xf32>
    %96 = vector.broadcast %95 : vector<1x128xf32> to vector<40x128xf32>
    %97 = arith.addf %94, %96 : vector<40x128xf32>
    %cst_33 = arith.constant 2.000000e-01 : f32
    %98 = vector.broadcast %cst_33 : f32 to vector<40x128xf32>
    %99 = arith.mulf %98, %97 : vector<40x128xf32>
    %100 = arith.maximumf %97, %99 : vector<40x128xf32>
    %c7 = arith.constant 7 : index
    %c0_34 = arith.constant 0 : index
    %101 = vector.load %arg2[%c7, %c0_34] : memref<24x128xf32, #tpu.memory_space<vmem>>, vector<1x128xf32>
    %c8_35 = arith.constant 8 : index
    %c0_36 = arith.constant 0 : index
    %102 = vector.load %arg2[%c8_35, %c0_36] : memref<24x128xf32, #tpu.memory_space<vmem>>, vector<1x128xf32>
    %c752 = arith.constant 752 : index
    %c0_37 = arith.constant 0 : index
    %103 = vector.load %arg1[%c752, %c0_37] : memref<1016x128xf32, #tpu.memory_space<vmem>>, vector<128x4xf32>
    %cst_38 = arith.constant dense<0.000000e+00> : vector<40x4xf32>
    %104 = tpu.matmul %100, %103, %cst_38 {dimension_numbers = #tpu.dot_dimension_numbers<[1], [0], [0], [1], [0, 0, 1, 1], [], []>} : vector<40x128xf32>, vector<128x4xf32>, vector<40x4xf32> -> vector<40x4xf32>
    %105 = arith.mulf %100, %100 : vector<40x128xf32>
    %cst_39 = arith.constant dense<0.000000e+00> : vector<40x4xf32>
    %106 = tpu.matmul %105, %103, %cst_39 {dimension_numbers = #tpu.dot_dimension_numbers<[1], [0], [0], [1], [0, 0, 1, 1], [], []>} : vector<40x128xf32>, vector<128x4xf32>, vector<40x4xf32> -> vector<40x4xf32>
    %cst_40 = arith.constant 3.125000e-02 : f32
    %107 = vector.broadcast %cst_40 : f32 to vector<40x4xf32>
    %108 = arith.mulf %104, %107 : vector<40x4xf32>
    %cst_41 = arith.constant 3.125000e-02 : f32
    %109 = vector.broadcast %cst_41 : f32 to vector<40x4xf32>
    %110 = arith.mulf %106, %109 : vector<40x4xf32>
    %111 = arith.mulf %108, %108 : vector<40x4xf32>
    %112 = arith.subf %110, %111 : vector<40x4xf32>
    %cst_42 = arith.constant 0.000000e+00 : f32
    %113 = vector.broadcast %cst_42 : f32 to vector<40x4xf32>
    %114 = arith.maximumf %112, %113 : vector<40x4xf32>
    %cst_43 = arith.constant 9.99999974E-6 : f32
    %115 = vector.broadcast %cst_43 : f32 to vector<40x4xf32>
    %116 = arith.addf %114, %115 : vector<40x4xf32>
    %117 = math.rsqrt %116 : vector<40x4xf32>
    %cst_44 = arith.constant 0.000000e+00 : f32
    %118 = vector.broadcast %cst_44 : f32 to vector<40x4xf32>
    %119 = arith.subf %118, %108 : vector<40x4xf32>
    %120 = arith.mulf %119, %117 : vector<40x4xf32>
    %121 = tpu.concatenate %117, %120 in 0 : vector<40x4xf32>, vector<40x4xf32> -> vector<80x4xf32>
    %c880 = arith.constant 880 : index
    %c0_45 = arith.constant 0 : index
    %122 = vector.load %arg1[%c880, %c0_45] : memref<1016x128xf32, #tpu.memory_space<vmem>>, vector<4x128xf32>
    %cst_46 = arith.constant dense<0.000000e+00> : vector<80x128xf32>
    %123 = tpu.matmul %121, %122, %cst_46 {dimension_numbers = #tpu.dot_dimension_numbers<[1], [0], [0], [1], [0, 0, 1, 1], [], []>} : vector<80x4xf32>, vector<4x128xf32>, vector<80x128xf32> -> vector<80x128xf32>
    %124 = vector.extract_strided_slice %123 {offsets = [0, 0], sizes = [40, 128], strides = [1, 1]} : vector<80x128xf32> to vector<40x128xf32>
    %125 = vector.extract_strided_slice %123 {offsets = [40, 0], sizes = [40, 128], strides = [1, 1]} : vector<80x128xf32> to vector<40x128xf32>
    %126 = arith.mulf %100, %124 : vector<40x128xf32>
    %127 = arith.addf %126, %125 : vector<40x128xf32>
    %128 = vector.broadcast %101 : vector<1x128xf32> to vector<40x128xf32>
    %129 = arith.mulf %127, %128 : vector<40x128xf32>
    %130 = vector.broadcast %102 : vector<1x128xf32> to vector<40x128xf32>
    %131 = arith.addf %129, %130 : vector<40x128xf32>
    %c104 = arith.constant 104 : index
    %c0_47 = arith.constant 0 : index
    %132 = vector.load %arg1[%c104, %c0_47] : memref<1016x128xf32, #tpu.memory_space<vmem>>, vector<128x128xf32>
    %cst_48 = arith.constant dense<0.000000e+00> : vector<40x128xf32>
    %133 = tpu.matmul %131, %132, %cst_48 {dimension_numbers = #tpu.dot_dimension_numbers<[1], [0], [0], [1], [0, 0, 1, 1], [], []>} : vector<40x128xf32>, vector<128x128xf32>, vector<40x128xf32> -> vector<40x128xf32>
    %c9 = arith.constant 9 : index
    %c0_49 = arith.constant 0 : index
    %134 = vector.load %arg2[%c9, %c0_49] : memref<24x128xf32, #tpu.memory_space<vmem>>, vector<1x128xf32>
    %135 = vector.broadcast %134 : vector<1x128xf32> to vector<40x128xf32>
    %136 = arith.addf %133, %135 : vector<40x128xf32>
    %cst_50 = arith.constant 2.000000e-01 : f32
    %137 = vector.broadcast %cst_50 : f32 to vector<40x128xf32>
    %138 = arith.mulf %137, %136 : vector<40x128xf32>
    %139 = arith.maximumf %136, %138 : vector<40x128xf32>
    %c10 = arith.constant 10 : index
    %c0_51 = arith.constant 0 : index
    %140 = vector.load %arg2[%c10, %c0_51] : memref<24x128xf32, #tpu.memory_space<vmem>>, vector<1x128xf32>
    %c11 = arith.constant 11 : index
    %c0_52 = arith.constant 0 : index
    %141 = vector.load %arg2[%c11, %c0_52] : memref<24x128xf32, #tpu.memory_space<vmem>>, vector<1x128xf32>
    %c752_53 = arith.constant 752 : index
    %c0_54 = arith.constant 0 : index
    %142 = vector.load %arg1[%c752_53, %c0_54] : memref<1016x128xf32, #tpu.memory_space<vmem>>, vector<128x4xf32>
    %cst_55 = arith.constant dense<0.000000e+00> : vector<40x4xf32>
    %143 = tpu.matmul %139, %142, %cst_55 {dimension_numbers = #tpu.dot_dimension_numbers<[1], [0], [0], [1], [0, 0, 1, 1], [], []>} : vector<40x128xf32>, vector<128x4xf32>, vector<40x4xf32> -> vector<40x4xf32>
    %144 = arith.mulf %139, %139 : vector<40x128xf32>
    %cst_56 = arith.constant dense<0.000000e+00> : vector<40x4xf32>
    %145 = tpu.matmul %144, %142, %cst_56 {dimension_numbers = #tpu.dot_dimension_numbers<[1], [0], [0], [1], [0, 0, 1, 1], [], []>} : vector<40x128xf32>, vector<128x4xf32>, vector<40x4xf32> -> vector<40x4xf32>
    %cst_57 = arith.constant 3.125000e-02 : f32
    %146 = vector.broadcast %cst_57 : f32 to vector<40x4xf32>
    %147 = arith.mulf %143, %146 : vector<40x4xf32>
    %cst_58 = arith.constant 3.125000e-02 : f32
    %148 = vector.broadcast %cst_58 : f32 to vector<40x4xf32>
    %149 = arith.mulf %145, %148 : vector<40x4xf32>
    %150 = arith.mulf %147, %147 : vector<40x4xf32>
    %151 = arith.subf %149, %150 : vector<40x4xf32>
    %cst_59 = arith.constant 0.000000e+00 : f32
    %152 = vector.broadcast %cst_59 : f32 to vector<40x4xf32>
    %153 = arith.maximumf %151, %152 : vector<40x4xf32>
    %cst_60 = arith.constant 9.99999974E-6 : f32
    %154 = vector.broadcast %cst_60 : f32 to vector<40x4xf32>
    %155 = arith.addf %153, %154 : vector<40x4xf32>
    %156 = math.rsqrt %155 : vector<40x4xf32>
    %cst_61 = arith.constant 0.000000e+00 : f32
    %157 = vector.broadcast %cst_61 : f32 to vector<40x4xf32>
    %158 = arith.subf %157, %147 : vector<40x4xf32>
    %159 = arith.mulf %158, %156 : vector<40x4xf32>
    %160 = tpu.concatenate %156, %159 in 0 : vector<40x4xf32>, vector<40x4xf32> -> vector<80x4xf32>
    %c880_62 = arith.constant 880 : index
    %c0_63 = arith.constant 0 : index
    %161 = vector.load %arg1[%c880_62, %c0_63] : memref<1016x128xf32, #tpu.memory_space<vmem>>, vector<4x128xf32>
    %cst_64 = arith.constant dense<0.000000e+00> : vector<80x128xf32>
    %162 = tpu.matmul %160, %161, %cst_64 {dimension_numbers = #tpu.dot_dimension_numbers<[1], [0], [0], [1], [0, 0, 1, 1], [], []>} : vector<80x4xf32>, vector<4x128xf32>, vector<80x128xf32> -> vector<80x128xf32>
    %163 = vector.extract_strided_slice %162 {offsets = [0, 0], sizes = [40, 128], strides = [1, 1]} : vector<80x128xf32> to vector<40x128xf32>
    %164 = vector.extract_strided_slice %162 {offsets = [40, 0], sizes = [40, 128], strides = [1, 1]} : vector<80x128xf32> to vector<40x128xf32>
    %165 = arith.mulf %139, %163 : vector<40x128xf32>
    %166 = arith.addf %165, %164 : vector<40x128xf32>
    %167 = vector.broadcast %140 : vector<1x128xf32> to vector<40x128xf32>
    %168 = arith.mulf %166, %167 : vector<40x128xf32>
    %169 = vector.broadcast %141 : vector<1x128xf32> to vector<40x128xf32>
    %170 = arith.addf %168, %169 : vector<40x128xf32>
    %171 = vector.extract_strided_slice %170 {offsets = [0, 0], sizes = [16, 128], strides = [1, 1]} : vector<40x128xf32> to vector<16x128xf32>
    %cst_65 = arith.constant dense<0xFF800000> : vector<128xf32>
    %172 = vector.multi_reduction <maximumf>, %171, %cst_65 [0] : vector<16x128xf32> to vector<128xf32>
    %173 = vector.shape_cast %172 : vector<128xf32> to vector<1x128xf32>
    %174 = vector.extract_strided_slice %170 {offsets = [16, 0], sizes = [24, 128], strides = [1, 1]} : vector<40x128xf32> to vector<24x128xf32>
    %cst_66 = arith.constant dense<0xFF800000> : vector<128xf32>
    %175 = vector.multi_reduction <maximumf>, %174, %cst_66 [0] : vector<24x128xf32> to vector<128xf32>
    %176 = vector.shape_cast %175 : vector<128xf32> to vector<1x128xf32>
    %c360 = arith.constant 360 : index
    %c0_67 = arith.constant 0 : index
    %177 = vector.load %arg1[%c360, %c0_67] : memref<1016x128xf32, #tpu.memory_space<vmem>>, vector<128x128xf32>
    %cst_68 = arith.constant dense<0.000000e+00> : vector<1x128xf32>
    %178 = tpu.matmul %173, %177, %cst_68 {dimension_numbers = #tpu.dot_dimension_numbers<[1], [0], [0], [1], [0, 0, 1, 1], [], []>} : vector<1x128xf32>, vector<128x128xf32>, vector<1x128xf32> -> vector<1x128xf32>
    %cst_69 = arith.constant dense<0.000000e+00> : vector<1x128xf32>
    %179 = tpu.matmul %176, %177, %cst_69 {dimension_numbers = #tpu.dot_dimension_numbers<[1], [0], [0], [1], [0, 0, 1, 1], [], []>} : vector<1x128xf32>, vector<128x128xf32>, vector<1x128xf32> -> vector<1x128xf32>
    %c232 = arith.constant 232 : index
    %c0_70 = arith.constant 0 : index
    %180 = vector.load %arg1[%c232, %c0_70] : memref<1016x128xf32, #tpu.memory_space<vmem>>, vector<128x128xf32>
    %cst_71 = arith.constant dense<0.000000e+00> : vector<40x128xf32>
    %181 = tpu.matmul %131, %180, %cst_71 {dimension_numbers = #tpu.dot_dimension_numbers<[1], [0], [0], [1], [0, 0, 1, 1], [], []>} : vector<40x128xf32>, vector<128x128xf32>, vector<40x128xf32> -> vector<40x128xf32>
    %c12 = arith.constant 12 : index
    %c0_72 = arith.constant 0 : index
    %182 = vector.load %arg2[%c12, %c0_72] : memref<24x128xf32, #tpu.memory_space<vmem>>, vector<1x128xf32>
    %183 = vector.broadcast %182 : vector<1x128xf32> to vector<40x128xf32>
    %184 = arith.addf %181, %183 : vector<40x128xf32>
    %185 = vector.extract_strided_slice %184 {offsets = [0, 0], sizes = [16, 128], strides = [1, 1]} : vector<40x128xf32> to vector<16x128xf32>
    %186 = vector.broadcast %178 : vector<1x128xf32> to vector<16x128xf32>
    %187 = arith.addf %185, %186 : vector<16x128xf32>
    %188 = vector.extract_strided_slice %184 {offsets = [16, 0], sizes = [24, 128], strides = [1, 1]} : vector<40x128xf32> to vector<24x128xf32>
    %189 = vector.broadcast %179 : vector<1x128xf32> to vector<24x128xf32>
    %190 = arith.addf %188, %189 : vector<24x128xf32>
    %191 = tpu.concatenate %187, %190 in 0 : vector<16x128xf32>, vector<24x128xf32> -> vector<40x128xf32>
    %cst_73 = arith.constant 2.000000e-01 : f32
    %192 = vector.broadcast %cst_73 : f32 to vector<40x128xf32>
    %193 = arith.mulf %192, %191 : vector<40x128xf32>
    %194 = arith.maximumf %191, %193 : vector<40x128xf32>
    %c13 = arith.constant 13 : index
    %c0_74 = arith.constant 0 : index
    %195 = vector.load %arg2[%c13, %c0_74] : memref<24x128xf32, #tpu.memory_space<vmem>>, vector<1x128xf32>
    %c14 = arith.constant 14 : index
    %c0_75 = arith.constant 0 : index
    %196 = vector.load %arg2[%c14, %c0_75] : memref<24x128xf32, #tpu.memory_space<vmem>>, vector<1x128xf32>
    %c752_76 = arith.constant 752 : index
    %c0_77 = arith.constant 0 : index
    %197 = vector.load %arg1[%c752_76, %c0_77] : memref<1016x128xf32, #tpu.memory_space<vmem>>, vector<128x4xf32>
    %cst_78 = arith.constant dense<0.000000e+00> : vector<40x4xf32>
    %198 = tpu.matmul %194, %197, %cst_78 {dimension_numbers = #tpu.dot_dimension_numbers<[1], [0], [0], [1], [0, 0, 1, 1], [], []>} : vector<40x128xf32>, vector<128x4xf32>, vector<40x4xf32> -> vector<40x4xf32>
    %199 = arith.mulf %194, %194 : vector<40x128xf32>
    %cst_79 = arith.constant dense<0.000000e+00> : vector<40x4xf32>
    %200 = tpu.matmul %199, %197, %cst_79 {dimension_numbers = #tpu.dot_dimension_numbers<[1], [0], [0], [1], [0, 0, 1, 1], [], []>} : vector<40x128xf32>, vector<128x4xf32>, vector<40x4xf32> -> vector<40x4xf32>
    %cst_80 = arith.constant 3.125000e-02 : f32
    %201 = vector.broadcast %cst_80 : f32 to vector<40x4xf32>
    %202 = arith.mulf %198, %201 : vector<40x4xf32>
    %cst_81 = arith.constant 3.125000e-02 : f32
    %203 = vector.broadcast %cst_81 : f32 to vector<40x4xf32>
    %204 = arith.mulf %200, %203 : vector<40x4xf32>
    %205 = arith.mulf %202, %202 : vector<40x4xf32>
    %206 = arith.subf %204, %205 : vector<40x4xf32>
    %cst_82 = arith.constant 0.000000e+00 : f32
    %207 = vector.broadcast %cst_82 : f32 to vector<40x4xf32>
    %208 = arith.maximumf %206, %207 : vector<40x4xf32>
    %cst_83 = arith.constant 9.99999974E-6 : f32
    %209 = vector.broadcast %cst_83 : f32 to vector<40x4xf32>
    %210 = arith.addf %208, %209 : vector<40x4xf32>
    %211 = math.rsqrt %210 : vector<40x4xf32>
    %cst_84 = arith.constant 0.000000e+00 : f32
    %212 = vector.broadcast %cst_84 : f32 to vector<40x4xf32>
    %213 = arith.subf %212, %202 : vector<40x4xf32>
    %214 = arith.mulf %213, %211 : vector<40x4xf32>
    %215 = tpu.concatenate %211, %214 in 0 : vector<40x4xf32>, vector<40x4xf32> -> vector<80x4xf32>
    %c880_85 = arith.constant 880 : index
    %c0_86 = arith.constant 0 : index
    %216 = vector.load %arg1[%c880_85, %c0_86] : memref<1016x128xf32, #tpu.memory_space<vmem>>, vector<4x128xf32>
    %cst_87 = arith.constant dense<0.000000e+00> : vector<80x128xf32>
    %217 = tpu.matmul %215, %216, %cst_87 {dimension_numbers = #tpu.dot_dimension_numbers<[1], [0], [0], [1], [0, 0, 1, 1], [], []>} : vector<80x4xf32>, vector<4x128xf32>, vector<80x128xf32> -> vector<80x128xf32>
    %218 = vector.extract_strided_slice %217 {offsets = [0, 0], sizes = [40, 128], strides = [1, 1]} : vector<80x128xf32> to vector<40x128xf32>
    %219 = vector.extract_strided_slice %217 {offsets = [40, 0], sizes = [40, 128], strides = [1, 1]} : vector<80x128xf32> to vector<40x128xf32>
    %220 = arith.mulf %194, %218 : vector<40x128xf32>
    %221 = arith.addf %220, %219 : vector<40x128xf32>
    %222 = vector.broadcast %195 : vector<1x128xf32> to vector<40x128xf32>
    %223 = arith.mulf %221, %222 : vector<40x128xf32>
    %224 = vector.broadcast %196 : vector<1x128xf32> to vector<40x128xf32>
    %225 = arith.addf %223, %224 : vector<40x128xf32>
    %c488 = arith.constant 488 : index
    %c0_88 = arith.constant 0 : index
    %226 = vector.load %arg1[%c488, %c0_88] : memref<1016x128xf32, #tpu.memory_space<vmem>>, vector<128x64xf32>
    %cst_89 = arith.constant dense<0.000000e+00> : vector<40x64xf32>
    %227 = tpu.matmul %225, %226, %cst_89 {dimension_numbers = #tpu.dot_dimension_numbers<[1], [0], [0], [1], [0, 0, 1, 1], [], []>} : vector<40x128xf32>, vector<128x64xf32>, vector<40x64xf32> -> vector<40x64xf32>
    %c15 = arith.constant 15 : index
    %c0_90 = arith.constant 0 : index
    %228 = vector.load %arg2[%c15, %c0_90] : memref<24x128xf32, #tpu.memory_space<vmem>>, vector<1x64xf32>
    %229 = vector.broadcast %228 : vector<1x64xf32> to vector<40x64xf32>
    %230 = arith.addf %227, %229 : vector<40x64xf32>
    %cst_91 = arith.constant 2.000000e-01 : f32
    %231 = vector.broadcast %cst_91 : f32 to vector<40x64xf32>
    %232 = arith.mulf %231, %230 : vector<40x64xf32>
    %233 = arith.maximumf %230, %232 : vector<40x64xf32>
    %c16 = arith.constant 16 : index
    %c0_92 = arith.constant 0 : index
    %234 = vector.load %arg2[%c16, %c0_92] : memref<24x128xf32, #tpu.memory_space<vmem>>, vector<1x64xf32>
    %c17 = arith.constant 17 : index
    %c0_93 = arith.constant 0 : index
    %235 = vector.load %arg2[%c17, %c0_93] : memref<24x128xf32, #tpu.memory_space<vmem>>, vector<1x64xf32>
    %c680_94 = arith.constant 680 : index
    %c0_95 = arith.constant 0 : index
    %236 = vector.load %arg1[%c680_94, %c0_95] : memref<1016x128xf32, #tpu.memory_space<vmem>>, vector<64x2xf32>
    %cst_96 = arith.constant dense<0.000000e+00> : vector<40x2xf32>
    %237 = tpu.matmul %233, %236, %cst_96 {dimension_numbers = #tpu.dot_dimension_numbers<[1], [0], [0], [1], [0, 0, 1, 1], [], []>} : vector<40x64xf32>, vector<64x2xf32>, vector<40x2xf32> -> vector<40x2xf32>
    %238 = arith.mulf %233, %233 : vector<40x64xf32>
    %cst_97 = arith.constant dense<0.000000e+00> : vector<40x2xf32>
    %239 = tpu.matmul %238, %236, %cst_97 {dimension_numbers = #tpu.dot_dimension_numbers<[1], [0], [0], [1], [0, 0, 1, 1], [], []>} : vector<40x64xf32>, vector<64x2xf32>, vector<40x2xf32> -> vector<40x2xf32>
    %cst_98 = arith.constant 3.125000e-02 : f32
    %240 = vector.broadcast %cst_98 : f32 to vector<40x2xf32>
    %241 = arith.mulf %237, %240 : vector<40x2xf32>
    %cst_99 = arith.constant 3.125000e-02 : f32
    %242 = vector.broadcast %cst_99 : f32 to vector<40x2xf32>
    %243 = arith.mulf %239, %242 : vector<40x2xf32>
    %244 = arith.mulf %241, %241 : vector<40x2xf32>
    %245 = arith.subf %243, %244 : vector<40x2xf32>
    %cst_100 = arith.constant 0.000000e+00 : f32
    %246 = vector.broadcast %cst_100 : f32 to vector<40x2xf32>
    %247 = arith.maximumf %245, %246 : vector<40x2xf32>
    %cst_101 = arith.constant 9.99999974E-6 : f32
    %248 = vector.broadcast %cst_101 : f32 to vector<40x2xf32>
    %249 = arith.addf %247, %248 : vector<40x2xf32>
    %250 = math.rsqrt %249 : vector<40x2xf32>
    %cst_102 = arith.constant 0.000000e+00 : f32
    %251 = vector.broadcast %cst_102 : f32 to vector<40x2xf32>
    %252 = arith.subf %251, %241 : vector<40x2xf32>
    %253 = arith.mulf %252, %250 : vector<40x2xf32>
    %254 = tpu.concatenate %250, %253 in 0 : vector<40x2xf32>, vector<40x2xf32> -> vector<80x2xf32>
    %c744_103 = arith.constant 744 : index
    %c0_104 = arith.constant 0 : index
    %255 = vector.load %arg1[%c744_103, %c0_104] : memref<1016x128xf32, #tpu.memory_space<vmem>>, vector<2x64xf32>
    %cst_105 = arith.constant dense<0.000000e+00> : vector<80x64xf32>
    %256 = tpu.matmul %254, %255, %cst_105 {dimension_numbers = #tpu.dot_dimension_numbers<[1], [0], [0], [1], [0, 0, 1, 1], [], []>} : vector<80x2xf32>, vector<2x64xf32>, vector<80x64xf32> -> vector<80x64xf32>
    %257 = vector.extract_strided_slice %256 {offsets = [0, 0], sizes = [40, 64], strides = [1, 1]} : vector<80x64xf32> to vector<40x64xf32>
    %258 = vector.extract_strided_slice %256 {offsets = [40, 0], sizes = [40, 64], strides = [1, 1]} : vector<80x64xf32> to vector<40x64xf32>
    %259 = arith.mulf %233, %257 : vector<40x64xf32>
    %260 = arith.addf %259, %258 : vector<40x64xf32>
    %261 = vector.broadcast %234 : vector<1x64xf32> to vector<40x64xf32>
    %262 = arith.mulf %260, %261 : vector<40x64xf32>
    %263 = vector.broadcast %235 : vector<1x64xf32> to vector<40x64xf32>
    %264 = arith.addf %262, %263 : vector<40x64xf32>
    %c616 = arith.constant 616 : index
    %c0_106 = arith.constant 0 : index
    %265 = vector.load %arg1[%c616, %c0_106] : memref<1016x128xf32, #tpu.memory_space<vmem>>, vector<64x32xf32>
    %cst_107 = arith.constant dense<0.000000e+00> : vector<40x32xf32>
    %266 = tpu.matmul %264, %265, %cst_107 {dimension_numbers = #tpu.dot_dimension_numbers<[1], [0], [0], [1], [0, 0, 1, 1], [], []>} : vector<40x64xf32>, vector<64x32xf32>, vector<40x32xf32> -> vector<40x32xf32>
    %c18 = arith.constant 18 : index
    %c0_108 = arith.constant 0 : index
    %267 = vector.load %arg2[%c18, %c0_108] : memref<24x128xf32, #tpu.memory_space<vmem>>, vector<1x32xf32>
    %268 = vector.broadcast %267 : vector<1x32xf32> to vector<40x32xf32>
    %269 = arith.addf %266, %268 : vector<40x32xf32>
    %270 = arith.mulf %269, %269 : vector<40x32xf32>
    %cst_109 = arith.constant dense<0.000000e+00> : vector<40xf32>
    %271 = vector.multi_reduction <add>, %270, %cst_109 [1] : vector<40x32xf32> to vector<40xf32>
    %272 = vector.shape_cast %271 : vector<40xf32> to vector<40x1xf32>
    %cst_110 = arith.constant 1.000000e-24 : f32
    %273 = vector.broadcast %cst_110 : f32 to vector<40x1xf32>
    %274 = arith.maximumf %272, %273 : vector<40x1xf32>
    %275 = math.rsqrt %274 : vector<40x1xf32>
    %276 = vector.broadcast %275 : vector<40x1xf32> to vector<40x32xf32>
    %277 = arith.mulf %269, %276 : vector<40x32xf32>
    %c0_111 = arith.constant 0 : index
    %c0_112 = arith.constant 0 : index
    %278 = vector.load %arg3[%c0_111, %c0_112] : memref<40x32xf32, #tpu.memory_space<vmem>>, vector<40x32xf32>
    tpu.vector_store %arg3[%c0_111, %c0_112], %277 {strides = array<i32>} : memref<40x32xf32, #tpu.memory_space<vmem>>, vector<40x32xf32>,
    %279 = vector.extract_strided_slice %277 {offsets = [0, 0], sizes = [16, 32], strides = [1, 1]} : vector<40x32xf32> to vector<16x32xf32>
    %280 = vector.extract_strided_slice %277 {offsets = [16, 0], sizes = [24, 32], strides = [1, 1]} : vector<40x32xf32> to vector<24x32xf32>
    %cst_113 = arith.constant dense<0.000000e+00> : vector<16x24xf32>
    %281 = tpu.matmul %279, %280, %cst_113 {dimension_numbers = #tpu.dot_dimension_numbers<[1], [1], [0], [0], [0, 0, 1, 0], [], []>} : vector<16x32xf32>, vector<24x32xf32>, vector<16x24xf32> -> vector<16x24xf32>
    %cst_114 = arith.constant dense<0xFF800000> : vector<16xf32>
    %282 = vector.multi_reduction <maximumf>, %281, %cst_114 [1] : vector<16x24xf32> to vector<16xf32>
    %283 = vector.shape_cast %282 : vector<16xf32> to vector<16x1xf32>
    %284 = tpu.iota {dimensions = array<i32: 1>} : vector<16x24xi32>
    %285 = vector.broadcast %283 : vector<16x1xf32> to vector<16x24xf32>
    %286 = arith.cmpf oge, %281, %285 : vector<16x24xf32>
    %c24_i32 = arith.constant 24 : i32
    %287 = vector.broadcast %c24_i32 : i32 to vector<16x24xi32>
    %288 = arith.select %286, %284, %287 : vector<16x24xi1>, vector<16x24xi32>
    %cst_115 = arith.constant dense<2147483647> : vector<16xi32>
    %289 = vector.multi_reduction <minsi>, %288, %cst_115 [1] : vector<16x24xi32> to vector<16xi32>
    %290 = vector.shape_cast %289 : vector<16xi32> to vector<16x1xi32>
    %291 = vector.broadcast %290 : vector<16x1xi32> to vector<16x24xi32>
    %292 = arith.cmpi eq, %284, %291 : vector<16x24xi32>
    %293 = arith.extui %292 : vector<16x24xi1> to vector<16x24xi32>
    %294 = arith.sitofp %293 : vector<16x24xi32> to vector<16x24xf32>
    %cst_116 = arith.constant dense<0.000000e+00> : vector<16x32xf32>
    %295 = tpu.matmul %294, %280, %cst_116 {dimension_numbers = #tpu.dot_dimension_numbers<[1], [0], [0], [1], [0, 0, 1, 1], [], []>} : vector<16x24xf32>, vector<24x32xf32>, vector<16x32xf32> -> vector<16x32xf32>
    %c888 = arith.constant 888 : index
    %c0_117 = arith.constant 0 : index
    %296 = vector.load %arg1[%c888, %c0_117] : memref<1016x128xf32, #tpu.memory_space<vmem>>, vector<32x64xf32>
    %cst_118 = arith.constant dense<0.000000e+00> : vector<16x64xf32>
    %297 = tpu.matmul %279, %296, %cst_118 {dimension_numbers = #tpu.dot_dimension_numbers<[1], [0], [0], [1], [0, 0, 1, 1], [], []>} : vector<16x32xf32>, vector<32x64xf32>, vector<16x64xf32> -> vector<16x64xf32>
    %c920 = arith.constant 920 : index
    %c0_119 = arith.constant 0 : index
    %298 = vector.load %arg1[%c920, %c0_119] : memref<1016x128xf32, #tpu.memory_space<vmem>>, vector<32x64xf32>
    %cst_120 = arith.constant dense<0.000000e+00> : vector<16x64xf32>
    %299 = tpu.matmul %295, %298, %cst_120 {dimension_numbers = #tpu.dot_dimension_numbers<[1], [0], [0], [1], [0, 0, 1, 1], [], []>} : vector<16x32xf32>, vector<32x64xf32>, vector<16x64xf32> -> vector<16x64xf32>
    %300 = arith.addf %297, %299 : vector<16x64xf32>
    %c19 = arith.constant 19 : index
    %c0_121 = arith.constant 0 : index
    %301 = vector.load %arg2[%c19, %c0_121] : memref<24x128xf32, #tpu.memory_space<vmem>>, vector<1x64xf32>
    %302 = vector.broadcast %283 : vector<16x1xf32> to vector<16x64xf32>
    %303 = vector.broadcast %301 : vector<1x64xf32> to vector<16x64xf32>
    %304 = arith.mulf %302, %303 : vector<16x64xf32>
    %305 = arith.addf %300, %304 : vector<16x64xf32>
    %c20 = arith.constant 20 : index
    %c0_122 = arith.constant 0 : index
    %306 = vector.load %arg2[%c20, %c0_122] : memref<24x128xf32, #tpu.memory_space<vmem>>, vector<1x64xf32>
    %307 = vector.broadcast %306 : vector<1x64xf32> to vector<16x64xf32>
    %308 = arith.addf %305, %307 : vector<16x64xf32>
    %cst_123 = arith.constant 0.000000e+00 : f32
    %309 = vector.broadcast %cst_123 : f32 to vector<16x64xf32>
    %310 = arith.maximumf %308, %309 : vector<16x64xf32>
    %c952 = arith.constant 952 : index
    %c0_124 = arith.constant 0 : index
    %311 = vector.load %arg1[%c952, %c0_124] : memref<1016x128xf32, #tpu.memory_space<vmem>>, vector<64x1xf32>
    %cst_125 = arith.constant dense<0.000000e+00> : vector<16x1xf32>
    %312 = tpu.matmul %310, %311, %cst_125 {dimension_numbers = #tpu.dot_dimension_numbers<[1], [0], [0], [1], [0, 0, 1, 1], [], []>} : vector<16x64xf32>, vector<64x1xf32>, vector<16x1xf32> -> vector<16x1xf32>
    %c21 = arith.constant 21 : index
    %c0_126 = arith.constant 0 : index
    %313 = vector.load %arg2[%c21, %c0_126] : memref<24x128xf32, #tpu.memory_space<vmem>>, vector<1x1xf32>
    %314 = vector.broadcast %313 : vector<1x1xf32> to vector<16x1xf32>
    %315 = arith.addf %312, %314 : vector<16x1xf32>
    %c0_127 = arith.constant 0 : index
    %c0_128 = arith.constant 0 : index
    %316 = vector.load %arg4[%c0_127, %c0_128] : memref<16x1xf32, #tpu.memory_space<vmem>>, vector<16x1xf32>
    tpu.vector_store %arg4[%c0_127, %c0_128], %315 {strides = array<i32>} : memref<16x1xf32, #tpu.memory_space<vmem>>, vector<16x1xf32>,
    return
  }
}

</mosaic_0001>

<bundles_post_ra>
// kernel: tpu_custom_call.1
= control target key start
LH: loop header
LB: loop body
LE: loop exit
PB: predicated region body
PF: predicated region fallthrough
CT: control target
= control target key end

     0   :  { %10 = vsyncpa [#allocation3], 0  ;;  %s5740_s15 = smov [#allocation2]   ;;  %s6650_s0 = inlined_call_operand.vmem [shape: f32[40,3], index: 0, kind: input, shape index: {}]   ;;  %s6651_s1 = inlined_call_operand.hbm [shape: f32[1016,128], index: 1, kind: input, shape index: {}]   ;;  %s6652_s2 = inlined_call_operand.vmem [shape: f32[24,128], index: 2, kind: input, shape index: {}]   ;;  %s6653_s3 = inlined_call_operand.vmem [shape: f32[40,32], index: 3, kind: output, shape index: {0}]   ;;  %s6654_s4 = inlined_call_operand.vmem [shape: f32[16,1], index: 4, kind: output, shape index: {1}]  }
   0x1   :  { %s18_s16 = sshll.u32 %s5740_s15, 4  ;;  %s5716_s19 = scalar_lea.hbm %s6651_s1, 16256  ;;  %s19_s16 = int_to_ptr.vmem [resolvable:$true] %s18_s16 }
   0x2   :  { %p5717_p0 = scmp.ne.s32.totalorder %s6651_s1, %s5716_s19  ;;  %p5720_p1 = scmp.lt.u32.totalorder %s5716_s19, %s6651_s1 }
   0x4   :  { %p5722_p2 = pnand %p5720_p1, %p5717_p0 }
   0x6   :  { %5725 = shalt.err (!%p5722_p2)
}
   0x7   :  { %s5726_s24 = scalar_lea.vmem %s19_s16, 16256  ;;  %p5731_p4 = scmp.lt.s32.totalorder %s19_s16, %s19_s16 }
   0x8   :  { %p5727_p3 = scmp.ne.s32.totalorder %s19_s16, %s5726_s24  ;;  %p5732_p5 = scmp.lt.s32.totalorder %s5726_s24, %s5726_s24 }
   0xa   :  { %p5733_p6 = por %p5732_p5, %p5731_p4 }
   0xc   :  { %p5734_p7 = pnand %p5733_p6, %p5727_p3 }
   0xe   :  { %5737 = shalt.err (!%p5734_p7)
}
   0xf   :  { %s5741_s25 = smov 128   ;;  %s5742_s26 = smov 8  }
  0x10   :  { %24 = dma.hbm_to_vmem [thread:$0]  %s6651_s1, 16256, %s19_s16, [#allocation3], %s5741_s25, %s5741_s25, %s5742_s26  }
  0x11   :  { %5738 = dma.done.wait [#allocation3], 16256  }
  0x12   :  { %5739 = vsyncadd [#allocation3], 4294951040  ;;  %v5743_v0 = vmov 2   ;;  %v5744_v1 = vmov 0   ;;  %v30_v2 = vld [vmem:[%s6650_s0] sm:$0xff]  ;;  %v31_v3 = vld [vmem:[%s6650_s0 + $0x8] sm:$0xff]  ;;  %v61_v8 = vlaneseq }
  0x13   :  { %5632 = vset.pattern.permute.xlu1 %v5743_v0  ;;  %5630 = vset.pattern.permute.xlu0 %v5744_v1  ;;  %v5745_v4 = vmov 1   ;;  %v32_v5 = vld [vmem:[%s6650_s0 + $0x10] sm:$0xff]  ;;  %v33_v6 = vld [vmem:[%s6650_s0 + $0x18] sm:$0xff]  ;;  %v34_v7 = vld [vmem:[%s6650_s0 + $0x20] sm:$0xff]  ;;  %vm160_vm0 = vcmask 261120   ;;  %vm5747_vm1 = vmmov 0  }
  0x14   :  { %105 = vperm.xlu1 %5632, %v30_v2   ;;  %38 = vperm.xlu0 %5630, %v30_v2   ;;  %v62_v9 = vshrl.u32 %v61_v8, 7  ;;  %v35_v12 = vld [vmem:[#allocation2] sm:$0x7]  ;;  %v5814_v25 = vld [vmem:[%s6652_s2] ss:$0 sm:$0xff]  ;;  %vm404_vm2 = vcmask 523264   ;;  %vm5570_vm7 = vmpackc.low %vm160_vm0, %vm160_vm0 }
  0x15   :  { %vm697_vm3 = vcmask 1041408   ;;  %vm666_vm4 = vcmask 15360   ;;  %vm1252_vm5 = vcmask 1043456   ;;  %vm1221_vm6 = vcmask 31744  }
  0x16   :  { %v5802_v10 = vsub.s32 0, %v62_v9  ;;  %v92_v11 = vsub.s32 1, %v62_v9  ;;  %v126_v13 = vsub.s32 2, %v62_v9  ;;  %vm3439_vm8 = vcmask 195584  }
  0x17   :  { %vm3845_vm15 = vcmask 7168  }
  0x18   :  { %5633 = vset.pattern.permute.xlu1 %v5744_v1  ;;  %5631 = vset.pattern.permute.xlu0 %v5745_v4  ;;  %v5805_v15 = vrot.slane %v35_v12, %v5802_v10  ;;  %v93_v17 = vrot.slane %v35_v12, %v92_v11  ;;  %v5807_v18 = vrot.slane %v35_v12, %v126_v13 }
  0x19   :  { %43 = vperm.xlu1 %5633, %v31_v3   ;;  %71 = vperm.xlu0 %5631, %v30_v2  }
  0x1d   :  { %5634 = vset.pattern.permute.xlu1 %v5745_v4  ;;  %5635 = vset.pattern.permute.xlu0 %v5743_v0 }
  0x1e   :  { %75 = vperm.xlu1 %5634, %v31_v3   ;;  %109 = vperm.xlu0 %5635, %v31_v3  }
  0x22   :  { %5636 = vset.pattern.permute.xlu1 %v5744_v1  ;;  %113 = vperm.xlu0 %5635, %v32_v5  }
  0x23   :  { %48 = vperm.xlu1 %5636, %v32_v5  }
  0x26   :  { %5639 = vset.pattern.permute.xlu0 %v5745_v4 }
  0x27   :  { %5637 = vset.pattern.permute.xlu1 %v5745_v4  ;;  %83 = vperm.xlu0 %5639, %v33_v6  }
  0x28   :  { %79 = vperm.xlu1 %5637, %v32_v5  }
  0x2b   :  { %87 = vperm.xlu0 %5639, %v34_v7  }
  0x2c   :  { %5638 = vset.pattern.permute.xlu1 %v5744_v1 }
  0x2d   :  { %53 = vperm.xlu1 %5638, %v33_v6  }
  0x2f   :  { %5643 = vset.pattern.permute.xlu0 %v5743_v0 }
  0x31   :  { %5640 = vset.pattern.permute.xlu1 %v5743_v0 }
  0x32   :  { %117 = vperm.xlu1 %5640, %v33_v6  }
  0x36   :  { %5641 = vset.pattern.permute.xlu1 %v5744_v1 }
  0x37   :  { %58 = vperm.xlu1 %5641, %v34_v7  }
  0x3b   :  { %5642 = vset.pattern.permute.xlu1 %v5743_v0 }
  0x3c   :  { %121 = vperm.xlu1 %5642, %v34_v7  }
  0x93   :  { %v106_v14 = vpop.permute.xlu1 %105  ;;  %v39_v16 = vpop.permute.xlu0 %38 }
  0x94   :  { %v65_v19 = vmul.f32 %v5805_v15, %v39_v16  ;;  %v128_v23 = vmul.f32 %v5807_v18, %v106_v14 }
  0x98   :  { %v44_v20 = vpop.permute.xlu1 %43  ;;  %v72_v21 = vpop.permute.xlu0 %71 }
  0x99   :  { %v94_v22 = vmul.f32 %v93_v17, %v72_v21  ;;  %v66_v29 = vmul.f32 %v5805_v15, %v44_v20 }
  0x9b   :  { %v99_v24 = vadd.f32 %v94_v22, %v65_v19 }
  0x9d   :  { %v133_v26 = vadd.f32 %v128_v23, %v99_v24  ;;  %v76_v27 = vpop.permute.xlu1 %75  ;;  %v110_v28 = vpop.permute.xlu0 %109 }
  0x9e   :  { %v95_v30 = vmul.f32 %v93_v17, %v76_v27  ;;  %v129_v31 = vmul.f32 %v5807_v18, %v110_v28  ;;  %v271_v27 = vld [vmem:[#allocation2 + $0x10] sm:$0xff] }
  0x9f   :  { %v143_v32 = vadd.f32 %v5814_v25, %v133_v26  ;;  %v270_v26 = vld [vmem:[#allocation2 + $0x8] sm:$0xff] }
  0xa0   :  { %v100_v33 = vadd.f32 %v95_v30, %v66_v29  ;;  %v5228_v29 = vpack.c.bf16 %v271_v27, %v270_v26  ;;  %v5746_v30 = vmov 0.0|0.0  }
  0xa1   :  { %v148_v34 = vmul.f32 0.2, %v143_v32  ;;  %v114_v41 = vpop.permute.xlu0 %113  ;;  %5227 = vmatprep.subr.bf16.mxu0 %v5746_v30  ;;  %5233 = vmatprep.subr.bf16.mxu1 %v5746_v30 }
  0xa2   :  { %v134_v35 = vadd.f32 %v129_v31, %v100_v33  ;;  %v49_v36 = vpop.permute.xlu1 %48  ;;  %v130_v47 = vmul.f32 %v5807_v18, %v114_v41  ;;  %5229 = vmatpush3.bf16.msra.mxu0 %v5228_v29  ;;  %v273_v31 = vld [vmem:[#allocation2 + $0x20] sm:$0xff]  ;;  %v5748_v33 = vmov 0.0  }
  0xa3   :  { %v5819_v37 = vmax.f32 %v143_v32, %v148_v34  ;;  %v67_v45 = vmul.f32 %v5805_v15, %v49_v36  ;;  %5230 = vmatprep.subr.bf16.mxu0 %v5746_v30  ;;  %4389 = vmatprep.mubr.msk.f32.mxu0 %vm5747_vm1, %v5748_v33  ;;  %v396_v34 = vld [vmem:[#allocation2 + $0x2a8] sm:$0xff]  ;;  %v398_v36 = vld [vmem:[#allocation2 + $0x2b8] sm:$0xff] }
  0xa4   :  { %v144_v38 = vadd.f32 %v5814_v25, %v134_v35  ;;  %4420 = vmatprep.mubr.msk.f32.mxu1 %vm5747_vm1, %v5748_v33  ;;  %v397_v35 = vld [vmem:[#allocation2 + $0x2b0] sm:$0xff] }
  0xa5   :  { %v161_v39 = vsel %vm160_vm0, %v5819_v37, 0.0  ;;  %v182_v40 = vmul.f32 %v5819_v37, %v5819_v37 }
  0xa6   :  { %v149_v42 = vmul.f32 0.2, %v144_v38  ;;  %162 = vadd.xlane.f32.xlu0 %v161_v39  ;;  %v84_v52 = vpop.permute.xlu0 %83  ;;  %v399_v39 = vld [vmem:[#allocation2 + $0x2c0] sm:$0xff] }
  0xa7   :  { %v80_v43 = vpop.permute.xlu1 %79  ;;  %v187_v44 = vsel %vm160_vm0, %v182_v40, 0.0  ;;  %v97_v57 = vmul.f32 %v93_v17, %v84_v52  ;;  %v5875_v40 = vpack.c.bf16 %v399_v39, %v398_v36 }
  0xa8   :  { %v96_v46 = vmul.f32 %v93_v17, %v80_v43  ;;  %188 = vadd.xlane.f32.xlu1 %v187_v44  ;;  %v5829_v48 = vmax.f32 %v144_v38, %v149_v42  ;;  %v5872_v38 = vpack.c.bf16 %v397_v35, %v396_v34 }
  0xaa   :  { %v101_v49 = vadd.f32 %v96_v46, %v67_v45  ;;  %v164_v50 = vsel %vm160_vm0, %v5829_v48, 0.0  ;;  %v183_v51 = vmul.f32 %v5829_v48, %v5829_v48  ;;  %v88_v3 = vpop.permute.xlu0 %87  ;;  %5235 = vmatpush3.bf16.msra.mxu1 %v5872_v38 }
  0xab   :  { %165 = vadd.xlane.f32.xlu0 %v164_v50  ;;  %v98_v9 = vmul.f32 %v93_v17, %v88_v3  ;;  %5236 = vmatprep.subr.bf16.mxu1 %v5746_v30 }
  0xac   :  { %v135_v53 = vadd.f32 %v130_v47, %v101_v49  ;;  %v54_v54 = vpop.permute.xlu1 %53  ;;  %v190_v58 = vsel %vm160_vm0, %v183_v51, 0.0 }
  0xad   :  { %v68_v56 = vmul.f32 %v5805_v15, %v54_v54 }
  0xae   :  { %v145_v55 = vadd.f32 %v5814_v25, %v135_v53  ;;  %5238 = vmatpush3.bf16.msra.mxu1 %v5875_v40 }
  0xaf   :  { %191 = vadd.xlane.f32.xlu0 %v190_v58  ;;  %v102_v61 = vadd.f32 %v97_v57, %v68_v56  ;;  %5239 = vmatprep.subr.bf16.mxu1 %v5746_v30 }
  0xb0   :  { %v150_v59 = vmul.f32 0.2, %v145_v55 }
  0xb1   :  { %v118_v60 = vpop.permute.xlu1 %117 }
  0xb2   :  { %v131_v62 = vmul.f32 %v5807_v18, %v118_v60  ;;  %v5839_v63 = vmax.f32 %v145_v55, %v150_v59 }
  0xb4   :  { %v136_v0 = vadd.f32 %v131_v62, %v102_v61  ;;  %v167_v1 = vsel %vm160_vm0, %v5839_v63, 0.0  ;;  %v184_v2 = vmul.f32 %v5839_v63, %v5839_v63 }
  0xb5   :  { %168 = vadd.xlane.f32.xlu1 %v167_v1 }
  0xb6   :  { %v146_v4 = vadd.f32 %v5814_v25, %v136_v0  ;;  %v59_v5 = vpop.permute.xlu1 %58  ;;  %v193_v6 = vsel %vm160_vm0, %v184_v2, 0.0 }
  0xb7   :  { %194 = vadd.xlane.f32.xlu0 %v193_v6  ;;  %v69_v11 = vmul.f32 %v5805_v15, %v59_v5 }
  0xb8   :  { %v151_v7 = vmul.f32 0.2, %v146_v4 }
  0xb9   :  { %v103_v14 = vadd.f32 %v98_v9, %v69_v11  ;;  %v3858_v11 = vld [vmem:[%s6652_s2 + $0x1] ss:$0 sm:$0xff] }
  0xba   :  { %v5848_v12 = vmax.f32 %v146_v4, %v151_v7 }
  0xbb   :  { %v122_v13 = vpop.permute.xlu1 %121 }
  0xbc   :  { %v132_v16 = vmul.f32 %v5807_v18, %v122_v13  ;;  %v170_v19 = vsel %vm160_vm0, %v5848_v12, 0.0  ;;  %v185_v20 = vmul.f32 %v5848_v12, %v5848_v12 }
  0xbd   :  { %171 = vadd.xlane.f32.xlu1 %v170_v19 }
  0xbe   :  { %v137_v21 = vadd.f32 %v132_v16, %v103_v14  ;;  %v196_v22 = vsel %vm160_vm0, %v185_v20, 0.0  ;;  %v3859_v20 = vld [vmem:[%s6652_s2 + $0x2] ss:$0 sm:$0xff] }
  0xbf   :  { %197 = vadd.xlane.f32.xlu0 %v196_v22 }
  0xc0   :  { %v147_v17 = vadd.f32 %v5814_v25, %v137_v21  ;;  %v272_v25 = vld [vmem:[#allocation2 + $0x18] sm:$0xff] }
  0xc1   :  { %v5231_v32 = vpack.c.bf16 %v273_v31, %v272_v25 }
  0xc2   :  { %v152_v15 = vmul.f32 0.2, %v147_v17 }
  0xc3   :  { %5232 = vmatpush3.bf16.msra.mxu0 %v5231_v32 }
  0xc4   :  { %v5857_v23 = vmax.f32 %v147_v17, %v152_v15  ;;  %5245 = vmatprep.subr.bf16.mxu0 %v5746_v30 }
  0xc6   :  { %v173_v24 = vsel %vm160_vm0, %v5857_v23, 0.0  ;;  %v186_v18 = vmul.f32 %v5857_v23, %v5857_v23 }
  0xc7   :  { %174 = vadd.xlane.f32.xlu1 %v173_v24 }
  0xc8   :  { %v199_v28 = vsel %vm160_vm0, %v186_v18, 0.0 }
  0xc9   :  { %200 = vadd.xlane.f32.xlu0 %v199_v28 }
 0x133   :  { %v163_v41 = vpop.xlane.xlu0 %162 }
 0x134   :  { %v177_v42 = vmul.f32 0.03125, %v163_v41 }
 0x135   :  { %v189_v43 = vpop.xlane.xlu1 %188 }
 0x136   :  { %v207_v44 = vmul.f32 %v177_v42, %v177_v42  ;;  %v202_v45 = vmul.f32 0.03125, %v189_v43  ;;  %v232_v0 = vsub.f32 0.0, %v177_v42 }
 0x138   :  { %v212_v46 = vsub.f32 %v202_v45, %v207_v44  ;;  %v166_v47 = vpop.xlane.xlu0 %165 }
 0x139   :  { %v178_v49 = vmul.f32 0.03125, %v166_v47 }
 0x13a   :  { %v217_v50 = vmax.f32 %v212_v46, 0.0 }
 0x13b   :  { %v208_v53 = vmul.f32 %v178_v49, %v178_v49  ;;  %v233_v21 = vsub.f32 0.0, %v178_v49 }
 0x13c   :  { %v222_v51 = vadd.f32 1e-05, %v217_v50  ;;  %v192_v52 = vpop.xlane.xlu0 %191 }
 0x13d   :  { %v203_v54 = vmul.f32 0.03125, %v192_v52 }
 0x13e   :  { %5644 = vrsqrt.f32 %v222_v51 }
 0x13f   :  { %v213_v55 = vsub.f32 %v203_v54, %v208_v53 }
 0x141   :  { %v218_v56 = vmax.f32 %v213_v55, 0.0 }
 0x142   :  { %v169_v57 = vpop.xlane.xlu1 %168 }
 0x143   :  { %v223_v58 = vadd.f32 1e-05, %v218_v56  ;;  %v179_v59 = vmul.f32 0.03125, %v169_v57 }
 0x144   :  { %v195_v60 = vpop.xlane.xlu0 %194 }
 0x145   :  { %5646 = vrsqrt.f32 %v223_v58  ;;  %v209_v61 = vmul.f32 %v179_v59, %v179_v59  ;;  %v204_v62 = vmul.f32 0.03125, %v195_v60  ;;  %v234_v32 = vsub.f32 0.0, %v179_v59 }
 0x147   :  { %v214_v1 = vsub.f32 %v204_v62, %v209_v61 }
 0x148   :  { %v5645_v2 = vpop.eup %5644 }
 0x149   :  { %v219_v3 = vmax.f32 %v214_v1, 0.0  ;;  %v237_v4 = vmul.f32 %v5645_v2, %v232_v0  ;;  %v242_v5 = vmul.f32 %v5645_v2, %v5819_v37  ;;  %v401_v0 = vld [vmem:[#allocation2 + $0x2d0] sm:$0xff]  ;;  %v402_v2 = vld [vmem:[#allocation2 + $0x2d8] sm:$0xff] }
 0x14a   :  { %v172_v6 = vpop.xlane.xlu1 %171 }
 0x14b   :  { %v224_v7 = vadd.f32 1e-05, %v219_v3  ;;  %v180_v9 = vmul.f32 0.03125, %v172_v6  ;;  %v247_v13 = vadd.f32 %v242_v5, %v237_v4  ;;  %v3860_v4 = vld [vmem:[%s6652_s2 + $0x3] ss:$0 sm:$0xff] }
 0x14c   :  { %v198_v14 = vpop.xlane.xlu0 %197 }
 0x14d   :  { %5648 = vrsqrt.f32 %v224_v7  ;;  %v210_v16 = vmul.f32 %v180_v9, %v180_v9  ;;  %v205_v19 = vmul.f32 0.03125, %v198_v14  ;;  %v256_v22 = vmul.f32 %v3858_v11, %v247_v13 }
 0x14e   :  { %v235_v49 = vsub.f32 0.0, %v180_v9 }
 0x14f   :  { %v5647_v17 = vpop.eup %5646  ;;  %v215_v37 = vsub.f32 %v205_v19, %v210_v16  ;;  %v265_v15 = vadd.f32 %v3859_v20, %v256_v22 }
 0x150   :  { %v238_v24 = vmul.f32 %v5647_v17, %v233_v21  ;;  %v243_v18 = vmul.f32 %v5647_v17, %v5829_v48 }
 0x151   :  { %v220_v26 = vmax.f32 %v215_v37, 0.0  ;;  %4390 = vmatmul.mubr.msk.f32.vlgmr.msra.gmra.mrb[0].mxu0 %vm160_vm0, %v265_v15 }
 0x152   :  { %v248_v27 = vadd.f32 %v243_v18, %v238_v24  ;;  %4392 = vmatprep.mubr.msk.f32.mxu0 %vm5747_vm1, %v5748_v33  ;;  %5247 = vmatpush3.bf16.msra.mxu0 %v5872_v38 }
 0x153   :  { %v225_v28 = vadd.f32 1e-05, %v220_v26  ;;  %5248 = vmatprep.subr.bf16.mxu0 %v5746_v30 }
 0x154   :  { %v175_v29 = vpop.xlane.xlu1 %174  ;;  %v257_v25 = vmul.f32 %v3858_v11, %v248_v27 }
 0x155   :  { %5650 = vrsqrt.f32 %v225_v28  ;;  %v181_v31 = vmul.f32 0.03125, %v175_v29 }
 0x156   :  { %v201_v34 = vpop.xlane.xlu0 %200  ;;  %v266_v35 = vadd.f32 %v3859_v20, %v257_v25  ;;  %5250 = vmatpush3.bf16.msra.mxu0 %v5875_v40 }
 0x157   :  { %v5649_v48 = vpop.eup %5648  ;;  %v211_v36 = vmul.f32 %v181_v31, %v181_v31  ;;  %v206_v39 = vmul.f32 0.03125, %v201_v34  ;;  %5251 = vmatprep.subr.bf16.mxu0 %v5746_v30  ;;  %v236_v56 = vsub.f32 0.0, %v181_v31 }
 0x158   :  { %4393 = vmatmul.mubr.msk.f32.gmra.mrb[2].mxu0 %vm160_vm0, %v266_v35  ;;  %v239_v41 = vmul.f32 %v5649_v48, %v234_v32  ;;  %v244_v42 = vmul.f32 %v5649_v48, %v5839_v63 }
 0x159   :  { %v216_v43 = vsub.f32 %v206_v39, %v211_v36  ;;  %4395 = vmatprep.mubr.msk.f32.mxu0 %vm5747_vm1, %v5748_v33 }
 0x15a   :  { %v249_v44 = vadd.f32 %v244_v42, %v239_v41  ;;  %v665_v42 = vld [vmem:[#allocation2 + $0x2e8] sm:$0x3] }
 0x15b   :  { %v221_v45 = vmax.f32 %v216_v43, 0.0 }
 0x15c   :  { %v258_v46 = vmul.f32 %v3858_v11, %v249_v44 }
 0x15d   :  { %v226_v47 = vadd.f32 1e-05, %v221_v45 }
 0x15e   :  { %v267_v50 = vadd.f32 %v3859_v20, %v258_v46 }
 0x15f   :  { %v5651_v51 = vpop.eup %5650  ;;  %5652 = vrsqrt.f32 %v226_v47 }
 0x160   :  { %4396 = vmatmul.mubr.msk.f32.gmra.mrb[4].mxu0 %vm160_vm0, %v267_v50  ;;  %v240_v52 = vmul.f32 %v5651_v51, %v235_v49  ;;  %v245_v53 = vmul.f32 %v5651_v51, %v5848_v12  ;;  %v400_v12 = vld [vmem:[#allocation2 + $0x2c8] sm:$0xff] }
 0x161   :  { %4398 = vmatprep.mubr.msk.f32.mxu0 %vm5747_vm1, %v5748_v33  ;;  %v5910_v1 = vpack.c.bf16 %v401_v0, %v400_v12 }
 0x162   :  { %v250_v63 = vadd.f32 %v245_v53, %v240_v52 }
 0x163   :  { %5241 = vmatpush3.bf16.msra.mxu1 %v5910_v1  ;;  %5253 = vmatpush3.bf16.msra.mxu0 %v5910_v1 }
 0x164   :  { %v259_v54 = vmul.f32 %v3858_v11, %v250_v63  ;;  %5242 = vmatprep.subr.bf16.mxu1 %v5746_v30  ;;  %5254 = vmatprep.subr.bf16.mxu0 %v5746_v30 }
 0x166   :  { %v268_v55 = vadd.f32 %v3859_v20, %v259_v54 }
 0x168   :  { %4399 = vmatmul.mubr.msk.f32.gmra.mrb[6].mxu0 %vm160_vm0, %v268_v55 }
 0x169   :  { %v5653_v57 = vpop.eup %5652  ;;  %4401 = vmatprep.mubr.msk.f32.mxu0 %vm5747_vm1, %v5748_v33 }
 0x16a   :  { %v241_v58 = vmul.f32 %v5653_v57, %v236_v56  ;;  %v246_v59 = vmul.f32 %v5653_v57, %v5857_v23  ;;  %v403_v23 = vld [vmem:[#allocation2 + $0x2e0] sm:$0xff] }
 0x16b   :  { %v5916_v3 = vpack.c.bf16 %v403_v23, %v402_v2 }
 0x16c   :  { %v251_v60 = vadd.f32 %v246_v59, %v241_v58 }
 0x16d   :  { %5244 = vmatpush3.bf16.msra.mxu1 %v5916_v3  ;;  %5256 = vmatpush3.bf16.msra.mxu0 %v5916_v3 }
 0x16e   :  { %v260_v61 = vmul.f32 %v3858_v11, %v251_v60  ;;  %5611 = vmatprep.subr.bf16.mxu1 %v5746_v30  ;;  %5257 = vmatprep.subr.bf16.mxu0 %v5746_v30 }
 0x170   :  { %v269_v62 = vadd.f32 %v3859_v20, %v260_v61 }
 0x172   :  { %4402 = vmatmul.mubr.msk.f32.gmra.mrb[8].mxu0 %vm160_vm0, %v269_v62 }
 0x173   :  { %4451 = vmatprep.mubr.msk.f32.mxu0 %vm5747_vm1, %v5748_v33 }
 0x224   :  { %v360_v5 = vpop.f32.mrb[0].mxu0 }
 0x225   :  { %v361_v6 = vadd.f32 %v3860_v4, %v360_v5  ;;  %v4391_v7 = vpop.f32.mrb[1].mxu0 }
 0x227   :  { %v384_v9 = vmul.f32 0.2, %v361_v6 }
 0x229   :  { %v5925_v11 = vmax.f32 %v361_v6, %v384_v9 }
 0x22b   :  { %v365_v13 = vpop.f32.mrb[2].mxu0  ;;  %v510_v14 = vmul.f32 %v5925_v11, %v5925_v11  ;;  %4421 = vmatmul.mubr.msk.f32.vlgmr.msra.gmra.mrb[0].mxu1 %vm404_vm2, %v5925_v11 }
 0x22c   :  { %v366_v16 = vadd.f32 %v3860_v4, %v365_v13  ;;  %v4394_v19 = vpop.f32.mrb[3].mxu0  ;;  %4423 = vmatprep.mubr.msk.f32.mxu1 %vm5747_vm1, %v5748_v33  ;;  %5615 = vmatpush3.bf16.msra.mxu1 %v5872_v38 }
 0x22d   :  { %4452 = vmatmul.mubr.msk.f32.vlgmr.msra.gmra.mrb[10].mxu0 %vm404_vm2, %v510_v14  ;;  %5612 = vmatprep.subr.bf16.mxu1 %v5746_v30 }
 0x22e   :  { %v385_v20 = vmul.f32 0.2, %v366_v16  ;;  %4454 = vmatprep.mubr.msk.f32.mxu0 %vm5747_vm1, %v5748_v33 }
 0x230   :  { %v5938_v21 = vmax.f32 %v366_v16, %v385_v20  ;;  %5616 = vmatpush3.bf16.msra.mxu1 %v5875_v40 }
 0x231   :  { %5613 = vmatprep.subr.bf16.mxu1 %v5746_v30 }
 0x232   :  { %v511_v22 = vmul.f32 %v5938_v21, %v5938_v21  ;;  %4424 = vmatmul.mubr.msk.f32.gmra.mrb[2].mxu1 %vm404_vm2, %v5938_v21 }
 0x233   :  { %v370_v17 = vpop.f32.mrb[4].mxu0  ;;  %4426 = vmatprep.mubr.msk.f32.mxu1 %vm5747_vm1, %v5748_v33 }
 0x234   :  { %v371_v37 = vadd.f32 %v3860_v4, %v370_v17  ;;  %v4397_v15 = vpop.f32.mrb[5].mxu0  ;;  %4455 = vmatmul.mubr.msk.f32.gmra.mrb[12].mxu0 %vm404_vm2, %v511_v22  ;;  %5617 = vmatpush3.bf16.msra.mxu1 %v5910_v1 }
 0x235   :  { %4457 = vmatprep.mubr.msk.f32.mxu0 %vm5747_vm1, %v5748_v33  ;;  %5614 = vmatprep.subr.bf16.mxu1 %v5746_v30 }
 0x236   :  { %v386_v24 = vmul.f32 0.2, %v371_v37 }
 0x238   :  { %v5953_v18 = vmax.f32 %v371_v37, %v386_v24  ;;  %5618 = vmatpush3.bf16.msra.mxu1 %v5916_v3 }
 0x239   :  { %4466 = vmatprep.subr.msk.mxu1 %vm697_vm3, %v665_v42 }
 0x23a   :  { %v512_v26 = vmul.f32 %v5953_v18, %v5953_v18  ;;  %4427 = vmatmul.mubr.msk.f32.gmra.mrb[4].mxu1 %vm404_vm2, %v5953_v18 }
 0x23b   :  { %v375_v27 = vpop.f32.mrb[6].mxu0  ;;  %4429 = vmatprep.mubr.msk.f32.mxu1 %vm5747_vm1, %v5748_v33 }
 0x23c   :  { %v376_v28 = vadd.f32 %v3860_v4, %v375_v27  ;;  %v4400_v29 = vpop.f32.mrb[7].mxu0  ;;  %4458 = vmatmul.mubr.msk.f32.gmra.mrb[14].mxu0 %vm404_vm2, %v512_v26 }
 0x23d   :  { %4460 = vmatprep.mubr.msk.f32.mxu0 %vm5747_vm1, %v5748_v33 }
 0x23e   :  { %v387_v25 = vmul.f32 0.2, %v376_v28 }
 0x240   :  { %v5965_v31 = vmax.f32 %v376_v28, %v387_v25 }
 0x242   :  { %v513_v32 = vmul.f32 %v5965_v31, %v5965_v31  ;;  %4430 = vmatmul.mubr.msk.f32.gmra.mrb[6].mxu1 %vm404_vm2, %v5965_v31 }
 0x243   :  { %4432 = vmatprep.mubr.msk.f32.mxu1 %vm5747_vm1, %v5748_v33 }
 0x244   :  { %4461 = vmatmul.mubr.msk.f32.gmra.mrb[16].mxu0 %vm404_vm2, %v513_v32 }
 0x245   :  { %v380_v34 = vpop.f32.mrb[8].mxu0  ;;  %4499 = vmatprep.mubr.msk.f32.mxu0 %vm5747_vm1, %v5748_v33 }
 0x246   :  { %v381_v35 = vadd.f32 %v3860_v4, %v380_v34  ;;  %v4403_v48 = vpop.f32.mrb[9].mxu0 }
 0x248   :  { %v388_v36 = vmul.f32 0.2, %v381_v35 }
 0x24a   :  { %v5976_v39 = vmax.f32 %v381_v35, %v388_v36 }
 0x24c   :  { %4433 = vmatmul.mubr.msk.f32.gmra.mrb[8].mxu1 %vm404_vm2, %v5976_v39  ;;  %v514_v41 = vmul.f32 %v5976_v39, %v5976_v39 }
 0x24d   :  { %4463 = vmatprep.mubr.msk.f32.mxu1 %vm5747_vm1, %v5748_v33 }
 0x250   :  { %4464 = vmatmul.mubr.msk.f32.vlgmr.msra.gmra.mrb[10].mxu1 %vm404_vm2, %v514_v41 }
 0x251   :  { %4467 = vmatpush3.msk.msra.mxu1 %vm697_vm3, %v665_v42 }
 0x252   :  { %5269 = vmatprep.subr.bf16.mxu1 %v5746_v30 }
 0x2fe   :  { %v486_v43 = vpop.f32.mrb[0].mxu1 }
 0x2ff   :  { %v620_v44 = vmul.f32 0.03125, %v486_v43  ;;  %v4422_v45 = vpop.f32.mrb[1].mxu1 }
 0x300   :  { %v596_v46 = vpop.f32.mrb[10].mxu0 }
 0x301   :  { %v630_v47 = vmul.f32 %v620_v44, %v620_v44  ;;  %v625_v49 = vmul.f32 0.03125, %v596_v46  ;;  %v4453_v50 = vpop.f32.mrb[11].mxu0  ;;  %v655_v9 = vsub.f32 0.0, %v620_v44 }
 0x303   :  { %v635_v51 = vsub.f32 %v625_v49, %v630_v47 }
 0x305   :  { %v491_v52 = vpop.f32.mrb[2].mxu1  ;;  %v640_v53 = vmax.f32 %v635_v51, 0.0 }
 0x306   :  { %v621_v63 = vmul.f32 0.03125, %v491_v52  ;;  %v4425_v54 = vpop.f32.mrb[3].mxu1 }
 0x307   :  { %v601_v55 = vpop.f32.mrb[12].mxu0  ;;  %v645_v56 = vadd.f32 1e-05, %v640_v53 }
 0x308   :  { %v631_v57 = vmul.f32 %v621_v63, %v621_v63  ;;  %v626_v58 = vmul.f32 0.03125, %v601_v55  ;;  %v4456_v59 = vpop.f32.mrb[13].mxu0  ;;  %v656_v27 = vsub.f32 0.0, %v621_v63 }
 0x309   :  { %5654 = vrsqrt.f32 %v645_v56  ;;  %v846_v59 = vld [vmem:[#allocation2 + $0x38] sm:$0xff] }
 0x30a   :  { %v636_v60 = vsub.f32 %v626_v58, %v631_v57  ;;  %v844_v57 = vld [vmem:[#allocation2 + $0x28] sm:$0xff]  ;;  %v845_v58 = vld [vmem:[#allocation2 + $0x30] sm:$0xff] }
 0x30c   :  { %v641_v61 = vmax.f32 %v636_v60, 0.0  ;;  %v5258_v60 = vpack.c.bf16 %v845_v58, %v844_v57 }
 0x30d   :  { %v496_v62 = vpop.f32.mrb[4].mxu1 }
 0x30e   :  { %v646_v12 = vadd.f32 1e-05, %v641_v61  ;;  %v622_v0 = vmul.f32 0.03125, %v496_v62  ;;  %v4428_v2 = vpop.f32.mrb[5].mxu1  ;;  %v847_v61 = vld [vmem:[#allocation2 + $0x40] sm:$0xff]  ;;  %5259 = vmatpush3.bf16.msra.mxu0 %v5258_v60 }
 0x30f   :  { %v606_v23 = vpop.f32.mrb[14].mxu0  ;;  %v5261_v62 = vpack.c.bf16 %v847_v61, %v846_v59  ;;  %5260 = vmatprep.subr.bf16.mxu0 %v5746_v30 }
 0x310   :  { %5656 = vrsqrt.f32 %v646_v12  ;;  %v632_v4 = vmul.f32 %v622_v0, %v622_v0  ;;  %v627_v5 = vmul.f32 0.03125, %v606_v23  ;;  %v4459_v6 = vpop.f32.mrb[15].mxu0  ;;  %v657_v41 = vsub.f32 0.0, %v622_v0  ;;  %v848_v12 = vld [vmem:[#allocation2 + $0x48] sm:$0xff]  ;;  %v849_v0 = vld [vmem:[#allocation2 + $0x50] sm:$0xff]  ;;  %v850_v23 = vld [vmem:[#allocation2 + $0x58] sm:$0xff] }
 0x311   :  { %v5264_v2 = vpack.c.bf16 %v849_v0, %v848_v12  ;;  %v974_v6 = vld [vmem:[#allocation2 + $0x2f0] sm:$0xff]  ;;  %v987_v0 = vld [vmem:[#allocation2 + $0x358] sm:$0xff] }
 0x312   :  { %v637_v7 = vsub.f32 %v627_v5, %v632_v4  ;;  %5262 = vmatpush3.bf16.msra.mxu0 %v5261_v62  ;;  %v851_v4 = vld [vmem:[#allocation2 + $0x60] sm:$0xff]  ;;  %v986_v12 = vld [vmem:[#allocation2 + $0x350] sm:$0xff] }
 0x313   :  { %v5655_v13 = vpop.eup %5654  ;;  %5263 = vmatprep.subr.bf16.mxu0 %v5746_v30  ;;  %v5267_v5 = vpack.c.bf16 %v851_v4, %v850_v23  ;;  %v988_v23 = vld [vmem:[#allocation2 + $0x360] sm:$0xff]  ;;  %v989_v4 = vld [vmem:[#allocation2 + $0x368] sm:$0xff] }
 0x314   :  { %v642_v14 = vmax.f32 %v637_v7, 0.0  ;;  %4468 = vmatprep.mubr.msk.f32.mxu1 %vm666_vm4, %v5655_v13  ;;  %v660_v19 = vmul.f32 %v5655_v13, %v655_v9  ;;  %v975_v7 = vld [vmem:[#allocation2 + $0x2f8] sm:$0xff]  ;;  %v976_v9 = vld [vmem:[#allocation2 + $0x300] sm:$0xff] }
 0x315   :  { %v501_v16 = vpop.f32.mrb[6].mxu1  ;;  %v6004_v13 = vpack.c.bf16 %v975_v7, %v974_v6  ;;  %v3889_v6 = vld [vmem:[%s6652_s2 + $0x6] ss:$0 sm:$0xff] }
 0x316   :  { %v647_v20 = vadd.f32 1e-05, %v642_v14  ;;  %v623_v22 = vmul.f32 0.03125, %v501_v16  ;;  %v4431_v17 = vpop.f32.mrb[7].mxu1  ;;  %5265 = vmatpush3.bf16.msra.mxu0 %v5264_v2  ;;  %v977_v14 = vld [vmem:[#allocation2 + $0x308] sm:$0xff]  ;;  %v6066_v2 = vpack.c.bf16 %v987_v0, %v986_v12 }
 0x317   :  { %v611_v37 = vpop.f32.mrb[16].mxu0  ;;  %5266 = vmatprep.subr.bf16.mxu0 %v5746_v30  ;;  %v6007_v16 = vpack.c.bf16 %v977_v14, %v976_v9  ;;  %v980_v17 = vld [vmem:[#allocation2 + $0x320] sm:$0xff] }
 0x318   :  { %5658 = vrsqrt.f32 %v647_v20  ;;  %v633_v15 = vmul.f32 %v623_v22, %v623_v22  ;;  %v628_v24 = vmul.f32 0.03125, %v611_v37  ;;  %v4462_v26 = vpop.f32.mrb[17].mxu0  ;;  %v658_v51 = vsub.f32 0.0, %v623_v22  ;;  %v979_v20 = vld [vmem:[#allocation2 + $0x318] sm:$0xff]  ;;  %v981_v37 = vld [vmem:[#allocation2 + $0x328] sm:$0xff] }
 0x319   :  { %v983_v26 = vld [vmem:[#allocation2 + $0x338] sm:$0xff] }
 0x31a   :  { %v5657_v28 = vpop.eup %5656  ;;  %v638_v29 = vsub.f32 %v628_v24, %v633_v15  ;;  %5268 = vmatpush3.bf16.msra.mxu0 %v5267_v5  ;;  %v6015_v15 = vpack.c.bf16 %v981_v37, %v980_v17  ;;  %v982_v24 = vld [vmem:[#allocation2 + $0x330] sm:$0xff]  ;;  %v6072_v5 = vpack.c.bf16 %v989_v4, %v988_v23 }
 0x31b   :  { %4469 = vmatmul.mubr.msk.f32.vlgmr.msra.gmra.mrb[12].mxu1 %vm666_vm4, %v5657_v28  ;;  %v661_v25 = vmul.f32 %v5657_v28, %v656_v27  ;;  %5293 = vmatprep.subr.bf16.mxu0 %v5746_v30  ;;  %v6019_v27 = vpack.c.bf16 %v983_v26, %v982_v24  ;;  %v984_v28 = vld [vmem:[#allocation2 + $0x340] sm:$0xff] }
 0x31c   :  { %v643_v32 = vmax.f32 %v638_v29, 0.0  ;;  %5271 = vmatpush3.bf16.msra.mxu1 %v6004_v13  ;;  %v985_v29 = vld [vmem:[#allocation2 + $0x348] sm:$0xff] }
 0x31d   :  { %5272 = vmatprep.subr.bf16.mxu1 %v5746_v30 }
 0x31e   :  { %v648_v34 = vadd.f32 1e-05, %v643_v32 }
 0x31f   :  { %v506_v35 = vpop.f32.mrb[8].mxu1 }
 0x320   :  { %5660 = vrsqrt.f32 %v648_v34  ;;  %v624_v48 = vmul.f32 0.03125, %v506_v35  ;;  %v4434_v36 = vpop.f32.mrb[9].mxu1  ;;  %5274 = vmatpush3.bf16.msra.mxu1 %v6007_v16 }
 0x321   :  { %5275 = vmatprep.subr.bf16.mxu1 %v5746_v30 }
 0x322   :  { %v5659_v42 = vpop.eup %5658  ;;  %v634_v45 = vmul.f32 %v624_v48, %v624_v48  ;;  %v659_v54 = vsub.f32 0.0, %v624_v48 }
 0x323   :  { %v616_v43 = vpop.f32.mrb[10].mxu1  ;;  %4471 = vmatprep.mubr.msk.f32.mxu1 %vm666_vm4, %v5659_v42  ;;  %v662_v44 = vmul.f32 %v5659_v42, %v657_v41  ;;  %v3887_v41 = vld [vmem:[%s6652_s2 + $0x4] ss:$0 sm:$0xff] }
 0x324   :  { %v629_v46 = vmul.f32 0.03125, %v616_v43  ;;  %v4465_v47 = vpop.f32.mrb[11].mxu1 }
 0x326   :  { %v639_v49 = vsub.f32 %v629_v46, %v634_v45  ;;  %v3888_v45 = vld [vmem:[%s6652_s2 + $0x5] ss:$0 sm:$0xff] }
 0x328   :  { %v644_v50 = vmax.f32 %v639_v49, 0.0 }
 0x32a   :  { %v5661_v52 = vpop.eup %5660  ;;  %v649_v53 = vadd.f32 1e-05, %v644_v50 }
 0x32b   :  { %4472 = vmatmul.mubr.msk.f32.gmra.mrb[14].mxu1 %vm666_vm4, %v5661_v52  ;;  %v663_v63 = vmul.f32 %v5661_v52, %v658_v51 }
 0x32c   :  { %5662 = vrsqrt.f32 %v649_v53 }
 0x336   :  { %v5663_v55 = vpop.eup %5662 }
 0x337   :  { %4474 = vmatprep.mubr.msk.f32.mxu1 %vm666_vm4, %v5663_v55  ;;  %v664_v56 = vmul.f32 %v5663_v55, %v659_v54 }
 0x338   :  { %4475 = vmatmul.mubr.msk.f32.gmra.mrb[16].mxu1 %vm666_vm4, %v660_v19  ;;  %v978_v19 = vld [vmem:[#allocation2 + $0x310] sm:$0xff] }
 0x339   :  { %4477 = vmatprep.mubr.msk.f32.mxu1 %vm666_vm4, %v661_v25  ;;  %v6011_v22 = vpack.c.bf16 %v979_v20, %v978_v19  ;;  %v6023_v25 = vpack.c.bf16 %v985_v29, %v984_v28 }
 0x33b   :  { %5277 = vmatpush3.bf16.msra.mxu1 %v6011_v22 }
 0x33c   :  { %4478 = vmatmul.mubr.msk.f32.gmra.mrb[18].mxu1 %vm666_vm4, %v662_v44  ;;  %5278 = vmatprep.subr.bf16.mxu1 %v5746_v30 }
 0x33d   :  { %4480 = vmatprep.mubr.msk.f32.mxu1 %vm666_vm4, %v663_v63 }
 0x33f   :  { %5280 = vmatpush3.bf16.msra.mxu1 %v6015_v15 }
 0x340   :  { %4481 = vmatmul.mubr.msk.f32.gmra.mrb[20].mxu1 %vm666_vm4, %v664_v56  ;;  %5281 = vmatprep.subr.bf16.mxu1 %v5746_v30 }
 0x341   :  { %4546 = vmatprep.mubr.msk.f32.mxu1 %vm5747_vm1, %v5748_v33 }
 0x343   :  { %5283 = vmatpush3.bf16.msra.mxu1 %v6019_v27 }
 0x344   :  { %5284 = vmatprep.subr.bf16.mxu1 %v5746_v30 }
 0x347   :  { %5286 = vmatpush3.bf16.msra.mxu1 %v6023_v25 }
 0x348   :  { %5287 = vmatprep.subr.bf16.mxu1 %v5746_v30 }
 0x34b   :  { %5289 = vmatpush3.bf16.msra.mxu1 %v6066_v2 }
 0x34c   :  { %5290 = vmatprep.subr.bf16.mxu1 %v5746_v30 }
 0x34f   :  { %5292 = vmatpush3.bf16.msra.mxu1 %v6072_v5 }
 0x3ee   :  { %v4470_v32 = vpop.f32.mrb[12].mxu1 }
 0x3ef   :  { %v767_v34 = vpop.f32.mrb[13].mxu1  ;;  %v817_v49 = vmul.f32 %v4470_v32, %v5938_v21 }
 0x3f0   :  { %v816_v36 = vmul.f32 %v767_v34, %v5925_v11 }
 0x3fe   :  { %v4473_v35 = vpop.f32.mrb[14].mxu1 }
 0x3ff   :  { %v777_v48 = vpop.f32.mrb[15].mxu1  ;;  %v819_v54 = vmul.f32 %v4473_v35, %v5965_v31 }
 0x400   :  { %v818_v46 = vmul.f32 %v777_v48, %v5953_v18 }
 0x40b   :  { %v4476_v42 = vpop.f32.mrb[16].mxu1 }
 0x40c   :  { %v821_v43 = vadd.f32 %v4476_v42, %v816_v36  ;;  %v787_v44 = vpop.f32.mrb[17].mxu1 }
 0x40d   :  { %v820_v63 = vmul.f32 %v787_v44, %v5976_v39 }
 0x40e   :  { %v830_v47 = vmul.f32 %v3887_v41, %v821_v43 }
 0x40f   :  { %v4479_v50 = vpop.f32.mrb[18].mxu1 }
 0x410   :  { %v839_v51 = vadd.f32 %v3888_v45, %v830_v47  ;;  %v823_v52 = vadd.f32 %v4479_v50, %v818_v46  ;;  %v797_v11 = vpop.f32.mrb[19].mxu1 }
 0x411   :  { %v822_v53 = vadd.f32 %v817_v49, %v797_v11 }
 0x412   :  { %4500 = vmatmul.mubr.msk.f32.vlgmr.msra.gmra.mrb[18].mxu0 %vm404_vm2, %v839_v51  ;;  %v832_v57 = vmul.f32 %v3887_v41, %v823_v52 }
 0x413   :  { %v831_v55 = vmul.f32 %v3887_v41, %v822_v53  ;;  %v4482_v56 = vpop.f32.mrb[20].mxu1  ;;  %4502 = vmatprep.mubr.msk.f32.mxu0 %vm5747_vm1, %v5748_v33  ;;  %5295 = vmatpush3.bf16.msra.mxu0 %v6004_v13 }
 0x414   :  { %v825_v18 = vadd.f32 %v4482_v56, %v820_v63  ;;  %v807_v21 = vpop.f32.mrb[21].mxu1  ;;  %5296 = vmatprep.subr.bf16.mxu0 %v5746_v30  ;;  %v841_v31 = vadd.f32 %v3888_v45, %v832_v57  ;;  %v1400_v56 = vld [vmem:[#allocation2 + $0x70] sm:$0xff]  ;;  %v1402_v57 = vld [vmem:[#allocation2 + $0x80] sm:$0xff] }
 0x415   :  { %v840_v58 = vadd.f32 %v3888_v45, %v831_v55  ;;  %v824_v59 = vadd.f32 %v819_v54, %v807_v21  ;;  %v6123_v54 = vld [vmem:[#allocation2 + $0x370] sm:$0xf]  ;;  %v1399_v55 = vld [vmem:[#allocation2 + $0x68] sm:$0xff] }
 0x416   :  { %v834_v60 = vmul.f32 %v3887_v41, %v825_v18  ;;  %4608 = vmatprep.subr.msk.mxu1 %vm1252_vm5, %v6123_v54  ;;  %v1401_v18 = vld [vmem:[#allocation2 + $0x78] sm:$0xff]  ;;  %v5318_v21 = vpack.c.bf16 %v1400_v56, %v1399_v55 }
 0x417   :  { %4503 = vmatmul.mubr.msk.f32.gmra.mrb[20].mxu0 %vm404_vm2, %v840_v58  ;;  %v833_v39 = vmul.f32 %v3887_v41, %v824_v59  ;;  %v5321_v58 = vpack.c.bf16 %v1402_v57, %v1401_v18  ;;  %v1403_v59 = vld [vmem:[#allocation2 + $0x88] sm:$0xff] }
 0x418   :  { %4505 = vmatprep.mubr.msk.f32.mxu0 %vm5747_vm1, %v5748_v33  ;;  %5298 = vmatpush3.bf16.msra.mxu0 %v6007_v16  ;;  %v843_v62 = vadd.f32 %v3888_v45, %v834_v60 }
 0x419   :  { %5299 = vmatprep.subr.bf16.mxu0 %v5746_v30  ;;  %v842_v61 = vadd.f32 %v3888_v45, %v833_v39 }
 0x41b   :  { %4506 = vmatmul.mubr.msk.f32.gmra.mrb[22].mxu0 %vm404_vm2, %v841_v31  ;;  %v1404_v31 = vld [vmem:[#allocation2 + $0x90] sm:$0xff] }
 0x41c   :  { %4508 = vmatprep.mubr.msk.f32.mxu0 %vm5747_vm1, %v5748_v33  ;;  %5301 = vmatpush3.bf16.msra.mxu0 %v6011_v22  ;;  %v5324_v39 = vpack.c.bf16 %v1404_v31, %v1403_v59 }
 0x41d   :  { %5302 = vmatprep.subr.bf16.mxu0 %v5746_v30 }
 0x41f   :  { %4509 = vmatmul.mubr.msk.f32.gmra.mrb[24].mxu0 %vm404_vm2, %v842_v61 }
 0x420   :  { %4511 = vmatprep.mubr.msk.f32.mxu0 %vm5747_vm1, %v5748_v33  ;;  %5304 = vmatpush3.bf16.msra.mxu0 %v6015_v15 }
 0x421   :  { %5305 = vmatprep.subr.bf16.mxu0 %v5746_v30 }
 0x423   :  { %4512 = vmatmul.mubr.msk.f32.gmra.mrb[26].mxu0 %vm404_vm2, %v843_v62 }
 0x424   :  { %5307 = vmatpush3.bf16.msra.mxu0 %v6019_v27  ;;  %4593 = vmatprep.mubr.msk.f32.mxu0 %vm5747_vm1, %v5748_v33 }
 0x425   :  { %5308 = vmatprep.subr.bf16.mxu0 %v5746_v30 }
 0x428   :  { %5310 = vmatpush3.bf16.msra.mxu0 %v6023_v25 }
 0x429   :  { %5311 = vmatprep.subr.bf16.mxu0 %v5746_v30 }
 0x42c   :  { %5313 = vmatpush3.bf16.msra.mxu0 %v6066_v2 }
 0x42d   :  { %5314 = vmatprep.subr.bf16.mxu0 %v5746_v30 }
 0x430   :  { %5316 = vmatpush3.bf16.msra.mxu0 %v6072_v5 }
 0x431   :  { %5317 = vmatprep.subr.bf16.mxu0 %v5746_v30 }
 0x4e5   :  { %v938_v7 = vpop.f32.mrb[18].mxu0 }
 0x4e6   :  { %v939_v9 = vadd.f32 %v3889_v6, %v938_v7  ;;  %v4501_v14 = vpop.f32.mrb[19].mxu0 }
 0x4e8   :  { %v962_v19 = vmul.f32 0.2, %v939_v9 }
 0x4ea   :  { %v6080_v20 = vmax.f32 %v939_v9, %v962_v19  ;;  %v943_v17 = vpop.f32.mrb[20].mxu0 }
 0x4eb   :  { %v944_v37 = vadd.f32 %v3889_v6, %v943_v17  ;;  %v4504_v24 = vpop.f32.mrb[21].mxu0 }
 0x4ec   :  { %v1080_v26 = vmul.f32 %v6080_v20, %v6080_v20  ;;  %4547 = vmatmul.mubr.f32.vlgmr.msra.gmra.mrb[22].mxu1 %v6080_v20 }
 0x4ed   :  { %v963_v28 = vmul.f32 0.2, %v944_v37  ;;  %4549 = vmatprep.mubr.msk.f32.mxu1 %vm5747_vm1, %v5748_v33  ;;  %4609 = vmatpush3.msk.msra.mxu1 %vm1252_vm5, %v6123_v54 }
 0x4ee   :  { %v948_v29 = vpop.f32.mrb[22].mxu0  ;;  %4594 = vmatmul.mubr.f32.vlgmr.msra.gmra.mrb[28].mxu0 %v1080_v26  ;;  %5341 = vmatprep.subr.bf16.mxu1 %v5746_v30 }
 0x4ef   :  { %v6087_v32 = vmax.f32 %v944_v37, %v963_v28  ;;  %v949_v34 = vadd.f32 %v3889_v6, %v948_v29  ;;  %v4507_v35 = vpop.f32.mrb[23].mxu0  ;;  %4596 = vmatprep.mubr.msk.f32.mxu0 %vm5747_vm1, %v5748_v33  ;;  %5319 = vmatpush3.bf16.msra.mxu0 %v5318_v21 }
 0x4f0   :  { %5320 = vmatprep.subr.bf16.mxu0 %v5746_v30 }
 0x4f1   :  { %v964_v48 = vmul.f32 0.2, %v949_v34  ;;  %4550 = vmatmul.mubr.f32.gmra.mrb[24].mxu1 %v6087_v32  ;;  %v1081_v36 = vmul.f32 %v6087_v32, %v6087_v32 }
 0x4f2   :  { %v953_v41 = vpop.f32.mrb[24].mxu0  ;;  %4552 = vmatprep.mubr.msk.f32.mxu1 %vm5747_vm1, %v5748_v33 }
 0x4f3   :  { %v6096_v42 = vmax.f32 %v949_v34, %v964_v48  ;;  %v954_v43 = vadd.f32 %v3889_v6, %v953_v41  ;;  %v4510_v44 = vpop.f32.mrb[25].mxu0  ;;  %4597 = vmatmul.mubr.f32.gmra.mrb[30].mxu0 %v1081_v36 }
 0x4f4   :  { %4599 = vmatprep.mubr.msk.f32.mxu0 %vm5747_vm1, %v5748_v33  ;;  %5322 = vmatpush3.bf16.msra.mxu0 %v5321_v58 }
 0x4f5   :  { %v965_v45 = vmul.f32 0.2, %v954_v43  ;;  %4553 = vmatmul.mubr.f32.gmra.mrb[26].mxu1 %v6096_v42  ;;  %v1082_v46 = vmul.f32 %v6096_v42, %v6096_v42  ;;  %5323 = vmatprep.subr.bf16.mxu0 %v5746_v30 }
 0x4f6   :  { %v958_v47 = vpop.f32.mrb[26].mxu0  ;;  %4555 = vmatprep.mubr.msk.f32.mxu1 %vm5747_vm1, %v5748_v33 }
 0x4f7   :  { %v6105_v49 = vmax.f32 %v954_v43, %v965_v45  ;;  %v959_v50 = vadd.f32 %v3889_v6, %v958_v47  ;;  %v4513_v51 = vpop.f32.mrb[27].mxu0  ;;  %4600 = vmatmul.mubr.f32.gmra.mrb[32].mxu0 %v1082_v46 }
 0x4f8   :  { %4602 = vmatprep.mubr.msk.f32.mxu0 %vm5747_vm1, %v5748_v33  ;;  %5325 = vmatpush3.bf16.msra.mxu0 %v5324_v39 }
 0x4f9   :  { %v966_v52 = vmul.f32 0.2, %v959_v50  ;;  %4556 = vmatmul.mubr.f32.gmra.mrb[28].mxu1 %v6105_v49  ;;  %v1083_v11 = vmul.f32 %v6105_v49, %v6105_v49  ;;  %5326 = vmatprep.subr.bf16.mxu0 %v5746_v30 }
 0x4fa   :  { %4558 = vmatprep.mubr.msk.f32.mxu1 %vm5747_vm1, %v5748_v33 }
 0x4fb   :  { %v6114_v53 = vmax.f32 %v959_v50, %v966_v52  ;;  %4603 = vmatmul.mubr.f32.gmra.mrb[34].mxu0 %v1083_v11 }
 0x4fc   :  { %4605 = vmatprep.mubr.msk.f32.mxu0 %vm5747_vm1, %v5748_v33 }
 0x4fd   :  { %4559 = vmatmul.mubr.f32.gmra.mrb[30].mxu1 %v6114_v53  ;;  %v1084_v63 = vmul.f32 %v6114_v53, %v6114_v53 }
 0x4ff   :  { %4606 = vmatmul.mubr.f32.gmra.mrb[36].mxu0 %v1084_v63 }
 0x500   :  { %4657 = vmatprep.mubr.msk.f32.mxu0 %vm5747_vm1, %v5748_v33 }
 0x5bf   :  { %v1056_v60 = vpop.f32.mrb[22].mxu1 }
 0x5c0   :  { %v1175_v61 = vmul.f32 0.03125, %v1056_v60  ;;  %v4548_v62 = vpop.f32.mrb[23].mxu1 }
 0x5c1   :  { %v1151_v12 = vpop.f32.mrb[28].mxu0 }
 0x5c2   :  { %v1185_v0 = vmul.f32 %v1175_v61, %v1175_v61  ;;  %v1180_v23 = vmul.f32 0.03125, %v1151_v12  ;;  %v4595_v4 = vpop.f32.mrb[29].mxu0  ;;  %v1210_v60 = vsub.f32 0.0, %v1175_v61 }
 0x5c4   :  { %v1190_v6 = vsub.f32 %v1180_v23, %v1185_v0  ;;  %v1061_v7 = vpop.f32.mrb[24].mxu1 }
 0x5c5   :  { %v1176_v9 = vmul.f32 0.03125, %v1061_v7  ;;  %v4551_v14 = vpop.f32.mrb[25].mxu1 }
 0x5c6   :  { %v1195_v19 = vmax.f32 %v1190_v6, 0.0  ;;  %v1156_v17 = vpop.f32.mrb[30].mxu0 }
 0x5c7   :  { %v1186_v37 = vmul.f32 %v1176_v9, %v1176_v9  ;;  %v1181_v24 = vmul.f32 0.03125, %v1156_v17  ;;  %v4598_v26 = vpop.f32.mrb[31].mxu0  ;;  %v1211_v17 = vsub.f32 0.0, %v1176_v9 }
 0x5c8   :  { %v1200_v28 = vadd.f32 1e-05, %v1195_v19  ;;  %v1066_v29 = vpop.f32.mrb[26].mxu1 }
 0x5c9   :  { %v1191_v34 = vsub.f32 %v1181_v24, %v1186_v37  ;;  %v1177_v35 = vmul.f32 0.03125, %v1066_v29  ;;  %v4554_v48 = vpop.f32.mrb[27].mxu1 }
 0x5ca   :  { %5664 = vrsqrt.f32 %v1200_v28  ;;  %v1161_v36 = vpop.f32.mrb[32].mxu0 }
 0x5cb   :  { %v1196_v41 = vmax.f32 %v1191_v34, 0.0  ;;  %v1187_v43 = vmul.f32 %v1177_v35, %v1177_v35  ;;  %v1182_v44 = vmul.f32 0.03125, %v1161_v36  ;;  %v4601_v45 = vpop.f32.mrb[33].mxu0  ;;  %v1212_v61 = vsub.f32 0.0, %v1177_v35 }
 0x5cc   :  { %v1071_v46 = vpop.f32.mrb[28].mxu1 }
 0x5cd   :  { %v1201_v47 = vadd.f32 1e-05, %v1196_v41  ;;  %v1192_v50 = vsub.f32 %v1182_v44, %v1187_v43  ;;  %v1178_v51 = vmul.f32 0.03125, %v1071_v46  ;;  %v4557_v52 = vpop.f32.mrb[29].mxu1  ;;  %v1405_v43 = vld [vmem:[#allocation2 + $0x98] sm:$0xff]  ;;  %v1406_v44 = vld [vmem:[#allocation2 + $0xa0] sm:$0xff] }
 0x5ce   :  { %v1166_v11 = vpop.f32.mrb[34].mxu0  ;;  %v5327_v45 = vpack.c.bf16 %v1406_v44, %v1405_v43  ;;  %v1407_v46 = vld [vmem:[#allocation2 + $0xa8] sm:$0xff]  ;;  %v1410_v52 = vld [vmem:[#allocation2 + $0xc0] sm:$0xff]  ;;  %v3908_v43 = vld [vmem:[%s6652_s2 + $0x9] ss:$0 sm:$0xff] }
 0x5cf   :  { %5666 = vrsqrt.f32 %v1201_v47  ;;  %v1197_v63 = vmax.f32 %v1192_v50, 0.0  ;;  %v1188_v55 = vmul.f32 %v1178_v51, %v1178_v51  ;;  %v4604_v56 = vpop.f32.mrb[35].mxu0  ;;  %v1183_v18 = vmul.f32 0.03125, %v1166_v11  ;;  %v1408_v47 = vld [vmem:[#allocation2 + $0xb0] sm:$0xff] }
 0x5d0   :  { %v1076_v21 = vpop.f32.mrb[30].mxu1  ;;  %v1213_v9 = vsub.f32 0.0, %v1178_v51  ;;  %5328 = vmatpush3.bf16.msra.mxu0 %v5327_v45  ;;  %v5330_v50 = vpack.c.bf16 %v1408_v47, %v1407_v46  ;;  %v1409_v51 = vld [vmem:[#allocation2 + $0xb8] sm:$0xff] }
 0x5d1   :  { %v1202_v57 = vadd.f32 1e-05, %v1197_v63  ;;  %v1179_v58 = vmul.f32 0.03125, %v1076_v21  ;;  %v4560_v59 = vpop.f32.mrb[31].mxu1  ;;  %v1193_v31 = vsub.f32 %v1183_v18, %v1188_v55  ;;  %5329 = vmatprep.subr.bf16.mxu0 %v5746_v30  ;;  %v5333_v11 = vpack.c.bf16 %v1410_v52, %v1409_v51  ;;  %v1411_v63 = vld [vmem:[#allocation2 + $0xc8] sm:$0xff]  ;;  %v1412_v55 = vld [vmem:[#allocation2 + $0xd0] sm:$0xff] }
 0x5d2   :  { %v1171_v39 = vpop.f32.mrb[36].mxu0  ;;  %v5336_v56 = vpack.c.bf16 %v1412_v55, %v1411_v63  ;;  %v1413_v18 = vld [vmem:[#allocation2 + $0xd8] sm:$0xff]  ;;  %v1414_v21 = vld [vmem:[#allocation2 + $0xe0] sm:$0xff] }
 0x5d3   :  { %5668 = vrsqrt.f32 %v1202_v57  ;;  %v1189_v62 = vmul.f32 %v1179_v58, %v1179_v58  ;;  %v1184_v12 = vmul.f32 0.03125, %v1171_v39  ;;  %v4607_v0 = vpop.f32.mrb[37].mxu0  ;;  %v1198_v4 = vmax.f32 %v1193_v31, 0.0 }
 0x5d4   :  { %v5665_v23 = vpop.eup %5664  ;;  %v1214_v36 = vsub.f32 0.0, %v1179_v58  ;;  %5331 = vmatpush3.bf16.msra.mxu0 %v5330_v50  ;;  %v5339_v57 = vpack.c.bf16 %v1414_v21, %v1413_v18 }
 0x5d5   :  { %v1194_v6 = vsub.f32 %v1184_v12, %v1189_v62  ;;  %4610 = vmatprep.mubr.msk.f32.mxu1 %vm1221_vm6, %v5665_v23  ;;  %v1215_v7 = vmul.f32 %v5665_v23, %v1210_v60  ;;  %v1203_v14 = vadd.f32 1e-05, %v1198_v4  ;;  %5332 = vmatprep.subr.bf16.mxu0 %v5746_v30  ;;  %v3906_v62 = vld [vmem:[%s6652_s2 + $0x7] ss:$0 sm:$0xff]  ;;  %v3907_v4 = vld [vmem:[%s6652_s2 + $0x8] ss:$0 sm:$0xff] }
 0x5d7   :  { %v1199_v19 = vmax.f32 %v1194_v6, 0.0  ;;  %5670 = vrsqrt.f32 %v1203_v14 }
 0x5d8   :  { %5334 = vmatpush3.bf16.msra.mxu0 %v5333_v11 }
 0x5d9   :  { %v5667_v37 = vpop.eup %5666  ;;  %v1204_v24 = vadd.f32 1e-05, %v1199_v19  ;;  %5335 = vmatprep.subr.bf16.mxu0 %v5746_v30 }
 0x5da   :  { %4611 = vmatmul.mubr.msk.f32.vlgmr.msra.gmra.mrb[32].mxu1 %vm1221_vm6, %v5667_v37  ;;  %v1216_v26 = vmul.f32 %v5667_v37, %v1211_v17 }
 0x5db   :  { %5672 = vrsqrt.f32 %v1204_v24  ;;  %5343 = vmatpush3.bf16.msra.mxu1 %v6004_v13 }
 0x5dc   :  { %5344 = vmatprep.subr.bf16.mxu1 %v5746_v30  ;;  %5337 = vmatpush3.bf16.msra.mxu0 %v5336_v56 }
 0x5dd   :  { %v5669_v28 = vpop.eup %5668  ;;  %5338 = vmatprep.subr.bf16.mxu0 %v5746_v30 }
 0x5de   :  { %4613 = vmatprep.mubr.msk.f32.mxu1 %vm1221_vm6, %v5669_v28  ;;  %v1217_v29 = vmul.f32 %v5669_v28, %v1212_v61 }
 0x5df   :  { %5346 = vmatpush3.bf16.msra.mxu1 %v6007_v16 }
 0x5e0   :  { %5347 = vmatprep.subr.bf16.mxu1 %v5746_v30  ;;  %5340 = vmatpush3.bf16.msra.mxu0 %v5339_v57 }
 0x5e1   :  { %v5671_v34 = vpop.eup %5670  ;;  %5365 = vmatprep.subr.bf16.mxu0 %v5746_v30 }
 0x5e2   :  { %4614 = vmatmul.mubr.msk.f32.gmra.mrb[34].mxu1 %vm1221_vm6, %v5671_v34  ;;  %v1218_v48 = vmul.f32 %v5671_v34, %v1213_v9 }
 0x5e3   :  { %5349 = vmatpush3.bf16.msra.mxu1 %v6011_v22 }
 0x5e4   :  { %5350 = vmatprep.subr.bf16.mxu1 %v5746_v30 }
 0x5e5   :  { %v5673_v41 = vpop.eup %5672 }
 0x5e6   :  { %4616 = vmatprep.mubr.msk.f32.mxu1 %vm1221_vm6, %v5673_v41  ;;  %v1219_v35 = vmul.f32 %v5673_v41, %v1214_v36 }
 0x5e7   :  { %4617 = vmatmul.mubr.msk.f32.gmra.mrb[36].mxu1 %vm1221_vm6, %v1215_v7 }
 0x5e8   :  { %4619 = vmatprep.mubr.msk.f32.mxu1 %vm1221_vm6, %v1216_v26  ;;  %5352 = vmatpush3.bf16.msra.mxu1 %v6015_v15 }
 0x5e9   :  { %5353 = vmatprep.subr.bf16.mxu1 %v5746_v30 }
 0x5eb   :  { %4620 = vmatmul.mubr.msk.f32.gmra.mrb[38].mxu1 %vm1221_vm6, %v1217_v29 }
 0x5ec   :  { %4622 = vmatprep.mubr.msk.f32.mxu1 %vm1221_vm6, %v1218_v48  ;;  %5355 = vmatpush3.bf16.msra.mxu1 %v6019_v27 }
 0x5ed   :  { %5356 = vmatprep.subr.bf16.mxu1 %v5746_v30 }
 0x5ef   :  { %4623 = vmatmul.mubr.msk.f32.gmra.mrb[40].mxu1 %vm1221_vm6, %v1219_v35 }
 0x5f0   :  { %5358 = vmatpush3.bf16.msra.mxu1 %v6023_v25  ;;  %4704 = vmatprep.mubr.msk.f32.mxu1 %vm5747_vm1, %v5748_v33 }
 0x5f1   :  { %5359 = vmatprep.subr.bf16.mxu1 %v5746_v30 }
 0x5f4   :  { %5361 = vmatpush3.bf16.msra.mxu1 %v6066_v2 }
 0x5f5   :  { %5362 = vmatprep.subr.bf16.mxu1 %v5746_v30 }
 0x5f8   :  { %5364 = vmatpush3.bf16.msra.mxu1 %v6072_v5 }
 0x5f9   :  { %4766 = vmatprep.subr.msk.mxu1 %vm1252_vm5, %v6123_v54 }
 0x6ad   :  { %v4612_v58 = vpop.f32.mrb[32].mxu1 }
 0x6ae   :  { %v1322_v59 = vpop.f32.mrb[33].mxu1  ;;  %v1372_v14 = vmul.f32 %v4612_v58, %v6087_v32 }
 0x6af   :  { %v1371_v60 = vmul.f32 %v1322_v59, %v6080_v20 }
 0x6b5   :  { %v4615_v31 = vpop.f32.mrb[34].mxu1 }
 0x6b6   :  { %v1332_v39 = vpop.f32.mrb[35].mxu1  ;;  %v1374_v61 = vmul.f32 %v4615_v31, %v6105_v49 }
 0x6b7   :  { %v1373_v6 = vmul.f32 %v1332_v39, %v6096_v42 }
 0x6ba   :  { %v4618_v12 = vpop.f32.mrb[36].mxu1 }
 0x6bb   :  { %v1376_v0 = vadd.f32 %v4618_v12, %v1371_v60  ;;  %v1342_v23 = vpop.f32.mrb[37].mxu1 }
 0x6bc   :  { %v1375_v26 = vmul.f32 %v1342_v23, %v6114_v53 }
 0x6bd   :  { %v1385_v7 = vmul.f32 %v3906_v62, %v1376_v0 }
 0x6be   :  { %v4621_v19 = vpop.f32.mrb[38].mxu1 }
 0x6bf   :  { %v6176_v17 = vadd.f32 %v3907_v4, %v1385_v7  ;;  %v1378_v20 = vadd.f32 %v4621_v19, %v1373_v6  ;;  %v1352_v37 = vpop.f32.mrb[39].mxu1 }
 0x6c0   :  { %v1377_v24 = vadd.f32 %v1372_v14, %v1352_v37 }
 0x6c1   :  { %4658 = vmatmul.mubr.f32.vlgmr.msra.gmra.mrb[38].mxu0 %v6176_v17  ;;  %v1387_v9 = vmul.f32 %v3906_v62, %v1378_v20 }
 0x6c2   :  { %v1386_v28 = vmul.f32 %v3906_v62, %v1377_v24  ;;  %v4624_v29 = vpop.f32.mrb[40].mxu1  ;;  %4660 = vmatprep.mubr.msk.f32.mxu0 %vm5747_vm1, %v5748_v33  ;;  %5367 = vmatpush3.bf16.msra.mxu0 %v6004_v13 }
 0x6c3   :  { %v1380_v32 = vadd.f32 %v4624_v29, %v1375_v26  ;;  %v1362_v42 = vpop.f32.mrb[41].mxu1  ;;  %5368 = vmatprep.subr.bf16.mxu0 %v5746_v30  ;;  %v6191_v53 = vadd.f32 %v3907_v4, %v1387_v9 }
 0x6c4   :  { %v1379_v34 = vadd.f32 %v1374_v61, %v1362_v42  ;;  %v6185_v48 = vadd.f32 %v3907_v4, %v1386_v28 }
 0x6c5   :  { %v1389_v36 = vmul.f32 %v3906_v62, %v1380_v32 }
 0x6c6   :  { %4661 = vmatmul.mubr.f32.gmra.mrb[40].mxu0 %v6185_v48  ;;  %v1388_v49 = vmul.f32 %v3906_v62, %v1379_v34 }
 0x6c7   :  { %4663 = vmatprep.mubr.msk.f32.mxu0 %vm5747_vm1, %v5748_v33  ;;  %5370 = vmatpush3.bf16.msra.mxu0 %v6007_v16  ;;  %v6205_v35 = vadd.f32 %v3907_v4, %v1389_v36 }
 0x6c8   :  { %5371 = vmatprep.subr.bf16.mxu0 %v5746_v30  ;;  %v6198_v41 = vadd.f32 %v3907_v4, %v1388_v49 }
 0x6ca   :  { %4664 = vmatmul.mubr.f32.gmra.mrb[42].mxu0 %v6191_v53 }
 0x6cb   :  { %4666 = vmatprep.mubr.msk.f32.mxu0 %vm5747_vm1, %v5748_v33  ;;  %5373 = vmatpush3.bf16.msra.mxu0 %v6011_v22 }
 0x6cc   :  { %5374 = vmatprep.subr.bf16.mxu0 %v5746_v30 }
 0x6ce   :  { %4667 = vmatmul.mubr.f32.gmra.mrb[44].mxu0 %v6198_v41 }
 0x6cf   :  { %4669 = vmatprep.mubr.msk.f32.mxu0 %vm5747_vm1, %v5748_v33  ;;  %5376 = vmatpush3.bf16.msra.mxu0 %v6015_v15 }
 0x6d0   :  { %5377 = vmatprep.subr.bf16.mxu0 %v5746_v30 }
 0x6d2   :  { %4670 = vmatmul.mubr.f32.gmra.mrb[46].mxu0 %v6205_v35 }
 0x6d3   :  { %5379 = vmatpush3.bf16.msra.mxu0 %v6019_v27  ;;  %4751 = vmatprep.mubr.msk.f32.mxu0 %vm5747_vm1, %v5748_v33 }
 0x6d4   :  { %5380 = vmatprep.subr.bf16.mxu0 %v5746_v30 }
 0x6d7   :  { %5382 = vmatpush3.bf16.msra.mxu0 %v6023_v25 }
 0x6d8   :  { %5383 = vmatprep.subr.bf16.mxu0 %v5746_v30 }
 0x6db   :  { %5385 = vmatpush3.bf16.msra.mxu0 %v6066_v2 }
 0x6dc   :  { %5386 = vmatprep.subr.bf16.mxu0 %v5746_v30 }
 0x6df   :  { %5388 = vmatpush3.bf16.msra.mxu0 %v6072_v5 }
 0x6e0   :  { %5413 = vmatprep.subr.bf16.mxu0 %v5746_v30 }
 0x794   :  { %v1486_v44 = vpop.f32.mrb[38].mxu0 }
 0x795   :  { %v1487_v45 = vadd.f32 %v3908_v43, %v1486_v44  ;;  %v4659_v46 = vpop.f32.mrb[39].mxu0 }
 0x797   :  { %v1510_v47 = vmul.f32 0.2, %v1487_v45 }
 0x799   :  { %v6222_v50 = vmax.f32 %v1487_v45, %v1510_v47  ;;  %v1491_v51 = vpop.f32.mrb[40].mxu0 }
 0x79a   :  { %v1492_v52 = vadd.f32 %v3908_v43, %v1491_v51  ;;  %v4662_v11 = vpop.f32.mrb[41].mxu0 }
 0x79b   :  { %v1612_v63 = vmul.f32 %v6222_v50, %v6222_v50  ;;  %4705 = vmatmul.mubr.f32.vlgmr.msra.gmra.mrb[42].mxu1 %v6222_v50 }
 0x79c   :  { %v1511_v55 = vmul.f32 0.2, %v1492_v52  ;;  %4707 = vmatprep.mubr.msk.f32.mxu1 %vm5747_vm1, %v5748_v33  ;;  %4767 = vmatpush3.msk.msra.mxu1 %vm1252_vm5, %v6123_v54 }
 0x79d   :  { %v1496_v56 = vpop.f32.mrb[42].mxu0  ;;  %4752 = vmatmul.mubr.f32.vlgmr.msra.gmra.mrb[48].mxu0 %v1612_v63  ;;  %5389 = vmatprep.subr.bf16.mxu1 %v5746_v30 }
 0x79e   :  { %v6232_v18 = vmax.f32 %v1492_v52, %v1511_v55  ;;  %v1497_v21 = vadd.f32 %v3908_v43, %v1496_v56  ;;  %v4665_v57 = vpop.f32.mrb[43].mxu0  ;;  %4754 = vmatprep.mubr.msk.f32.mxu0 %vm5747_vm1, %v5748_v33 }
 0x7a0   :  { %v1512_v58 = vmul.f32 0.2, %v1497_v21  ;;  %4708 = vmatmul.mubr.f32.gmra.mrb[44].mxu1 %v6232_v18  ;;  %v1613_v59 = vmul.f32 %v6232_v18, %v6232_v18 }
 0x7a1   :  { %v1501_v31 = vpop.f32.mrb[44].mxu0  ;;  %4710 = vmatprep.mubr.msk.f32.mxu1 %vm5747_vm1, %v5748_v33 }
 0x7a2   :  { %v6241_v39 = vmax.f32 %v1497_v21, %v1512_v58  ;;  %v1502_v60 = vadd.f32 %v3908_v43, %v1501_v31  ;;  %v4668_v62 = vpop.f32.mrb[45].mxu0  ;;  %4755 = vmatmul.mubr.f32.gmra.mrb[50].mxu0 %v1613_v59 }
 0x7a3   :  { %4757 = vmatprep.mubr.msk.f32.mxu0 %vm5747_vm1, %v5748_v33 }
 0x7a4   :  { %v1513_v12 = vmul.f32 0.2, %v1502_v60  ;;  %4711 = vmatmul.mubr.f32.gmra.mrb[46].mxu1 %v6241_v39  ;;  %v1614_v0 = vmul.f32 %v6241_v39, %v6241_v39 }
 0x7a5   :  { %v1506_v23 = vpop.f32.mrb[46].mxu0  ;;  %4713 = vmatprep.mubr.msk.f32.mxu1 %vm5747_vm1, %v5748_v33 }
 0x7a6   :  { %v6250_v4 = vmax.f32 %v1502_v60, %v1513_v12  ;;  %v1507_v6 = vadd.f32 %v3908_v43, %v1506_v23  ;;  %v4671_v7 = vpop.f32.mrb[47].mxu0  ;;  %4758 = vmatmul.mubr.f32.gmra.mrb[52].mxu0 %v1614_v0 }
 0x7a7   :  { %4760 = vmatprep.mubr.msk.f32.mxu0 %vm5747_vm1, %v5748_v33 }
 0x7a8   :  { %v1514_v14 = vmul.f32 0.2, %v1507_v6  ;;  %4714 = vmatmul.mubr.f32.gmra.mrb[48].mxu1 %v6250_v4  ;;  %v1615_v19 = vmul.f32 %v6250_v4, %v6250_v4 }
 0x7a9   :  { %4716 = vmatprep.mubr.msk.f32.mxu1 %vm5747_vm1, %v5748_v33 }
 0x7aa   :  { %v6259_v20 = vmax.f32 %v1507_v6, %v1514_v14  ;;  %4761 = vmatmul.mubr.f32.gmra.mrb[54].mxu0 %v1615_v19 }
 0x7ab   :  { %4763 = vmatprep.mubr.msk.f32.mxu0 %vm5747_vm1, %v5748_v33 }
 0x7ac   :  { %4717 = vmatmul.mubr.f32.gmra.mrb[50].mxu1 %v6259_v20  ;;  %v1616_v37 = vmul.f32 %v6259_v20, %v6259_v20 }
 0x7ae   :  { %4764 = vmatmul.mubr.f32.gmra.mrb[56].mxu0 %v1616_v37 }
 0x7af   :  { %4850 = vmatprep.mubr.msk.f32.mxu0 %vm5747_vm1, %v5748_v33 }
 0x86e   :  { %v1588_v24 = vpop.f32.mrb[42].mxu1 }
 0x86f   :  { %v1707_v26 = vmul.f32 0.03125, %v1588_v24  ;;  %v4706_v61 = vpop.f32.mrb[43].mxu1 }
 0x870   :  { %v1683_v28 = vpop.f32.mrb[48].mxu0 }
 0x871   :  { %v1717_v29 = vmul.f32 %v1707_v26, %v1707_v26  ;;  %v1712_v32 = vmul.f32 0.03125, %v1683_v28  ;;  %v4753_v42 = vpop.f32.mrb[49].mxu0 }
 0x872   :  { %v1742_v42 = vsub.f32 0.0, %v1707_v26 }
 0x873   :  { %v1722_v9 = vsub.f32 %v1712_v32, %v1717_v29  ;;  %v1593_v34 = vpop.f32.mrb[44].mxu1 }
 0x874   :  { %v1708_v49 = vmul.f32 0.03125, %v1593_v34  ;;  %v4709_v36 = vpop.f32.mrb[45].mxu1 }
 0x875   :  { %v1727_v43 = vmax.f32 %v1722_v9, 0.0  ;;  %v1688_v44 = vpop.f32.mrb[50].mxu0 }
 0x876   :  { %v1718_v45 = vmul.f32 %v1708_v49, %v1708_v49  ;;  %v1713_v46 = vmul.f32 0.03125, %v1688_v44  ;;  %v4756_v47 = vpop.f32.mrb[51].mxu0 }
 0x877   :  { %v1732_v51 = vadd.f32 1e-05, %v1727_v43  ;;  %v1598_v52 = vpop.f32.mrb[46].mxu1 }
 0x878   :  { %v1723_v11 = vsub.f32 %v1713_v46, %v1718_v45  ;;  %v1709_v63 = vmul.f32 0.03125, %v1598_v52  ;;  %v4712_v55 = vpop.f32.mrb[47].mxu1  ;;  %v1743_v52 = vsub.f32 0.0, %v1708_v49 }
 0x879   :  { %5674 = vrsqrt.f32 %v1732_v51  ;;  %v1693_v56 = vpop.f32.mrb[52].mxu0 }
 0x87a   :  { %v1728_v21 = vmax.f32 %v1723_v11, 0.0  ;;  %v1719_v57 = vmul.f32 %v1709_v63, %v1709_v63  ;;  %v1714_v58 = vmul.f32 0.03125, %v1693_v56  ;;  %v4759_v59 = vpop.f32.mrb[53].mxu0  ;;  %v1744_v26 = vsub.f32 0.0, %v1709_v63  ;;  %v1940_v63 = vld [vmem:[#allocation2 + $0x168] sm:$0xff] }
 0x87b   :  { %v1603_v31 = vpop.f32.mrb[48].mxu1 }
 0x87c   :  { %v1733_v60 = vadd.f32 1e-05, %v1728_v21  ;;  %v1724_v62 = vsub.f32 %v1714_v58, %v1719_v57  ;;  %v1710_v12 = vmul.f32 0.03125, %v1603_v31  ;;  %v4715_v0 = vpop.f32.mrb[49].mxu1 }
 0x87d   :  { %v1698_v23 = vpop.f32.mrb[54].mxu0 }
 0x87e   :  { %5676 = vrsqrt.f32 %v1733_v60  ;;  %v1729_v6 = vmax.f32 %v1724_v62, 0.0  ;;  %v1720_v7 = vmul.f32 %v1710_v12, %v1710_v12  ;;  %v4762_v14 = vpop.f32.mrb[55].mxu0  ;;  %v1715_v19 = vmul.f32 0.03125, %v1698_v23  ;;  %v1942_v23 = vld [vmem:[#allocation2 + $0x178] sm:$0xff] }
 0x87f   :  { %v1608_v37 = vpop.f32.mrb[50].mxu1  ;;  %v1745_v58 = vsub.f32 0.0, %v1710_v12  ;;  %v1941_v12 = vld [vmem:[#allocation2 + $0x170] sm:$0xff]  ;;  %v1944_v14 = vld [vmem:[#allocation2 + $0x188] sm:$0xff] }
 0x880   :  { %v1734_v24 = vadd.f32 1e-05, %v1729_v6  ;;  %v1711_v61 = vmul.f32 0.03125, %v1608_v37  ;;  %v4718_v28 = vpop.f32.mrb[51].mxu1  ;;  %v1725_v29 = vsub.f32 %v1715_v19, %v1720_v7  ;;  %v5390_v0 = vpack.c.bf16 %v1941_v12, %v1940_v63  ;;  %v1943_v6 = vld [vmem:[#allocation2 + $0x180] sm:$0xff]  ;;  %v1945_v19 = vld [vmem:[#allocation2 + $0x190] sm:$0xff] }
 0x881   :  { %v1703_v32 = vpop.f32.mrb[56].mxu0  ;;  %v5393_v7 = vpack.c.bf16 %v1943_v6, %v1942_v23  ;;  %v5396_v37 = vpack.c.bf16 %v1945_v19, %v1944_v14 }
 0x882   :  { %5678 = vrsqrt.f32 %v1734_v24  ;;  %v1721_v9 = vmul.f32 %v1711_v61, %v1711_v61  ;;  %v1716_v34 = vmul.f32 0.03125, %v1703_v32  ;;  %v4765_v36 = vpop.f32.mrb[57].mxu0  ;;  %v1730_v44 = vmax.f32 %v1725_v29, 0.0  ;;  %5415 = vmatpush3.bf16.msra.mxu0 %v5390_v0  ;;  %v1946_v24 = vld [vmem:[#allocation2 + $0x198] sm:$0xff]  ;;  %v1948_v29 = vld [vmem:[#allocation2 + $0x1a8] sm:$0xff]  ;;  %v1949_v32 = vld [vmem:[#allocation2 + $0x1b0] sm:$0xff] }
 0x883   :  { %v5675_v43 = vpop.eup %5674  ;;  %v1746_v60 = vsub.f32 0.0, %v1711_v61  ;;  %5416 = vmatprep.subr.bf16.mxu0 %v5746_v30  ;;  %v1947_v61 = vld [vmem:[#allocation2 + $0x1a0] sm:$0xff] }
 0x884   :  { %v1726_v45 = vsub.f32 %v1716_v34, %v1721_v9  ;;  %4768 = vmatprep.mubr.msk.f32.mxu1 %vm1221_vm6, %v5675_v43  ;;  %v1747_v46 = vmul.f32 %v5675_v43, %v1742_v42  ;;  %v1735_v47 = vadd.f32 1e-05, %v1730_v44  ;;  %v5399_v28 = vpack.c.bf16 %v1947_v61, %v1946_v24  ;;  %v1950_v9 = vld [vmem:[#allocation2 + $0x1b8] sm:$0xff]  ;;  %v1951_v34 = vld [vmem:[#allocation2 + $0x1c0] sm:$0xff]  ;;  %v1952_v43 = vld [vmem:[#allocation2 + $0x1c8] sm:$0xff] }
 0x885   :  { %v5402_v42 = vpack.c.bf16 %v1949_v32, %v1948_v29  ;;  %v5405_v36 = vpack.c.bf16 %v1951_v34, %v1950_v9  ;;  %v1953_v44 = vld [vmem:[#allocation2 + $0x1d0] sm:$0xff] }
 0x886   :  { %v1731_v51 = vmax.f32 %v1726_v45, 0.0  ;;  %5680 = vrsqrt.f32 %v1735_v47  ;;  %5418 = vmatpush3.bf16.msra.mxu0 %v5393_v7  ;;  %v5408_v45 = vpack.c.bf16 %v1953_v44, %v1952_v43  ;;  %v1955_v47 = vld [vmem:[#allocation2 + $0x1e0] sm:$0xff] }
 0x887   :  { %5419 = vmatprep.subr.bf16.mxu0 %v5746_v30 }
 0x888   :  { %v5677_v11 = vpop.eup %5676  ;;  %v1736_v55 = vadd.f32 1e-05, %v1731_v51 }
 0x889   :  { %4769 = vmatmul.mubr.msk.f32.vlgmr.msra.gmra.mrb[52].mxu1 %vm1221_vm6, %v5677_v11  ;;  %v1748_v56 = vmul.f32 %v5677_v11, %v1743_v52 }
 0x88a   :  { %5682 = vrsqrt.f32 %v1736_v55  ;;  %5391 = vmatpush3.bf16.msra.mxu1 %v5390_v0  ;;  %5421 = vmatpush3.bf16.msra.mxu0 %v5396_v37 }
 0x88b   :  { %5392 = vmatprep.subr.bf16.mxu1 %v5746_v30  ;;  %5422 = vmatprep.subr.bf16.mxu0 %v5746_v30 }
 0x88c   :  { %v5679_v21 = vpop.eup %5678 }
 0x88d   :  { %4771 = vmatprep.mubr.msk.f32.mxu1 %vm1221_vm6, %v5679_v21  ;;  %v1749_v57 = vmul.f32 %v5679_v21, %v1744_v26 }
 0x88e   :  { %5394 = vmatpush3.bf16.msra.mxu1 %v5393_v7  ;;  %5424 = vmatpush3.bf16.msra.mxu0 %v5399_v28 }
 0x88f   :  { %5395 = vmatprep.subr.bf16.mxu1 %v5746_v30  ;;  %5425 = vmatprep.subr.bf16.mxu0 %v5746_v30 }
 0x890   :  { %v5681_v59 = vpop.eup %5680 }
 0x891   :  { %4772 = vmatmul.mubr.msk.f32.gmra.mrb[54].mxu1 %vm1221_vm6, %v5681_v59  ;;  %v1750_v31 = vmul.f32 %v5681_v59, %v1745_v58 }
 0x892   :  { %5397 = vmatpush3.bf16.msra.mxu1 %v5396_v37  ;;  %5427 = vmatpush3.bf16.msra.mxu0 %v5402_v42 }
 0x893   :  { %5398 = vmatprep.subr.bf16.mxu1 %v5746_v30  ;;  %5428 = vmatprep.subr.bf16.mxu0 %v5746_v30 }
 0x894   :  { %v5683_v62 = vpop.eup %5682 }
 0x895   :  { %4774 = vmatprep.mubr.msk.f32.mxu1 %vm1221_vm6, %v5683_v62  ;;  %v1751_v49 = vmul.f32 %v5683_v62, %v1746_v60 }
 0x896   :  { %4775 = vmatmul.mubr.msk.f32.gmra.mrb[56].mxu1 %vm1221_vm6, %v1747_v46  ;;  %5430 = vmatpush3.bf16.msra.mxu0 %v5405_v36  ;;  %v1954_v46 = vld [vmem:[#allocation2 + $0x1d8] sm:$0xff] }
 0x897   :  { %4777 = vmatprep.mubr.msk.f32.mxu1 %vm1221_vm6, %v1748_v56  ;;  %5400 = vmatpush3.bf16.msra.mxu1 %v5399_v28  ;;  %v5411_v51 = vpack.c.bf16 %v1955_v47, %v1954_v46  ;;  %v2096_v47 = vld [vmem:[#allocation2 + $0xe8] sm:$0xff] }
 0x898   :  { %5401 = vmatprep.subr.bf16.mxu1 %v5746_v30  ;;  %5431 = vmatprep.subr.bf16.mxu0 %v5746_v30 }
 0x89a   :  { %4778 = vmatmul.mubr.msk.f32.gmra.mrb[58].mxu1 %vm1221_vm6, %v1749_v57  ;;  %5433 = vmatpush3.bf16.msra.mxu0 %v5408_v45 }
 0x89b   :  { %4780 = vmatprep.mubr.msk.f32.mxu1 %vm1221_vm6, %v1750_v31  ;;  %5403 = vmatpush3.bf16.msra.mxu1 %v5402_v42  ;;  %v3920_v31 = vld [vmem:[%s6652_s2 + $0xa] ss:$0 sm:$0xff] }
 0x89c   :  { %5404 = vmatprep.subr.bf16.mxu1 %v5746_v30  ;;  %5434 = vmatprep.subr.bf16.mxu0 %v5746_v30 }
 0x89e   :  { %4781 = vmatmul.mubr.msk.f32.gmra.mrb[60].mxu1 %vm1221_vm6, %v1751_v49  ;;  %5436 = vmatpush3.bf16.msra.mxu0 %v5411_v51 }
 0x89f   :  { %4815 = vmatprep.mubr.msk.f32.mxu1 %vm5747_vm1, %v5748_v33  ;;  %5406 = vmatpush3.bf16.msra.mxu1 %v5405_v36 }
 0x8a0   :  { %5407 = vmatprep.subr.bf16.mxu1 %v5746_v30  ;;  %5461 = vmatprep.subr.bf16.mxu0 %v5746_v30 }
 0x8a3   :  { %5409 = vmatpush3.bf16.msra.mxu1 %v5408_v45 }
 0x8a4   :  { %5410 = vmatprep.subr.bf16.mxu1 %v5746_v30 }
 0x8a7   :  { %5412 = vmatpush3.bf16.msra.mxu1 %v5411_v51  ;;  %v2097_v51 = vld [vmem:[#allocation2 + $0xf0] sm:$0xff] }
 0x8a8   :  { %5437 = vmatprep.subr.bf16.mxu1 %v5746_v30 }
 0x95c   :  { %v4770_v52 = vpop.f32.mrb[52].mxu1 }
 0x95d   :  { %v1848_v11 = vpop.f32.mrb[53].mxu1  ;;  %v1898_v60 = vmul.f32 %v4770_v52, %v6232_v18 }
 0x95e   :  { %v1897_v26 = vmul.f32 %v1848_v11, %v6222_v50  ;;  %v3921_v50 = vld [vmem:[%s6652_s2 + $0xb] ss:$0 sm:$0xff] }
 0x964   :  { %v4773_v55 = vpop.f32.mrb[54].mxu1 }
 0x965   :  { %v1858_v56 = vpop.f32.mrb[55].mxu1  ;;  %v1900_v6 = vmul.f32 %v4773_v55, %v6250_v4  ;;  %v5438_v55 = vpack.c.bf16 %v2097_v51, %v2096_v47 }
 0x966   :  { %v1899_v59 = vmul.f32 %v1858_v56, %v6241_v39 }
 0x969   :  { %v4776_v21 = vpop.f32.mrb[56].mxu1 }
 0x96a   :  { %v1902_v57 = vadd.f32 %v4776_v21, %v1897_v26  ;;  %v1868_v58 = vpop.f32.mrb[57].mxu1  ;;  %v2098_v21 = vld [vmem:[#allocation2 + $0xf8] sm:$0xff] }
 0x96b   :  { %v1901_v23 = vmul.f32 %v1868_v58, %v6259_v20 }
 0x96c   :  { %v1911_v12 = vmul.f32 %v3920_v31, %v1902_v57  ;;  %v2099_v57 = vld [vmem:[#allocation2 + $0x100] sm:$0xff] }
 0x96d   :  { %v4779_v62 = vpop.f32.mrb[58].mxu1 }
 0x96e   :  { %v1904_v49 = vadd.f32 %v4779_v62, %v1899_v59  ;;  %v1878_v63 = vpop.f32.mrb[59].mxu1  ;;  %v1920_v37 = vadd.f32 %v3921_v50, %v1911_v12  ;;  %v5441_v59 = vpack.c.bf16 %v2099_v57, %v2098_v21  ;;  %v2101_v62 = vld [vmem:[#allocation2 + $0x110] sm:$0xff]  ;;  %v2102_v12 = vld [vmem:[#allocation2 + $0x118] sm:$0xff] }
 0x96f   :  { %v1903_v0 = vadd.f32 %v1898_v60, %v1878_v63  ;;  %v2100_v60 = vld [vmem:[#allocation2 + $0x108] sm:$0xff] }
 0x970   :  { %v1913_v24 = vmul.f32 %v3920_v31, %v1904_v49  ;;  %v5444_v63 = vpack.c.bf16 %v2101_v62, %v2100_v60 }
 0x971   :  { %v1912_v39 = vmul.f32 %v3920_v31, %v1903_v0  ;;  %v4782_v7 = vpop.f32.mrb[60].mxu1  ;;  %v2103_v0 = vld [vmem:[#allocation2 + $0x120] sm:$0xff] }
 0x972   :  { %v1906_v14 = vadd.f32 %v4782_v7, %v1901_v23  ;;  %v1888_v19 = vpop.f32.mrb[61].mxu1  ;;  %v1922_v42 = vadd.f32 %v3921_v50, %v1913_v24  ;;  %v2104_v23 = vld [vmem:[#allocation2 + $0x128] sm:$0xff]  ;;  %v2106_v7 = vld [vmem:[#allocation2 + $0x138] sm:$0xff]  ;;  %v2109_v24 = vld [vmem:[#allocation2 + $0x150] sm:$0xff] }
 0x973   :  { %v1921_v18 = vadd.f32 %v3921_v50, %v1912_v39  ;;  %v1905_v61 = vadd.f32 %v1900_v6, %v1888_v19  ;;  %v2105_v6 = vld [vmem:[#allocation2 + $0x130] sm:$0xff] }
 0x974   :  { %v1915_v29 = vmul.f32 %v3920_v31, %v1906_v14  ;;  %v5450_v39 = vpack.c.bf16 %v2105_v6, %v2104_v23  ;;  %v2107_v14 = vld [vmem:[#allocation2 + $0x140] sm:$0xff] }
 0x975   :  { %v1925_v28 = vmax.f32 %v1920_v37, %v1921_v18  ;;  %v1914_v32 = vmul.f32 %v3920_v31, %v1905_v61  ;;  %v5453_v19 = vpack.c.bf16 %v2107_v14, %v2106_v7  ;;  %v2108_v37 = vld [vmem:[#allocation2 + $0x148] sm:$0xff]  ;;  %v2110_v61 = vld [vmem:[#allocation2 + $0x158] sm:$0xff] }
 0x976   :  { %v1924_v43 = vadd.f32 %v3921_v50, %v1915_v29  ;;  %v5456_v18 = vpack.c.bf16 %v2109_v24, %v2108_v37 }
 0x977   :  { %v1926_v9 = vrot.slane %v1925_v28, 4  ;;  %v1923_v34 = vadd.f32 %v3921_v50, %v1914_v32  ;;  %v5447_v50 = vpack.c.bf16 %v2103_v0, %v2102_v12 }
 0x979   :  { %v1927_v36 = vmax.f32 %v1925_v28, %v1926_v9  ;;  %v1932_v44 = vmax.f32 %v1922_v42, %v1923_v34  ;;  %v2111_v28 = vld [vmem:[#allocation2 + $0x160] sm:$0xff] }
 0x97a   :  { %v5459_v29 = vpack.c.bf16 %v2111_v28, %v2110_v61 }
 0x97b   :  { %v1928_v20 = vrot.slane %v1927_v36, 2  ;;  %v1933_v45 = vmax.f32 %v1932_v44, %v1924_v43 }
 0x97d   :  { %v1929_v4 = vmax.f32 %v1927_v36, %v1928_v20  ;;  %v1934_v46 = vrot.slane %v1933_v45, 4 }
 0x97f   :  { %v1930_v52 = vrot.slane %v1929_v4, 1  ;;  %v1935_v11 = vmax.f32 %v1933_v45, %v1934_v46  ;;  %v5714_v45 = vld [vmem:[#allocation2 + $0x370] sm:$0xf] }
 0x981   :  { %v1936_v56 = vrot.slane %v1935_v11, 2  ;;  %v1931_v26 = vmax.f32 %v1929_v4, %v1930_v52 }
 0x983   :  { %v1937_v58 = vmax.f32 %v1935_v11, %v1936_v56  ;;  %4816 = vmatmul.mubr.f32.vlgmr.msra.gmra.mrb[62].mxu1 %v1931_v26 }
 0x984   :  { %5439 = vmatpush3.bf16.msra.mxu1 %v5438_v55  ;;  %4885 = vmatprep.mubr.msk.f32.mxu1 %vm5747_vm1, %v5748_v33 }
 0x985   :  { %5440 = vmatprep.subr.bf16.mxu1 %v5746_v30  ;;  %v1938_v31 = vrot.slane %v1937_v58, 1 }
 0x987   :  { %v1939_v49 = vmax.f32 %v1937_v58, %v1938_v31 }
 0x988   :  { %5442 = vmatpush3.bf16.msra.mxu1 %v5441_v59 }
 0x989   :  { %4851 = vmatmul.mubr.f32.vlgmr.msra.gmra.mrb[58].mxu0 %v1939_v49  ;;  %5443 = vmatprep.subr.bf16.mxu1 %v5746_v30 }
 0x98a   :  { %5463 = vmatpush3.bf16.msra.mxu0 %v6004_v13  ;;  %4932 = vmatprep.mubr.msk.f32.mxu0 %vm5747_vm1, %v5748_v33 }
 0x98b   :  { %5464 = vmatprep.subr.bf16.mxu0 %v5746_v30 }
 0x98c   :  { %5445 = vmatpush3.bf16.msra.mxu1 %v5444_v63 }
 0x98d   :  { %5446 = vmatprep.subr.bf16.mxu1 %v5746_v30 }
 0x98e   :  { %5466 = vmatpush3.bf16.msra.mxu0 %v6007_v16 }
 0x98f   :  { %5467 = vmatprep.subr.bf16.mxu0 %v5746_v30 }
 0x990   :  { %5448 = vmatpush3.bf16.msra.mxu1 %v5447_v50 }
 0x991   :  { %5449 = vmatprep.subr.bf16.mxu1 %v5746_v30 }
 0x992   :  { %5469 = vmatpush3.bf16.msra.mxu0 %v6011_v22 }
 0x993   :  { %5470 = vmatprep.subr.bf16.mxu0 %v5746_v30 }
 0x994   :  { %5451 = vmatpush3.bf16.msra.mxu1 %v5450_v39 }
 0x995   :  { %5452 = vmatprep.subr.bf16.mxu1 %v5746_v30 }
 0x996   :  { %5472 = vmatpush3.bf16.msra.mxu0 %v6015_v15 }
 0x997   :  { %5473 = vmatprep.subr.bf16.mxu0 %v5746_v30 }
 0x998   :  { %5454 = vmatpush3.bf16.msra.mxu1 %v5453_v19 }
 0x999   :  { %5455 = vmatprep.subr.bf16.mxu1 %v5746_v30 }
 0x99a   :  { %5475 = vmatpush3.bf16.msra.mxu0 %v6019_v27 }
 0x99b   :  { %5476 = vmatprep.subr.bf16.mxu0 %v5746_v30 }
 0x99c   :  { %5457 = vmatpush3.bf16.msra.mxu1 %v5456_v18 }
 0x99d   :  { %5458 = vmatprep.subr.bf16.mxu1 %v5746_v30 }
 0x99e   :  { %5478 = vmatpush3.bf16.msra.mxu0 %v6023_v25 }
 0x99f   :  { %5479 = vmatprep.subr.bf16.mxu0 %v5746_v30 }
 0x9a0   :  { %5460 = vmatpush3.bf16.msra.mxu1 %v5459_v29 }
 0x9a1   :  { %5485 = vmatprep.subr.bf16.mxu1 %v5746_v30 }
 0x9a2   :  { %5481 = vmatpush3.bf16.msra.mxu0 %v6066_v2 }
 0x9a3   :  { %4886 = vmatmul.mubr.f32.vlgmr.msra.gmra.mrb[64].mxu1 %v6176_v17  ;;  %5482 = vmatprep.subr.bf16.mxu0 %v5746_v30 }
 0x9a4   :  { %4888 = vmatprep.mubr.msk.f32.mxu1 %vm5747_vm1, %v5748_v33  ;;  %5487 = vmatpush3.bf16.msra.mxu1 %v6004_v13 }
 0x9a5   :  { %5488 = vmatprep.subr.bf16.mxu1 %v5746_v30 }
 0x9a6   :  { %5484 = vmatpush3.bf16.msra.mxu0 %v6072_v5 }
 0x9a7   :  { %4889 = vmatmul.mubr.f32.gmra.mrb[66].mxu1 %v6185_v48  ;;  %4994 = vmatprep.subr.msk.mxu0 %vm1252_vm5, %v6123_v54 }
 0x9a8   :  { %4891 = vmatprep.mubr.msk.f32.mxu1 %vm5747_vm1, %v5748_v33  ;;  %5490 = vmatpush3.bf16.msra.mxu1 %v6007_v16 }
 0x9a9   :  { %5491 = vmatprep.subr.bf16.mxu1 %v5746_v30 }
 0x9ab   :  { %4892 = vmatmul.mubr.f32.gmra.mrb[68].mxu1 %v6191_v53 }
 0x9ac   :  { %4894 = vmatprep.mubr.msk.f32.mxu1 %vm5747_vm1, %v5748_v33  ;;  %5493 = vmatpush3.bf16.msra.mxu1 %v6011_v22 }
 0x9ad   :  { %5494 = vmatprep.subr.bf16.mxu1 %v5746_v30 }
 0x9af   :  { %4895 = vmatmul.mubr.f32.gmra.mrb[70].mxu1 %v6198_v41 }
 0x9b0   :  { %4897 = vmatprep.mubr.msk.f32.mxu1 %vm5747_vm1, %v5748_v33  ;;  %5496 = vmatpush3.bf16.msra.mxu1 %v6015_v15 }
 0x9b1   :  { %5497 = vmatprep.subr.bf16.mxu1 %v5746_v30 }
 0x9b3   :  { %4898 = vmatmul.mubr.f32.gmra.mrb[72].mxu1 %v6205_v35 }
 0x9b4   :  { %5499 = vmatpush3.bf16.msra.mxu1 %v6019_v27  ;;  %4979 = vmatprep.mubr.msk.f32.mxu1 %vm5747_vm1, %v5748_v33  ;;  %v3922_v27 = vld [vmem:[%s6652_s2 + $0xc] ss:$0 sm:$0xff] }
 0x9b5   :  { %5500 = vmatprep.subr.bf16.mxu1 %v5746_v30 }
 0x9b8   :  { %5502 = vmatpush3.bf16.msra.mxu1 %v6023_v25 }
 0x9b9   :  { %5503 = vmatprep.subr.bf16.mxu1 %v5746_v30 }
 0x9bc   :  { %5505 = vmatpush3.bf16.msra.mxu1 %v6066_v2 }
 0x9bd   :  { %5506 = vmatprep.subr.bf16.mxu1 %v5746_v30 }
 0x9c0   :  { %5508 = vmatpush3.bf16.msra.mxu1 %v6072_v5 }
 0x9c1   :  { %5533 = vmatprep.subr.bf16.mxu1 %v5746_v30 }
 0xa56   :  { %v2022_v13 = vpop.f32.mrb[62].mxu1 }
 0xa57   :  { %v4817_v16 = vpop.f32.mrb[63].mxu1  ;;  %v2210_v25 = vrot.slane %v2022_v13, %v5802_v10 }
 0xa5c   :  { %v2092_v22 = vpop.f32.mrb[58].mxu0 }
 0xa5d   :  { %v4852_v15 = vpop.f32.mrb[59].mxu0  ;;  %v2216_v34 = vrot.slane %v2092_v22, %v5802_v10 }
 0xa76   :  { %v2183_v54 = vpop.f32.mrb[64].mxu1 }
 0xa77   :  { %v2184_v17 = vadd.f32 %v3922_v27, %v2183_v54  ;;  %v4887_v48 = vpop.f32.mrb[65].mxu1 }
 0xa79   :  { %v2211_v2 = vadd.f32 %v2210_v25, %v2184_v17 }
 0xa7a   :  { %v2188_v53 = vpop.f32.mrb[66].mxu1 }
 0xa7b   :  { %v2220_v41 = vmul.f32 0.2, %v2211_v2  ;;  %v2189_v35 = vadd.f32 %v3922_v27, %v2188_v53  ;;  %v4890_v5 = vpop.f32.mrb[67].mxu1 }
 0xa7d   :  { %v6371_v32 = vmax.f32 %v2211_v2, %v2220_v41  ;;  %v2212_v42 = vadd.f32 %v2210_v25, %v2189_v35 }
 0xa7e   :  { %v2193_v9 = vpop.f32.mrb[68].mxu1 }
 0xa7f   :  { %v2322_v36 = vmul.f32 %v6371_v32, %v6371_v32  ;;  %v2221_v43 = vmul.f32 0.2, %v2212_v42  ;;  %v2194_v44 = vadd.f32 %v3922_v27, %v2193_v9  ;;  %v4893_v20 = vpop.f32.mrb[69].mxu1  ;;  %4933 = vmatmul.mubr.f32.vlgmr.msra.gmra.mrb[60].mxu0 %v6371_v32 }
 0xa80   :  { %4935 = vmatprep.mubr.msk.f32.mxu0 %vm5747_vm1, %v5748_v33  ;;  %4995 = vmatpush3.msk.msra.mxu0 %vm1252_vm5, %v5714_v45 }
 0xa81   :  { %v2217_v4 = vadd.f32 %v2216_v34, %v2194_v44  ;;  %4980 = vmatmul.mubr.f32.vlgmr.msra.gmra.mrb[74].mxu1 %v2322_v36  ;;  %v6380_v46 = vmax.f32 %v2212_v42, %v2221_v43  ;;  %5509 = vmatprep.subr.bf16.mxu0 %v5746_v30 }
 0xa82   :  { %v2198_v10 = vpop.f32.mrb[70].mxu1  ;;  %4982 = vmatprep.mubr.msk.f32.mxu1 %vm5747_vm1, %v5748_v33  ;;  %5535 = vmatpush3.bf16.msra.mxu1 %v5872_v38 }
 0xa83   :  { %v2222_v47 = vmul.f32 0.2, %v2217_v4  ;;  %v2199_v51 = vadd.f32 %v3922_v27, %v2198_v10  ;;  %v4896_v52 = vpop.f32.mrb[71].mxu1  ;;  %4936 = vmatmul.mubr.f32.gmra.mrb[62].mxu0 %v6380_v46  ;;  %v2323_v11 = vmul.f32 %v6380_v46, %v6380_v46  ;;  %5536 = vmatprep.subr.bf16.mxu1 %v5746_v30 }
 0xa84   :  { %4938 = vmatprep.mubr.msk.f32.mxu0 %vm5747_vm1, %v5748_v33 }
 0xa85   :  { %v2218_v55 = vadd.f32 %v2216_v34, %v2199_v51  ;;  %4983 = vmatmul.mubr.f32.gmra.mrb[76].mxu1 %v2323_v11  ;;  %v6392_v56 = vmax.f32 %v2217_v4, %v2222_v47 }
 0xa86   :  { %v2203_v26 = vpop.f32.mrb[72].mxu1  ;;  %4985 = vmatprep.mubr.msk.f32.mxu1 %vm5747_vm1, %v5748_v33  ;;  %5538 = vmatpush3.bf16.msra.mxu1 %v5875_v40 }
 0xa87   :  { %v2223_v21 = vmul.f32 0.2, %v2218_v55  ;;  %v2204_v57 = vadd.f32 %v3922_v27, %v2203_v26  ;;  %v4899_v58 = vpop.f32.mrb[73].mxu1  ;;  %4939 = vmatmul.mubr.f32.gmra.mrb[64].mxu0 %v6392_v56  ;;  %v2324_v59 = vmul.f32 %v6392_v56, %v6392_v56  ;;  %5539 = vmatprep.subr.bf16.mxu1 %v5746_v30 }
 0xa88   :  { %4941 = vmatprep.mubr.msk.f32.mxu0 %vm5747_vm1, %v5748_v33 }
 0xa89   :  { %v2219_v31 = vadd.f32 %v2216_v34, %v2204_v57  ;;  %4986 = vmatmul.mubr.f32.gmra.mrb[78].mxu1 %v2324_v59  ;;  %v6403_v60 = vmax.f32 %v2218_v55, %v2223_v21  ;;  %v2635_v59 = vld [vmem:[#allocation2 + $0x1e8] sm:$0xff] }
 0xa8a   :  { %4988 = vmatprep.mubr.msk.f32.mxu1 %vm5747_vm1, %v5748_v33  ;;  %5541 = vmatpush3.bf16.msra.mxu1 %v5910_v1 }
 0xa8b   :  { %v2224_v62 = vmul.f32 0.2, %v2219_v31  ;;  %4942 = vmatmul.mubr.f32.gmra.mrb[66].mxu0 %v6403_v60  ;;  %v2325_v49 = vmul.f32 %v6403_v60, %v6403_v60  ;;  %5542 = vmatprep.subr.bf16.mxu1 %v5746_v30 }
 0xa8c   :  { %4944 = vmatprep.mubr.msk.f32.mxu0 %vm5747_vm1, %v5748_v33 }
 0xa8d   :  { %4989 = vmatmul.mubr.f32.gmra.mrb[80].mxu1 %v2325_v49  ;;  %v6414_v63 = vmax.f32 %v2219_v31, %v2224_v62  ;;  %v2636_v31 = vld [vmem:[#allocation2 + $0x1f0] sm:$0xff] }
 0xa8e   :  { %4991 = vmatprep.mubr.msk.f32.mxu1 %vm5747_vm1, %v5748_v33  ;;  %5544 = vmatpush3.bf16.msra.mxu1 %v5916_v3 }
 0xa8f   :  { %4945 = vmatmul.mubr.f32.gmra.mrb[68].mxu0 %v6414_v63  ;;  %v2326_v12 = vmul.f32 %v6414_v63, %v6414_v63  ;;  %5545 = vmatprep.subr.bf16.mxu1 %v5746_v30 }
 0xa91   :  { %4992 = vmatmul.mubr.f32.gmra.mrb[82].mxu1 %v2326_v12 }
 0xa92   :  { %5074 = vmatprep.mubr.msk.f32.mxu1 %vm5747_vm1, %v5748_v33 }
 0xb52   :  { %v2298_v0 = vpop.f32.mrb[60].mxu0 }
 0xb53   :  { %v2417_v50 = vmul.f32 0.03125, %v2298_v0  ;;  %v4934_v23 = vpop.f32.mrb[61].mxu0 }
 0xb54   :  { %v2393_v6 = vpop.f32.mrb[74].mxu1 }
 0xb55   :  { %v2427_v39 = vmul.f32 %v2417_v50, %v2417_v50  ;;  %v2422_v7 = vmul.f32 0.03125, %v2393_v6  ;;  %v4981_v14 = vpop.f32.mrb[75].mxu1  ;;  %v2452_v58 = vsub.f32 0.0, %v2417_v50  ;;  %v5510_v6 = vpack.c.bf16 %v2636_v31, %v2635_v59  ;;  %v3935_v59 = vld [vmem:[%s6652_s2 + $0xe] ss:$0 sm:$0xff] }
 0xb56   :  { %v2303_v19 = vpop.f32.mrb[62].mxu0  ;;  %v2638_v14 = vld [vmem:[#allocation2 + $0x200] sm:$0xff] }
 0xb57   :  { %v2432_v37 = vsub.f32 %v2422_v7, %v2427_v39  ;;  %v2418_v24 = vmul.f32 0.03125, %v2303_v19  ;;  %v4937_v18 = vpop.f32.mrb[63].mxu0  ;;  %v2637_v7 = vld [vmem:[#allocation2 + $0x1f8] sm:$0xff] }
 0xb58   :  { %v2398_v61 = vpop.f32.mrb[76].mxu1  ;;  %v5513_v18 = vpack.c.bf16 %v2638_v14, %v2637_v7 }
 0xb59   :  { %v2437_v28 = vmax.f32 %v2432_v37, 0.0  ;;  %v2428_v29 = vmul.f32 %v2418_v24, %v2418_v24  ;;  %v2423_v13 = vmul.f32 0.03125, %v2398_v61  ;;  %v4984_v16 = vpop.f32.mrb[77].mxu1  ;;  %v2453_v39 = vsub.f32 0.0, %v2418_v24  ;;  %v2639_v61 = vld [vmem:[#allocation2 + $0x208] sm:$0xff] }
 0xb5a   :  { %v2308_v22 = vpop.f32.mrb[64].mxu0 }
 0xb5b   :  { %v2442_v15 = vadd.f32 1e-05, %v2437_v28  ;;  %v2433_v27 = vsub.f32 %v2423_v13, %v2428_v29  ;;  %v2419_v54 = vmul.f32 0.03125, %v2308_v22  ;;  %v4940_v25 = vpop.f32.mrb[65].mxu0  ;;  %v2640_v28 = vld [vmem:[#allocation2 + $0x210] sm:$0xff] }
 0xb5c   :  { %v2403_v17 = vpop.f32.mrb[78].mxu1  ;;  %v5516_v24 = vpack.c.bf16 %v2640_v28, %v2639_v61 }
 0xb5d   :  { %5684 = vrsqrt.f32 %v2442_v15  ;;  %v2438_v48 = vmax.f32 %v2433_v27, 0.0  ;;  %v2429_v2 = vmul.f32 %v2419_v54, %v2419_v54  ;;  %v4987_v53 = vpop.f32.mrb[79].mxu1  ;;  %v2424_v41 = vmul.f32 0.03125, %v2403_v17 }
 0xb5e   :  { %v2313_v35 = vpop.f32.mrb[66].mxu0  ;;  %v2454_v29 = vsub.f32 0.0, %v2419_v54 }
 0xb5f   :  { %v2443_v5 = vadd.f32 1e-05, %v2438_v48  ;;  %v2420_v42 = vmul.f32 0.03125, %v2313_v35  ;;  %v4943_v9 = vpop.f32.mrb[67].mxu0  ;;  %v2434_v34 = vsub.f32 %v2424_v41, %v2429_v2  ;;  %v2641_v48 = vld [vmem:[#allocation2 + $0x218] sm:$0xff]  ;;  %v2642_v2 = vld [vmem:[#allocation2 + $0x220] sm:$0xff] }
 0xb60   :  { %v2408_v36 = vpop.f32.mrb[80].mxu1  ;;  %v5519_v53 = vpack.c.bf16 %v2642_v2, %v2641_v48  ;;  %v2643_v41 = vld [vmem:[#allocation2 + $0x228] sm:$0xff]  ;;  %v2644_v35 = vld [vmem:[#allocation2 + $0x230] sm:$0xff]  ;;  %v2646_v9 = vld [vmem:[#allocation2 + $0x240] sm:$0xff] }
 0xb61   :  { %5686 = vrsqrt.f32 %v2443_v5  ;;  %v2430_v43 = vmul.f32 %v2420_v42, %v2420_v42  ;;  %v2425_v44 = vmul.f32 0.03125, %v2408_v36  ;;  %v4990_v20 = vpop.f32.mrb[81].mxu1  ;;  %v2439_v45 = vmax.f32 %v2434_v34, 0.0  ;;  %v2647_v36 = vld [vmem:[#allocation2 + $0x248] sm:$0xff] }
 0xb62   :  { %v2318_v4 = vpop.f32.mrb[68].mxu0  ;;  %v2455_v22 = vsub.f32 0.0, %v2420_v42  ;;  %v5522_v5 = vpack.c.bf16 %v2644_v35, %v2643_v41  ;;  %v2645_v42 = vld [vmem:[#allocation2 + $0x238] sm:$0xff] }
 0xb63   :  { %v2435_v10 = vsub.f32 %v2425_v44, %v2430_v43  ;;  %v2421_v47 = vmul.f32 0.03125, %v2318_v4  ;;  %v4946_v51 = vpop.f32.mrb[69].mxu0  ;;  %v2444_v52 = vadd.f32 1e-05, %v2439_v45  ;;  %v5525_v34 = vpack.c.bf16 %v2646_v9, %v2645_v42  ;;  %v2648_v43 = vld [vmem:[#allocation2 + $0x250] sm:$0xff]  ;;  %v2649_v20 = vld [vmem:[#allocation2 + $0x258] sm:$0xff] }
 0xb64   :  { %v2413_v11 = vpop.f32.mrb[82].mxu1  ;;  %v5528_v44 = vpack.c.bf16 %v2648_v43, %v2647_v36  ;;  %v2650_v45 = vld [vmem:[#allocation2 + $0x260] sm:$0xff] }
 0xb65   :  { %v2440_v55 = vmax.f32 %v2435_v10, 0.0  ;;  %v2431_v26 = vmul.f32 %v2421_v47, %v2421_v47  ;;  %v2426_v21 = vmul.f32 0.03125, %v2413_v11  ;;  %v4993_v57 = vpop.f32.mrb[83].mxu1  ;;  %5688 = vrsqrt.f32 %v2444_v52  ;;  %v5715_v10 = vld [vmem:[#allocation2 + $0x2e8] sm:$0x3] }
 0xb66   :  { %v2456_v25 = vsub.f32 0.0, %v2421_v47  ;;  %v5531_v4 = vpack.c.bf16 %v2650_v45, %v2649_v20 }
 0xb67   :  { %v5685_v62 = vpop.eup %5684  ;;  %v2445_v49 = vadd.f32 1e-05, %v2440_v55  ;;  %v2436_v12 = vsub.f32 %v2426_v21, %v2431_v26  ;;  %v3934_v26 = vld [vmem:[%s6652_s2 + $0xd] ss:$0 sm:$0xff] }
 0xb68   :  { %4996 = vmatprep.mubr.msk.f32.mxu0 %vm1221_vm6, %v5685_v62  ;;  %v2457_v0 = vmul.f32 %v5685_v62, %v2452_v58 }
 0xb69   :  { %5690 = vrsqrt.f32 %v2445_v49  ;;  %v2441_v23 = vmax.f32 %v2436_v12, 0.0 }
 0xb6b   :  { %v5687_v19 = vpop.eup %5686  ;;  %v2446_v37 = vadd.f32 1e-05, %v2441_v23 }
 0xb6c   :  { %4997 = vmatmul.mubr.msk.f32.vlgmr.msra.gmra.mrb[70].mxu0 %vm1221_vm6, %v5687_v19  ;;  %v2458_v50 = vmul.f32 %v5687_v19, %v2453_v39 }
 0xb6d   :  { %5692 = vrsqrt.f32 %v2446_v37  ;;  %5511 = vmatpush3.bf16.msra.mxu0 %v5510_v6 }
 0xb6e   :  { %5512 = vmatprep.subr.bf16.mxu0 %v5746_v30 }
 0xb6f   :  { %v5689_v13 = vpop.eup %5688 }
 0xb70   :  { %4999 = vmatprep.mubr.msk.f32.mxu0 %vm1221_vm6, %v5689_v13  ;;  %v2459_v16 = vmul.f32 %v5689_v13, %v2454_v29  ;;  %v3936_v13 = vld [vmem:[%s6652_s2 + $0xf] ss:$0 sm:$0xff] }
 0xb71   :  { %5514 = vmatpush3.bf16.msra.mxu0 %v5513_v18 }
 0xb72   :  { %5515 = vmatprep.subr.bf16.mxu0 %v5746_v30 }
 0xb73   :  { %v5691_v15 = vpop.eup %5690 }
 0xb74   :  { %5000 = vmatmul.mubr.msk.f32.gmra.mrb[72].mxu0 %vm1221_vm6, %v5691_v15  ;;  %v2460_v27 = vmul.f32 %v5691_v15, %v2455_v22 }
 0xb75   :  { %5517 = vmatpush3.bf16.msra.mxu0 %v5516_v24 }
 0xb76   :  { %5518 = vmatprep.subr.bf16.mxu0 %v5746_v30 }
 0xb77   :  { %v5693_v17 = vpop.eup %5692 }
 0xb78   :  { %5002 = vmatprep.mubr.msk.f32.mxu0 %vm1221_vm6, %v5693_v17  ;;  %v2461_v54 = vmul.f32 %v5693_v17, %v2456_v25 }
 0xb79   :  { %5003 = vmatmul.mubr.msk.f32.gmra.mrb[74].mxu0 %vm1221_vm6, %v2457_v0 }
 0xb7a   :  { %5005 = vmatprep.mubr.msk.f32.mxu0 %vm1221_vm6, %v2458_v50  ;;  %5520 = vmatpush3.bf16.msra.mxu0 %v5519_v53 }
 0xb7b   :  { %5521 = vmatprep.subr.bf16.mxu0 %v5746_v30 }
 0xb7d   :  { %5006 = vmatmul.mubr.msk.f32.gmra.mrb[76].mxu0 %vm1221_vm6, %v2459_v16 }
 0xb7e   :  { %5008 = vmatprep.mubr.msk.f32.mxu0 %vm1221_vm6, %v2460_v27  ;;  %5523 = vmatpush3.bf16.msra.mxu0 %v5522_v5 }
 0xb7f   :  { %5524 = vmatprep.subr.bf16.mxu0 %v5746_v30 }
 0xb81   :  { %5009 = vmatmul.mubr.msk.f32.gmra.mrb[78].mxu0 %vm1221_vm6, %v2461_v54 }
 0xb82   :  { %5043 = vmatprep.mubr.msk.f32.mxu0 %vm5747_vm1, %v5748_v33  ;;  %5526 = vmatpush3.bf16.msra.mxu0 %v5525_v34 }
 0xb83   :  { %5527 = vmatprep.subr.bf16.mxu0 %v5746_v30 }
 0xb86   :  { %5529 = vmatpush3.bf16.msra.mxu0 %v5528_v44 }
 0xb87   :  { %5530 = vmatprep.subr.bf16.mxu0 %v5746_v30 }
 0xb8a   :  { %5532 = vmatpush3.bf16.msra.mxu0 %v5531_v4 }
 0xb8b   :  { %5120 = vmatprep.subr.msk.mxu0 %vm697_vm3, %v5715_v10 }
 0xc3f   :  { %v4998_v47 = vpop.f32.mrb[70].mxu0 }
 0xc40   :  { %v2558_v51 = vpop.f32.mrb[71].mxu0  ;;  %v2608_v49 = vmul.f32 %v4998_v47, %v6380_v46 }
 0xc41   :  { %v2607_v55 = vmul.f32 %v2558_v51, %v6371_v32 }
 0xc47   :  { %v5001_v52 = vpop.f32.mrb[72].mxu0 }
 0xc48   :  { %v2568_v11 = vpop.f32.mrb[73].mxu0  ;;  %v2610_v7 = vmul.f32 %v5001_v52, %v6403_v60 }
 0xc49   :  { %v2609_v31 = vmul.f32 %v2568_v11, %v6392_v56 }
 0xc4c   :  { %v5004_v21 = vpop.f32.mrb[74].mxu0 }
 0xc4d   :  { %v2612_v57 = vadd.f32 %v5004_v21, %v2607_v55  ;;  %v2578_v58 = vpop.f32.mrb[75].mxu0 }
 0xc4e   :  { %v2611_v39 = vmul.f32 %v2578_v58, %v6414_v63 }
 0xc4f   :  { %v2621_v62 = vmul.f32 %v3934_v26, %v2612_v57 }
 0xc50   :  { %v5007_v12 = vpop.f32.mrb[76].mxu0 }
 0xc51   :  { %v2630_v0 = vadd.f32 %v3935_v59, %v2621_v62  ;;  %v2614_v23 = vadd.f32 %v5007_v12, %v2609_v31  ;;  %v2588_v32 = vpop.f32.mrb[77].mxu0 }
 0xc52   :  { %v2613_v6 = vadd.f32 %v2608_v49, %v2588_v32 }
 0xc53   :  { %5044 = vmatmul.mubr.f32.vlgmr.msra.gmra.mrb[80].mxu0 %v2630_v0  ;;  %v2623_v46 = vmul.f32 %v3934_v26, %v2614_v23 }
 0xc54   :  { %v2622_v14 = vmul.f32 %v3934_v26, %v2613_v6  ;;  %v5010_v19 = vpop.f32.mrb[78].mxu0  ;;  %5046 = vmatprep.mubr.msk.f32.mxu0 %vm5747_vm1, %v5748_v33  ;;  %5121 = vmatpush3.msk.msra.mxu0 %vm697_vm3, %v5715_v10 }
 0xc55   :  { %v2616_v56 = vadd.f32 %v5010_v19, %v2611_v39  ;;  %v2598_v37 = vpop.f32.mrb[79].mxu0  ;;  %v2632_v61 = vadd.f32 %v3935_v59, %v2623_v46 }
 0xc56   :  { %v2615_v50 = vadd.f32 %v2610_v7, %v2598_v37  ;;  %v2631_v18 = vadd.f32 %v3935_v59, %v2622_v14 }
 0xc57   :  { %v2625_v60 = vmul.f32 %v3934_v26, %v2616_v56 }
 0xc58   :  { %5047 = vmatmul.mubr.f32.gmra.mrb[82].mxu0 %v2631_v18  ;;  %v2624_v63 = vmul.f32 %v3934_v26, %v2615_v50 }
 0xc59   :  { %5049 = vmatprep.mubr.msk.f32.mxu0 %vm5747_vm1, %v5748_v33  ;;  %v2634_v29 = vadd.f32 %v3935_v59, %v2625_v60 }
 0xc5a   :  { %v2633_v28 = vadd.f32 %v3935_v59, %v2624_v63 }
 0xc5c   :  { %5050 = vmatmul.mubr.f32.gmra.mrb[84].mxu0 %v2632_v61 }
 0xc5d   :  { %5052 = vmatprep.mubr.msk.f32.mxu0 %vm5747_vm1, %v5748_v33 }
 0xc60   :  { %5053 = vmatmul.mubr.f32.gmra.mrb[86].mxu0 %v2633_v28 }
 0xc61   :  { %5055 = vmatprep.mubr.msk.f32.mxu0 %vm5747_vm1, %v5748_v33 }
 0xc64   :  { %5056 = vmatmul.mubr.f32.gmra.mrb[88].mxu0 %v2634_v29 }
 0xd26   :  { %v2722_v16 = vpop.f32.mrb[80].mxu0 }
 0xd27   :  { %v2723_v24 = vadd.f32 %v3936_v13, %v2722_v16  ;;  %v5045_v22 = vpop.f32.mrb[81].mxu0 }
 0xd29   :  { %v2746_v15 = vmul.f32 0.2, %v2723_v24 }
 0xd2b   :  { %v6468_v27 = vmax.f32 %v2723_v24, %v2746_v15  ;;  %v2727_v25 = vpop.f32.mrb[82].mxu0 }
 0xd2c   :  { %v2728_v17 = vadd.f32 %v3936_v13, %v2727_v25  ;;  %v5048_v54 = vpop.f32.mrb[83].mxu0 }
 0xd2d   :  { %5075 = vmatmul.mubr.msk.f32.vlgmr.msra.gmra.mrb[84].mxu1 %vm404_vm2, %v6468_v27 }
 0xd2e   :  { %v2747_v48 = vmul.f32 0.2, %v2728_v17  ;;  %5077 = vmatprep.mubr.msk.f32.mxu1 %vm5747_vm1, %v5748_v33  ;;  %5547 = vmatpush3.bf16.msra.mxu1 %v5872_v38 }
 0xd2f   :  { %v2732_v2 = vpop.f32.mrb[84].mxu0  ;;  %5548 = vmatprep.subr.bf16.mxu1 %v5746_v30 }
 0xd30   :  { %v6476_v53 = vmax.f32 %v2728_v17, %v2747_v48  ;;  %v2733_v41 = vadd.f32 %v3936_v13, %v2732_v2  ;;  %v5051_v35 = vpop.f32.mrb[85].mxu0 }
 0xd32   :  { %v2748_v5 = vmul.f32 0.2, %v2733_v41  ;;  %5078 = vmatmul.mubr.msk.f32.gmra.mrb[86].mxu1 %vm404_vm2, %v6476_v53 }
 0xd33   :  { %v2737_v42 = vpop.f32.mrb[86].mxu0  ;;  %5080 = vmatprep.mubr.msk.f32.mxu1 %vm5747_vm1, %v5748_v33  ;;  %5550 = vmatpush3.bf16.msra.mxu1 %v5875_v40 }
 0xd34   :  { %v6483_v9 = vmax.f32 %v2733_v41, %v2748_v5  ;;  %v2738_v38 = vadd.f32 %v3936_v13, %v2737_v42  ;;  %v5054_v34 = vpop.f32.mrb[87].mxu0  ;;  %5551 = vmatprep.subr.bf16.mxu1 %v5746_v30 }
 0xd36   :  { %v2749_v36 = vmul.f32 0.2, %v2738_v38  ;;  %5081 = vmatmul.mubr.msk.f32.gmra.mrb[88].mxu1 %vm404_vm2, %v6483_v9  ;;  %v2865_v10 = vmul.f32 %v6483_v9, %v6483_v9 }
 0xd37   :  { %v2742_v43 = vpop.f32.mrb[88].mxu0  ;;  %5083 = vmatprep.mubr.msk.f32.mxu1 %vm5747_vm1, %v5748_v33  ;;  %5553 = vmatpush3.bf16.msra.mxu1 %v5910_v1  ;;  %v2863_v1 = vmul.f32 %v6468_v27, %v6468_v27 }
 0xd38   :  { %v6491_v44 = vmax.f32 %v2738_v38, %v2749_v36  ;;  %v2743_v20 = vadd.f32 %v3936_v13, %v2742_v43  ;;  %v5057_v40 = vpop.f32.mrb[89].mxu0  ;;  %5554 = vmatprep.subr.bf16.mxu1 %v5746_v30 }
 0xd3a   :  { %v2750_v45 = vmul.f32 0.2, %v2743_v20  ;;  %5084 = vmatmul.mubr.msk.f32.gmra.mrb[90].mxu1 %vm404_vm2, %v6491_v44  ;;  %v2866_v47 = vmul.f32 %v6491_v44, %v6491_v44 }
 0xd3b   :  { %5086 = vmatprep.mubr.msk.f32.mxu1 %vm5747_vm1, %v5748_v33  ;;  %5556 = vmatpush3.bf16.msra.mxu1 %v5916_v3  ;;  %v2864_v3 = vmul.f32 %v6476_v53, %v6476_v53 }
 0xd3c   :  { %v6499_v4 = vmax.f32 %v2743_v20, %v2750_v45  ;;  %5557 = vmatprep.subr.bf16.mxu1 %v5746_v30 }
 0xd3e   :  { %5087 = vmatmul.mubr.msk.f32.gmra.mrb[92].mxu1 %vm404_vm2, %v6499_v4  ;;  %v2867_v51 = vmul.f32 %v6499_v4, %v6499_v4 }
 0xd3f   :  { %5105 = vmatprep.mubr.msk.f32.mxu1 %vm5747_vm1, %v5748_v33 }
 0xd42   :  { %5106 = vmatmul.mubr.msk.f32.vlgmr.msra.gmra.mrb[94].mxu1 %vm404_vm2, %v2863_v1 }
 0xd43   :  { %5108 = vmatprep.mubr.msk.f32.mxu1 %vm5747_vm1, %v5748_v33 }
 0xd46   :  { %5109 = vmatmul.mubr.msk.f32.gmra.mrb[96].mxu1 %vm404_vm2, %v2864_v3 }
 0xd47   :  { %5111 = vmatprep.mubr.msk.f32.mxu1 %vm5747_vm1, %v5748_v33 }
 0xd4a   :  { %5112 = vmatmul.mubr.msk.f32.gmra.mrb[98].mxu1 %vm404_vm2, %v2865_v10 }
 0xd4b   :  { %5114 = vmatprep.mubr.msk.f32.mxu1 %vm5747_vm1, %v5748_v33 }
 0xd4e   :  { %5115 = vmatmul.mubr.msk.f32.gmra.mrb[100].mxu1 %vm404_vm2, %v2866_v47 }
 0xd4f   :  { %5117 = vmatprep.mubr.msk.f32.mxu1 %vm5747_vm1, %v5748_v33 }
 0xd52   :  { %5118 = vmatmul.mubr.msk.f32.gmra.mrb[102].mxu1 %vm404_vm2, %v2867_v51 }
 0xd53   :  { %5153 = vmatprep.mubr.msk.f32.mxu1 %vm5747_vm1, %v5748_v33 }
 0xe00   :  { %v2839_v52 = vpop.f32.mrb[84].mxu1 }
 0xe01   :  { %v5076_v11 = vpop.f32.mrb[85].mxu1  ;;  %v2973_v62 = vmul.f32 0.03125, %v2839_v52 }
 0xe03   :  { %v2983_v0 = vmul.f32 %v2973_v62, %v2973_v62  ;;  %v3008_v36 = vsub.f32 0.0, %v2973_v62  ;;  %v3191_v62 = vld [vmem:[#allocation2 + $0x268] sm:$0xff] }
 0xe05   :  { %v2844_v55 = vpop.f32.mrb[86].mxu1 }
 0xe06   :  { %v5079_v26 = vpop.f32.mrb[87].mxu1  ;;  %v2974_v23 = vmul.f32 0.03125, %v2844_v55 }
 0xe08   :  { %v2984_v14 = vmul.f32 %v2974_v23, %v2974_v23  ;;  %v3009_v3 = vsub.f32 0.0, %v2974_v23  ;;  %v3194_v23 = vld [vmem:[#allocation2 + $0x280] sm:$0xff] }
 0xe09   :  { %v2849_v21 = vpop.f32.mrb[88].mxu1 }
 0xe0a   :  { %v5082_v57 = vpop.f32.mrb[89].mxu1  ;;  %v2975_v19 = vmul.f32 0.03125, %v2849_v21 }
 0xe0c   :  { %v2985_v60 = vmul.f32 %v2975_v19, %v2975_v19  ;;  %v3010_v52 = vsub.f32 0.0, %v2975_v19  ;;  %v3198_v19 = vld [vmem:[#allocation2 + $0x2a0] sm:$0xff] }
 0xe0d   :  { %v2854_v58 = vpop.f32.mrb[90].mxu1 }
 0xe0e   :  { %v5085_v59 = vpop.f32.mrb[91].mxu1  ;;  %v2976_v63 = vmul.f32 0.03125, %v2854_v58 }
 0xe10   :  { %v2986_v22 = vmul.f32 %v2976_v63, %v2976_v63  ;;  %v3011_v26 = vsub.f32 0.0, %v2976_v63 }
 0xe11   :  { %v2859_v31 = vpop.f32.mrb[92].mxu1 }
 0xe12   :  { %v5088_v49 = vpop.f32.mrb[93].mxu1  ;;  %v2977_v25 = vmul.f32 0.03125, %v2859_v31 }
 0xe13   :  { %v3192_v49 = vld [vmem:[#allocation2 + $0x270] sm:$0xff] }
 0xe14   :  { %v2987_v5 = vmul.f32 %v2977_v25, %v2977_v25  ;;  %v3012_v58 = vsub.f32 0.0, %v2977_v25 }
 0xe15   :  { %v2949_v12 = vpop.f32.mrb[94].mxu1 }
 0xe16   :  { %v2978_v32 = vmul.f32 0.03125, %v2949_v12  ;;  %v5107_v6 = vpop.f32.mrb[95].mxu1  ;;  %v5558_v12 = vpack.c.bf16 %v3192_v49, %v3191_v62 }
 0xe17   :  { %v3195_v6 = vld [vmem:[#allocation2 + $0x288] sm:$0xff] }
 0xe18   :  { %v2988_v39 = vsub.f32 %v2978_v32, %v2983_v0  ;;  %5559 = vmatpush3.bf16.msra.mxu1 %v5558_v12  ;;  %v3193_v0 = vld [vmem:[#allocation2 + $0x278] sm:$0xff] }
 0xe19   :  { %v2954_v7 = vpop.f32.mrb[96].mxu1  ;;  %5560 = vmatprep.subr.bf16.mxu1 %v5746_v30  ;;  %v5561_v32 = vpack.c.bf16 %v3194_v23, %v3193_v0 }
 0xe1a   :  { %v2993_v56 = vmax.f32 %v2988_v39, 0.0  ;;  %v2979_v37 = vmul.f32 0.03125, %v2954_v7  ;;  %v5110_v46 = vpop.f32.mrb[97].mxu1  ;;  %v3196_v39 = vld [vmem:[#allocation2 + $0x290] sm:$0xff] }
 0xe1b   :  { %v5564_v7 = vpack.c.bf16 %v3196_v39, %v3195_v6 }
 0xe1c   :  { %v2998_v50 = vadd.f32 1e-05, %v2993_v56  ;;  %v2989_v18 = vsub.f32 %v2979_v37, %v2984_v14  ;;  %5562 = vmatpush3.bf16.msra.mxu1 %v5561_v32  ;;  %v3197_v14 = vld [vmem:[#allocation2 + $0x298] sm:$0xff] }
 0xe1d   :  { %v2959_v61 = vpop.f32.mrb[98].mxu1  ;;  %5563 = vmatprep.subr.bf16.mxu1 %v5746_v30  ;;  %v5567_v56 = vpack.c.bf16 %v3198_v19, %v3197_v14 }
 0xe1e   :  { %5694 = vrsqrt.f32 %v2998_v50  ;;  %v2994_v28 = vmax.f32 %v2989_v18, 0.0  ;;  %v2980_v29 = vmul.f32 0.03125, %v2959_v61  ;;  %v5113_v13 = vpop.f32.mrb[99].mxu1  ;;  %v3958_v61 = vld [vmem:[%s6652_s2 + $0x10] ss:$0 sm:$0xff] }
 0xe20   :  { %v2999_v16 = vadd.f32 1e-05, %v2994_v28  ;;  %v2990_v24 = vsub.f32 %v2980_v29, %v2985_v60  ;;  %5565 = vmatpush3.bf16.msra.mxu1 %v5564_v7 }
 0xe21   :  { %v2964_v15 = vpop.f32.mrb[100].mxu1  ;;  %5566 = vmatprep.subr.bf16.mxu1 %v5746_v30  ;;  %v3959_v30 = vld [vmem:[%s6652_s2 + $0x11] ss:$0 sm:$0xff] }
 0xe22   :  { %5696 = vrsqrt.f32 %v2999_v16  ;;  %v2995_v17 = vmax.f32 %v2990_v24, 0.0  ;;  %v2981_v54 = vmul.f32 0.03125, %v2964_v15  ;;  %v5116_v48 = vpop.f32.mrb[101].mxu1 }
 0xe24   :  { %v3000_v2 = vadd.f32 1e-05, %v2995_v17  ;;  %v2991_v41 = vsub.f32 %v2981_v54, %v2986_v22  ;;  %5568 = vmatpush3.bf16.msra.mxu1 %v5567_v56 }
 0xe25   :  { %v2969_v35 = vpop.f32.mrb[102].mxu1 }
 0xe26   :  { %5698 = vrsqrt.f32 %v3000_v2  ;;  %v2996_v42 = vmax.f32 %v2991_v41, 0.0  ;;  %v2982_v38 = vmul.f32 0.03125, %v2969_v35  ;;  %v5119_v34 = vpop.f32.mrb[103].mxu1 }
 0xe28   :  { %v5695_v43 = vpop.eup %5694  ;;  %v3001_v20 = vadd.f32 1e-05, %v2996_v42  ;;  %v2992_v40 = vsub.f32 %v2982_v38, %v2987_v5 }
 0xe29   :  { %5122 = vmatprep.mubr.msk.f32.mxu0 %vm666_vm4, %v5695_v43  ;;  %v3013_v45 = vmul.f32 %v5695_v43, %v3008_v36 }
 0xe2a   :  { %5700 = vrsqrt.f32 %v3001_v20  ;;  %v2997_v1 = vmax.f32 %v2992_v40, 0.0 }
 0xe2c   :  { %v5697_v10 = vpop.eup %5696  ;;  %v3002_v47 = vadd.f32 1e-05, %v2997_v1  ;;  %v3960_v1 = vld [vmem:[%s6652_s2 + $0x12] ss:$0 sm:$0xff] }
 0xe2d   :  { %5123 = vmatmul.mubr.msk.f32.vlgmr.msra.gmra.mrb[90].mxu0 %vm666_vm4, %v5697_v10  ;;  %v3014_v51 = vmul.f32 %v5697_v10, %v3009_v3 }
 0xe2e   :  { %5702 = vrsqrt.f32 %v3002_v47 }
 0xe30   :  { %v5699_v11 = vpop.eup %5698 }
 0xe31   :  { %5125 = vmatprep.mubr.msk.f32.mxu0 %vm666_vm4, %v5699_v11  ;;  %v3015_v55 = vmul.f32 %v5699_v11, %v3010_v52 }
 0xe34   :  { %v5701_v21 = vpop.eup %5700 }
 0xe35   :  { %5126 = vmatmul.mubr.msk.f32.gmra.mrb[92].mxu0 %vm666_vm4, %v5701_v21  ;;  %v3016_v57 = vmul.f32 %v5701_v21, %v3011_v26 }
 0xe38   :  { %v5703_v59 = vpop.eup %5702 }
 0xe39   :  { %5128 = vmatprep.mubr.msk.f32.mxu0 %vm666_vm4, %v5703_v59  ;;  %v3017_v31 = vmul.f32 %v5703_v59, %v3012_v58 }
 0xe3a   :  { %5129 = vmatmul.mubr.msk.f32.gmra.mrb[94].mxu0 %vm666_vm4, %v3013_v45 }
 0xe3b   :  { %5131 = vmatprep.mubr.msk.f32.mxu0 %vm666_vm4, %v3014_v51 }
 0xe3e   :  { %5132 = vmatmul.mubr.msk.f32.gmra.mrb[96].mxu0 %vm666_vm4, %v3015_v55 }
 0xe3f   :  { %5134 = vmatprep.mubr.msk.f32.mxu0 %vm666_vm4, %v3016_v57 }
 0xe42   :  { %5135 = vmatmul.mubr.msk.f32.gmra.mrb[98].mxu0 %vm666_vm4, %v3017_v31 }
 0xf00   :  { %v5124_v37 = vpop.f32.mrb[90].mxu0 }
 0xf01   :  { %v3114_v46 = vpop.f32.mrb[91].mxu0  ;;  %v3164_v24 = vmul.f32 %v5124_v37, %v6476_v53 }
 0xf02   :  { %v3163_v63 = vmul.f32 %v3114_v46, %v6468_v27 }
 0xf08   :  { %v5127_v50 = vpop.f32.mrb[92].mxu0 }
 0xf09   :  { %v3124_v18 = vpop.f32.mrb[93].mxu0  ;;  %v3166_v48 = vmul.f32 %v5127_v50, %v6491_v44 }
 0xf0a   :  { %v3165_v13 = vmul.f32 %v3124_v18, %v6483_v9 }
 0xf0d   :  { %v5130_v60 = vpop.f32.mrb[94].mxu0 }
 0xf0e   :  { %v3168_v28 = vadd.f32 %v5130_v60, %v3163_v63  ;;  %v3134_v29 = vpop.f32.mrb[95].mxu0 }
 0xf0f   :  { %v3167_v54 = vmul.f32 %v3134_v29, %v6499_v4 }
 0xf10   :  { %v3177_v16 = vmul.f32 %v3958_v61, %v3168_v28 }
 0xf11   :  { %v5133_v22 = vpop.f32.mrb[96].mxu0 }
 0xf12   :  { %v3186_v15 = vadd.f32 %v3959_v30, %v3177_v16  ;;  %v3170_v25 = vadd.f32 %v5133_v22, %v3165_v13  ;;  %v3144_v27 = vpop.f32.mrb[97].mxu0 }
 0xf13   :  { %v3169_v17 = vadd.f32 %v3164_v24, %v3144_v27 }
 0xf14   :  { %5154 = vmatmul.mubr.msk.f32.vlgmr.msra.gmra.mrb[104].mxu1 %vm404_vm2, %v3186_v15  ;;  %v3179_v5 = vmul.f32 %v3958_v61, %v3170_v25 }
 0xf15   :  { %v3178_v2 = vmul.f32 %v3958_v61, %v3169_v17  ;;  %v5136_v41 = vpop.f32.mrb[98].mxu0  ;;  %5156 = vmatprep.mubr.msk.f32.mxu1 %vm5747_vm1, %v5748_v33 }
 0xf16   :  { %v3172_v9 = vadd.f32 %v5136_v41, %v3167_v54  ;;  %v3154_v35 = vpop.f32.mrb[99].mxu0  ;;  %v3188_v4 = vadd.f32 %v3959_v30, %v3179_v5  ;;  %v3447_v41 = vand.u32 127, %v61_v8 }
 0xf17   :  { %v3187_v53 = vadd.f32 %v3959_v30, %v3178_v2  ;;  %v3171_v42 = vadd.f32 %v3166_v48, %v3154_v35 }
 0xf18   :  { %v3181_v44 = vmul.f32 %v3958_v61, %v3172_v9 }
 0xf19   :  { %5157 = vmatmul.mubr.msk.f32.gmra.mrb[106].mxu1 %vm404_vm2, %v3187_v53  ;;  %v3180_v38 = vmul.f32 %v3958_v61, %v3171_v42 }
 0xf1a   :  { %5159 = vmatprep.mubr.msk.f32.mxu1 %vm5747_vm1, %v5748_v33  ;;  %v3190_v36 = vadd.f32 %v3959_v30, %v3181_v44 }
 0xf1b   :  { %v3189_v34 = vadd.f32 %v3959_v30, %v3180_v38 }
 0xf1d   :  { %5160 = vmatmul.mubr.msk.f32.gmra.mrb[108].mxu1 %vm404_vm2, %v3188_v4 }
 0xf1e   :  { %5162 = vmatprep.mubr.msk.f32.mxu1 %vm5747_vm1, %v5748_v33 }
 0xf21   :  { %5163 = vmatmul.mubr.msk.f32.gmra.mrb[110].mxu1 %vm404_vm2, %v3189_v34 }
 0xf22   :  { %5165 = vmatprep.mubr.msk.f32.mxu1 %vm5747_vm1, %v5748_v33 }
 0xf25   :  { %5166 = vmatmul.mubr.msk.f32.gmra.mrb[112].mxu1 %vm404_vm2, %v3190_v36 }
 0xfe7   :  { %v3285_v43 = vpop.f32.mrb[104].mxu1 }
 0xfe8   :  { %v5155_v20 = vpop.f32.mrb[105].mxu1  ;;  %v3286_v11 = vadd.f32 %v3960_v1, %v3285_v43 }
 0xfea   :  { %v3309_v12 = vmul.f32 %v3286_v11, %v3286_v11 }
 0xfec   :  { %v3290_v40 = vpop.f32.mrb[106].mxu1  ;;  %v3314_v23 = vsel %vm160_vm0, %v3309_v12, 0.0  ;;  %v3575_v12 = vld [vmem:[#allocation2 + $0x3a8] sm:$0xff] }
 0xfed   :  { %v5158_v45 = vpop.f32.mrb[107].mxu1  ;;  %v3291_v59 = vadd.f32 %v3960_v1, %v3290_v40 }
 0xfef   :  { %v3310_v6 = vmul.f32 %v3291_v59, %v3291_v59 }
 0xff0   :  { %v3295_v3 = vpop.f32.mrb[108].mxu1 }
 0xff1   :  { %v3296_v10 = vadd.f32 %v3960_v1, %v3295_v3  ;;  %v5161_v47 = vpop.f32.mrb[109].mxu1  ;;  %v3317_v39 = vsel %vm160_vm0, %v3310_v6, 0.0 }
 0xff2   :  { %v3573_v47 = vld [vmem:[#allocation2 + $0x398] sm:$0xff] }
 0xff3   :  { %v3311_v51 = vmul.f32 %v3296_v10, %v3296_v10 }
 0xff4   :  { %v3300_v52 = vpop.f32.mrb[110].mxu1 }
 0xff5   :  { %v3301_v55 = vadd.f32 %v3960_v1, %v3300_v52  ;;  %v5164_v26 = vpop.f32.mrb[111].mxu1  ;;  %v3320_v21 = vsel %vm160_vm0, %v3311_v51, 0.0  ;;  %v3574_v51 = vld [vmem:[#allocation2 + $0x3a0] sm:$0xff] }
 0xff6   :  { %3321 = vadd.xlane.f32.xlu1 %v3320_v21  ;;  %v5579_v52 = vpack.c.bf16 %v3574_v51, %v3573_v47 }
 0xff7   :  { %v3312_v57 = vmul.f32 %v3301_v55, %v3301_v55 }
 0xff8   :  { %v3305_v58 = vpop.f32.mrb[112].mxu1 }
 0xff9   :  { %v3306_v31 = vadd.f32 %v3960_v1, %v3305_v58  ;;  %v5167_v62 = vpop.f32.mrb[113].mxu1  ;;  %v3323_v49 = vsel %vm160_vm0, %v3312_v57, 0.0 }
 0xffa   :  { %3324 = vadd.xlane.f32.xlu0 %v3323_v49 }
 0xffb   :  { %v3313_v0 = vmul.f32 %v3306_v31, %v3306_v31 }
 0xffd   :  { %v3326_v32 = vsel %vm160_vm0, %v3313_v0, 0.0  ;;  %v3576_v0 = vld [vmem:[#allocation2 + $0x3b0] sm:$0xff] }
 0xffe   :  { %3315 = vadd.xlane.f32.xlu0 %v3314_v23  ;;  %3327 = vadd.xlane.f32.xlu1 %v3326_v32  ;;  %v5583_v32 = vpack.c.bf16 %v3576_v0, %v3575_v12 }
0x1002   :  { %3318 = vadd.xlane.f32.xlu1 %v3317_v39  ;;  %v3569_v39 = vld [vmem:[#allocation2 + $0x378] sm:$0xff] }
0x1083   :  { %v3322_v7 = vpop.xlane.xlu1 %3321 }
0x1084   :  { %v3331_v14 = vmax.f32 %v3322_v7, 1e-24  ;;  %v3570_v7 = vld [vmem:[#allocation2 + $0x380] sm:$0xff] }
0x1086   :  { %5704 = vrsqrt.f32 %v3331_v14  ;;  %v5587_v14 = vpack.c.bf16 %v3570_v7, %v3569_v39 }
0x1087   :  { %v3325_v19 = vpop.xlane.xlu0 %3324 }
0x1088   :  { %v3332_v56 = vmax.f32 %v3325_v19, 1e-24  ;;  %v3751_v19 = vld [vmem:[#allocation2 + $0x3b8] sm:$0xff] }
0x108a   :  { %5706 = vrsqrt.f32 %v3332_v56  ;;  %v3752_v56 = vld [vmem:[#allocation2 + $0x3c0] sm:$0xff] }
0x108b   :  { %v3316_v37 = vpop.xlane.xlu0 %3315  ;;  %v3328_v46 = vpop.xlane.xlu1 %3327 }
0x108c   :  { %v3329_v50 = vmax.f32 %v3316_v37, 1e-24  ;;  %v3333_v18 = vmax.f32 %v3328_v46, 1e-24  ;;  %v3753_v37 = vld [vmem:[#allocation2 + $0x3c8] sm:$0xff]  ;;  %v5595_v46 = vpack.c.bf16 %v3752_v56, %v3751_v19 }
0x108e   :  { %5708 = vrsqrt.f32 %v3329_v50  ;;  %v3754_v50 = vld [vmem:[#allocation2 + $0x3d0] sm:$0xff]  ;;  %5596 = vmatprep.subr.bf16.mxu1 %v5595_v46 }
0x108f   :  { %5710 = vrsqrt.f32 %v3333_v18  ;;  %v3319_v63 = vpop.xlane.xlu1 %3318  ;;  %v5599_v18 = vpack.c.bf16 %v3754_v50, %v3753_v37  ;;  %5598 = vmatpush3.bf16.msra.mxu1 %v5595_v46 }
0x1090   :  { %v5705_v61 = vpop.eup %5704  ;;  %v3330_v60 = vmax.f32 %v3319_v63, 1e-24  ;;  %v3572_v63 = vld [vmem:[#allocation2 + $0x390] sm:$0xff] }
0x1091   :  { %v3341_v28 = vmul.f32 %v5705_v61, %v3296_v10  ;;  %5600 = vmatprep.subr.bf16.mxu1 %v5599_v18 }
0x1092   :  { %5712 = vrsqrt.f32 %v3330_v60 }
0x1093   :  { %3346 = vst.msk [vmem:[%s6653_s3 + $0x10] sm:$0xff] %vm160_vm0, %v3341_v28  ;;  %5602 = vmatpush3.bf16.msra.mxu1 %v5599_v18 }
0x1094   :  { %v5707_v29 = vpop.eup %5706 }
0x1095   :  { %v3342_v30 = vmul.f32 %v5707_v29, %v3301_v55  ;;  %v3755_v29 = vld [vmem:[#allocation2 + $0x3d8] sm:$0xff] }
0x1097   :  { %3347 = vst.msk [vmem:[%s6653_s3 + $0x18] sm:$0xff] %vm160_vm0, %v3342_v30  ;;  %v5569_v13 = vpack.c.bf16 %v3342_v30, %v3341_v28  ;;  %v3756_v30 = vld [vmem:[#allocation2 + $0x3e0] sm:$0xff] }
0x1098   :  { %v5709_v16 = vpop.eup %5708 }
0x1099   :  { %v5711_v24 = vpop.eup %5710  ;;  %5571 = vmatprep.subr.msk.bf16.mxu0 %vm5570_vm7, %v5569_v13  ;;  %v6586_v22 = vmul.f32 %v5709_v16, %v3286_v11  ;;  %v3757_v16 = vld [vmem:[#allocation2 + $0x3e8] sm:$0xff] }
0x109a   :  { %5574 = vmatpush3.bf16.xpose.msk.msra.mxu0 %vm5570_vm7, %v5569_v13  ;;  %v3343_v15 = vmul.f32 %v5711_v24, %v3306_v31  ;;  %v3758_v24 = vld [vmem:[#allocation2 + $0x3f0] sm:$0xff] }
0x109b   :  { %3344 = vst.msk [vmem:[%s6653_s3] sm:$0xff] %vm160_vm0, %v6586_v22  ;;  %5174 = vmatprep.mubr.msk.f32.mxu0 %vm160_vm0, %v6586_v22 }
0x109c   :  { %v5713_v25 = vpop.eup %5712  ;;  %3348 = vst.msk [vmem:[%s6653_s3 + $0x20] sm:$0xff] %vm160_vm0, %v3343_v15  ;;  %5172 = vmatprep.subr.msk.mxu0 %vm160_vm0, %v3343_v15 }
0x109d   :  { %v6600_v27 = vmul.f32 %v5713_v25, %v3291_v59  ;;  %v3979_v25 = vld [vmem:[%s6652_s2 + $0x13] ss:$0 sm:$0xff] }
0x109f   :  { %3345 = vst.msk [vmem:[%s6653_s3 + $0x8] sm:$0xff] %vm160_vm0, %v6600_v27 }
0x10a2   :  { %5173 = vmatpush3.xpose.msk.msra.mxu0 %vm160_vm0, %v3343_v15 }
0x10a3   :  { %5576 = vmatprep.subr.bf16.mxu0 %v5569_v13 }
0x10a5   :  { %5175 = vmatmul.mubr.msk.f32.vlgmr.msra.gmra.mrb[100].mxu0 %vm160_vm0, %v6600_v27 }
0x10a6   :  { %5578 = vmatpush3.bf16.msra.mxu0 %v5569_v13  ;;  %v5603_v13 = vpack.c.bf16 %v3756_v30, %v3755_v29 }
0x10a7   :  { %5181 = vmatprep.subr.mxu0 %v3343_v15 }
0x10a8   :  { %5604 = vmatprep.subr.bf16.mxu1 %v5603_v13 }
0x10a9   :  { %5606 = vmatpush3.bf16.msra.mxu1 %v5603_v13 }
0x10aa   :  { %5182 = vmatpush3.msra.mxu0 %v3343_v15  ;;  %v5607_v15 = vpack.c.bf16 %v3758_v24, %v3757_v16 }
0x10ab   :  { %5580 = vmatprep.subr.bf16.mxu0 %v5579_v52 }
0x10ac   :  { %5608 = vmatprep.subr.bf16.mxu1 %v5607_v15 }
0x10ad   :  { %5610 = vmatpush3.bf16.msra.mxu1 %v5607_v15 }
0x1178   :  { %v5176_v17 = vpop.f32.mrb[100].mxu0 }
0x1179   :  { %v3430_v54 = vpop.f32.mrb[101].mxu0  ;;  %v3443_v48 = vsel %vm3439_vm8, %v5176_v17, -inf }
0x117a   :  { %3444 = vmax.xlane.f32.xlu1 %v3443_v48  ;;  %v3440_v2 = vsel %vm3439_vm8, %v3430_v54, -inf }
0x117b   :  { %3441 = vmax.xlane.f32.xlu0 %v3440_v2 }
0x1207   :  { %v6613_v9 = vpop.xlane.xlu1 %3444 }
0x1208   :  { %vm3449_vm9 = vcmp.ge.f32.partialorder %v5176_v17, %v6613_v9  ;;  %v6616_v35 = vpop.xlane.xlu0 %3441 }
0x1209   :  { %v3451_v5 = vsel %vm3449_vm9, %v3447_v41, 24  ;;  %vm3448_vm10 = vcmp.ge.f32.partialorder %v3430_v54, %v6616_v35  ;;  %v3738_v17 = vmul.f32 %v3979_v25, %v6616_v35 }
0x120a   :  { %v3450_v53 = vsel %vm3448_vm10, %v3447_v41, 24  ;;  %v3467_v42 = vsel %vm3439_vm8, %v3451_v5, 2147483647 }
0x120b   :  { %v3469_v4 = vshra.s32 %v3467_v42, 16  ;;  %v3452_v38 = vsel %vm3439_vm8, %v3450_v53, 2147483647  ;;  %v3468_v8 = vand.u32 65535, %v3467_v42 }
0x120c   :  { %v3454_v44 = vshra.s32 %v3452_v38, 16  ;;  %v3453_v43 = vand.u32 65535, %v3452_v38 }
0x120d   :  { %v3471_v34 = vcvt.s32.f32 %v3469_v4  ;;  %v3470_v40 = vcvt.s32.f32 %v3468_v8 }
0x120e   :  { %v3456_v36 = vcvt.s32.f32 %v3454_v44  ;;  %v3455_v1 = vcvt.s32.f32 %v3453_v43 }
0x120f   :  { %3472 = vmin.xlane.f32.xlu1 %v3471_v34 }
0x1210   :  { %3457 = vmin.xlane.f32.xlu0 %v3456_v36 }
0x129c   :  { %v3473_v20 = vpop.xlane.xlu1 %3472 }
0x129d   :  { %v3458_v45 = vpop.xlane.xlu0 %3457  ;;  %vm3474_vm11 = vcmp.eq.f32.partialorder %v3471_v34, %v3473_v20  ;;  %v3479_v11 = vcvt.f32.s32 %v3473_v20 }
0x129e   :  { %v3475_v3 = vsel %vm3474_vm11, %v3470_v40, inf  ;;  %vm3459_vm12 = vcmp.eq.f32.partialorder %v3456_v36, %v3458_v45  ;;  %v3464_v55 = vcvt.f32.s32 %v3458_v45 }
0x129f   :  { %3476 = vmin.xlane.f32.xlu1 %v3475_v3  ;;  %v3460_v10 = vsel %vm3459_vm12, %v3455_v1, inf  ;;  %v3480_v21 = vshll.u32 %v3479_v11, 16 }
0x12a0   :  { %3461 = vmin.xlane.f32.xlu0 %v3460_v10  ;;  %v3465_v59 = vshll.u32 %v3464_v55, 16 }
0x132c   :  { %v3477_v26 = vpop.xlane.xlu1 %3476 }
0x132d   :  { %v3478_v57 = vcvt.f32.s32 %v3477_v26  ;;  %v3462_v58 = vpop.xlane.xlu0 %3461 }
0x132e   :  { %v3463_v31 = vcvt.f32.s32 %v3462_v58 }
0x132f   :  { %v3481_v62 = vadd.s32 %v3480_v21, %v3478_v57 }
0x1330   :  { %v3466_v49 = vadd.s32 %v3465_v59, %v3463_v31 }
0x1331   :  { %vm3483_vm13 = vcmp.eq.s32.totalorder %v3447_v41, %v3481_v62 }
0x1332   :  { %vm3482_vm14 = vcmp.eq.s32.totalorder %v3447_v41, %v3466_v49  ;;  %v3972_v6 = vsel %vm3483_vm13, 1.0, %v5748_v33 }
0x1333   :  { %v3971_v23 = vsel %vm3482_vm14, 1.0, %v5748_v33  ;;  %v3571_v33 = vld [vmem:[#allocation2 + $0x388] sm:$0xff] }
0x1334   :  { %5183 = vmatprep.mubr.msk.f32.mxu0 %vm3439_vm8, %v3971_v23  ;;  %v5591_v28 = vpack.c.bf16 %v3572_v63, %v3571_v33 }
0x1335   :  { %5184 = vmatmul.mubr.msk.f32.vlgmr.msra.gmra.mrb[102].mxu0 %vm3439_vm8, %v3972_v6 }
0x1336   :  { %5582 = vmatpush3.bf16.msra.mxu0 %v5579_v52 }
0x1337   :  { %5584 = vmatprep.subr.bf16.mxu0 %v5583_v32 }
0x133a   :  { %5586 = vmatpush3.bf16.msra.mxu0 %v5583_v32 }
0x133b   :  { %5588 = vmatprep.subr.bf16.mxu0 %v5587_v14 }
0x1408   :  { %v5185_v61 = vpop.f32.mrb[102].mxu0 }
0x1409   :  { %v3560_v60 = vpop.f32.mrb[103].mxu0 }
0x140a   :  { %5194 = vmatprep.mubr.msk.f32.mxu0 %vm160_vm0, %v3560_v60 }
0x140b   :  { %5195 = vmatmul.mubr.msk.f32.vlgmr.msra.gmra.mrb[104].mxu0 %vm160_vm0, %v5185_v61 }
0x140c   :  { %5590 = vmatpush3.bf16.msra.mxu0 %v5587_v14  ;;  %5205 = vmatprep.mubr.msk.f32.mxu0 %vm160_vm0, %v6586_v22  ;;  %v3739_v22 = vmul.f32 %v3979_v25, %v6613_v9  ;;  %v3981_v9 = vld [vmem:[%s6652_s2 + $0x15] ss:$0 sm:$0xff] }
0x140d   :  { %5592 = vmatprep.subr.bf16.mxu0 %v5591_v28 }
0x1410   :  { %5594 = vmatpush3.bf16.msra.mxu0 %v5591_v28 }
0x1413   :  { %5206 = vmatmul.mubr.msk.f32.vlgmr.msra.gmra.mrb[104].mxu0 %vm160_vm0, %v6600_v27  ;;  %v3980_v27 = vld [vmem:[%s6652_s2 + $0x14] ss:$0 sm:$0xff] }
0x14e6   :  { %v5207_v54 = vpop.f32.mrb[104].mxu0 }
0x14e7   :  { %v3741_v48 = vadd.f32 %v5207_v54, %v3739_v22  ;;  %v3724_v2 = vpop.f32.mrb[105].mxu0 }
0x14e8   :  { %v3740_v41 = vadd.f32 %v3738_v17, %v3724_v2 }
0x14e9   :  { %v3748_v5 = vadd.f32 %v3980_v27, %v3741_v48 }
0x14ea   :  { %v3747_v53 = vadd.f32 %v3980_v27, %v3740_v41 }
0x14eb   :  { %v3750_v4 = vmax.f32 %v3748_v5, 0.0 }
0x14ec   :  { %v3749_v42 = vmax.f32 %v3747_v53, 0.0 }
0x14ee   :  { %5224 = vmatprep.mubr.msk.f32.mxu1 %vm404_vm2, %v3749_v42 }
0x14ef   :  { %5225 = vmatmul.mubr.msk.f32.vlgmr.msra.gmra.mrb[114].mxu1 %vm404_vm2, %v3750_v4 }
0x15c2   :  { %v5226_v35 = vpop.f32.mrb[114].mxu1 }
0x15c3   :  { %v3842_v38 = vadd.f32 %v5226_v35, %v3981_v9  ;;  %v3836_v44 = vpop.f32.mrb[115].mxu1 }
0x15c4   :  { %v3837_v34 = vadd.f32 %v3981_v9, %v3836_v44 }
0x15c5   :  { %3847 = vst.msk [vmem:[%s6654_s4 + $0x8] sm:$0xff] %vm3845_vm15, %v3842_v38 }
0x15c6   :  { %3846 = vst.msk [vmem:[%s6654_s4] sm:$0xff] %vm3845_vm15, %v3837_v34 }
0x15c7   :  { %3856 = vsyncpa [#allocation3], 1 }

</bundles_post_ra>
